<compile_context>
chip_gen: v5e
topology: v5e:2x2
jax: 0.10.0
libtpu: 0.0.40
codegen_flags: <defaults>
</compile_context>

<pallas_src>
import functools

import jax
import jax.numpy as jnp
from jax import lax
from jax.experimental import pallas as pl
from jax.experimental.pallas import tpu as pltpu


def _fused_residual_block_kernel(x_ref, w_ref, p_ref, o_ref, *, W, kernel_sizes, eps):
    """Fused ResidualBlock forward on (C, N*H*W) lane-dense slabs.

    x_ref : (Cin, M)                 input activations, M = N*H*W (W fastest)
    w_ref : (Cout, K1*Cin + K2*Cout + K3*Cout + Cin)  packed conv weights;
            within a stage, column j*Ci + ci holds w[j, ci, :]
    p_ref : (Cout, 8)                packed BN params [g1,be1,g2,be2,g3,be3,gs,bes]
    o_ref : (Cout, M)                output activations
    """
    Cout, M = o_ref.shape
    Cin = x_ref.shape[0]
    k1, k2, k3 = kernel_sizes
    max_half = max(kernel_sizes) // 2

    # Column-within-row index, generated in-kernel (no host-built array / DMA).
    i = lax.broadcasted_iota(jnp.int32, (1, M), 1)
    if (W & (W - 1)) == 0:
        col = i & (W - 1)
    else:
        col = i % W  # TODO(synk): verify vector integer-mod lowering for non-pow2 W.

    # One mask per tap offset d != 0: the tap reads 'same'-padding zeros when
    # its source column falls outside [0, W) of the row.  Because M is a
    # multiple of W, lanes wrapped by the roll always land on masked columns.
    masks = {}
    for d in range(-max_half, max_half + 1):
        if d < 0:
            masks[d] = col >= -d
        elif d > 0:
            masks[d] = col < (W - d)

    x = x_ref[...]

    def conv_bn(x_in, woff, K, pidx, relu, residual=None):
        cin = x_in.shape[0]
        half = K // 2

        # 1xK conv as K*cin rank-1 exact-f32 VPU FMAs on roll-shifted slabs:
        #   acc[co, m] += w[j, ci, co] * x[ci, m + (j - half)]
        acc = jnp.zeros((Cout, M), jnp.float32)
        for j in range(K):
            d = j - half
            if d == 0:
                xs = x_in
            else:
                xs = pltpu.roll(x_in, shift=(-d) % M, axis=1)   # XLU lane rotate
                xs = jnp.where(masks[d], xs, 0.0)               # one select per shift
            base = woff + j * cin
            for ci in range(cin):
                w_col = w_ref[:, base + ci:base + ci + 1]       # (Cout, 1)
                acc = acc + w_col * xs[ci:ci + 1, :]            # (Cout, M) VPU FMA
        # (conv bias omitted: training-mode BN mean subtraction cancels it exactly)

        # BatchNorm2d training-mode forward, one-pass stats, folded to one FMA.
        mean = jnp.mean(acc, axis=1, keepdims=True)             # (Cout, 1)
        mean_sq = jnp.mean(acc * acc, axis=1, keepdims=True)    # (Cout, 1)
        var = mean_sq - mean * mean
        g = p_ref[:, 2 * pidx:2 * pidx + 1]
        be = p_ref[:, 2 * pidx + 1:2 * pidx + 2]
        scale = g * lax.rsqrt(var + eps)                        # EUP rsqrt
        shift = be - mean * scale
        y = acc * scale + shift
        if residual is not None:
            y = y + residual
        if relu:
            y = jnp.maximum(y, 0.0)
        return y

    # Static column offsets into the packed weight matrix.
    off1 = 0
    off2 = off1 + k1 * Cin
    off3 = off2 + k2 * Cout
    offs = off3 + k3 * Cout

    h = conv_bn(x, off1, k1, 0, relu=True)
    h = conv_bn(h, off2, k2, 1, relu=True)
    s = conv_bn(x, offs, 1, 3, relu=False)                      # 1x1 skip branch
    h = conv_bn(h, off3, k3, 2, relu=True, residual=s)          # bn3 + skip, final ReLU
    o_ref[...] = h.astype(o_ref.dtype)


def residual_block_forward(x_nchw, params, kernel_sizes=(9, 5, 3), eps=1e-5):
    """Pallas implementation of ResidualBlock.forward (NCHW in / NCHW out)."""
    assert all(k % 2 == 1 for k in kernel_sizes), "odd kernel sizes expected"
    N, Cin, H, W = x_nchw.shape
    Cout = params["g1"].shape[0]
    M = N * H * W
    assert max(kernel_sizes) // 2 < W

    # Lane-dense layout: channels on sublanes, flattened spatial (W fastest) on lanes.
    x2d = jnp.transpose(x_nchw, (1, 0, 2, 3)).reshape(Cin, M)

    def wmat(w):   # (K, Ci, Co) -> (Co, K*Ci); column j*Ci + ci holds w[j, ci, :]
        K, Ci, Co = w.shape
        return jnp.transpose(w.reshape(K * Ci, Co))

    # Pack all conv weights into one matrix and all BN params into one matrix:
    # 3 input DMAs total instead of 18.
    w_pack = jnp.concatenate(
        [wmat(params["w1"]), wmat(params["w2"]), wmat(params["w3"]), wmat(params["ws"])],
        axis=1)                                                          # (Cout, sum K*Ci)
    p_pack = jnp.stack(
        [params["g1"], params["be1"], params["g2"], params["be2"],
         params["g3"], params["be3"], params["gs"], params["bes"]], axis=1)  # (Cout, 8)

    kernel = functools.partial(
        _fused_residual_block_kernel,
        W=W, kernel_sizes=tuple(kernel_sizes), eps=eps)

    vmem = pl.BlockSpec(memory_space=pltpu.MemorySpace.VMEM)
    out2d = pl.pallas_call(
        kernel,
        out_shape=jax.ShapeDtypeStruct((Cout, M), jnp.float32),
        in_specs=[vmem, vmem, vmem],
        out_specs=vmem,
    )(x2d, w_pack, p_pack)

    return jnp.transpose(out2d.reshape(Cout, N, H, W), (1, 0, 2, 3))


def init_params(key, cin, cout, kernel_sizes=(9, 5, 3)):
    """Deterministic synthetic parameters. Conv weights stored as (K, Cin, Cout)."""
    specs = [("1", kernel_sizes[0], cin),
             ("2", kernel_sizes[1], cout),
             ("3", kernel_sizes[2], cout),
             ("s", 1, cin)]
    params = {}
    for i, (name, k, ci) in enumerate(specs):
        kk = jax.random.fold_in(key, i)
        kw, kb, kg, kbe = jax.random.split(kk, 4)
        params[f"w{name}"] = 0.1 * jax.random.normal(kw, (k, ci, cout), jnp.float32)
        params[f"b{name}"] = 0.1 * jax.random.normal(kb, (cout,), jnp.float32)
        params[f"g{name}"] = 1.0 + 0.1 * jax.random.normal(kg, (cout,), jnp.float32)
        params[f"be{name}"] = 0.1 * jax.random.normal(kbe, (cout,), jnp.float32)
    return params


def ref_forward(x, params, kernel_sizes=(9, 5, 3), eps=1e-5):
    """Pure-JAX reference (mirrors the PyTorch forward) for correctness checking."""
    dn = ("NCHW", "OIHW", "NCHW")

    def conv(h, w, b):
        wk = jnp.transpose(w, (2, 1, 0))[:, :, None, :]  # (Cout, Cin, 1, K)
        y = jax.lax.conv_general_dilated(h, wk, (1, 1), "VALID",
                                         dimension_numbers=dn,
                                         precision=jax.lax.Precision.HIGHEST)
        return y + b[None, :, None, None]

    def bn(h, g, be):
        m = jnp.mean(h, axis=(0, 2, 3), keepdims=True)
        v = jnp.mean((h - m) ** 2, axis=(0, 2, 3), keepdims=True)
        return (h - m) * jax.lax.rsqrt(v + eps) * g[None, :, None, None] \
            + be[None, :, None, None]

    def padw(h, p):
        return jnp.pad(h, ((0, 0), (0, 0), (0, 0), (p, p)))

    k1, k2, k3 = kernel_sizes
    h = jax.nn.relu(bn(conv(padw(x, k1 // 2), params["w1"], params["b1"]),
                       params["g1"], params["be1"]))
    h = jax.nn.relu(bn(conv(padw(h, k2 // 2), params["w2"], params["b2"]),
                       params["g2"], params["be2"]))
    h = bn(conv(padw(h, k3 // 2), params["w3"], params["b3"]),
           params["g3"], params["be3"])
    s = bn(conv(x, params["ws"], params["bs"]), params["gs"], params["bes"])
    return jax.nn.relu(h + s)


if __name__ == "__main__":
    key = jax.random.PRNGKey(0)
    N, Cin, H, W = 2, 4, 16, 16
    Cout = 8
    kernel_sizes = (9, 5, 3)

    pkey, xkey = jax.random.split(key)
    params = init_params(pkey, Cin, Cout, kernel_sizes)
    x = jax.random.normal(xkey, (N, Cin, H, W), jnp.float32)

    out = residual_block_forward(x, params, kernel_sizes)
    out = jax.block_until_ready(out)

    assert out.shape == (N, Cout, H, W), out.shape
    ref = ref_forward(x, params, kernel_sizes)
    max_err = float(jnp.max(jnp.abs(out - ref)))
    assert max_err < 1e-2, f"max abs error {max_err}"

    print("KERNEL_OK")
</pallas_src>

<mosaic_0001>
module attributes {stable_mosaic.version = 11 : i64} {
  func.func @_fused_residual_block_kernel(%arg0: memref<4x512xf32, #tpu.memory_space<vmem>>, %arg1: memref<8x104xf32, #tpu.memory_space<vmem>>, %arg2: memref<8x8xf32, #tpu.memory_space<vmem>>, %arg3: memref<8x512xf32, #tpu.memory_space<vmem>>) attributes {dimension_semantics = [], scalar_prefetch = 0 : i64, scratch_operands = 0 : i64, tpu.core_type = #tpu.core_type<tc>} {
    %0 = tpu.iota {dimensions = array<i32: 1>} : vector<1x512xi32>
    %c15_i32 = arith.constant 15 : i32
    %1 = vector.broadcast %c15_i32 : i32 to vector<1x512xi32>
    %2 = arith.andi %0, %1 : vector<1x512xi32>
    %c4_i32 = arith.constant 4 : i32
    %3 = vector.broadcast %c4_i32 : i32 to vector<1x512xi32>
    %4 = arith.cmpi sge, %2, %3 : vector<1x512xi32>
    %c3_i32 = arith.constant 3 : i32
    %5 = vector.broadcast %c3_i32 : i32 to vector<1x512xi32>
    %6 = arith.cmpi sge, %2, %5 : vector<1x512xi32>
    %c2_i32 = arith.constant 2 : i32
    %7 = vector.broadcast %c2_i32 : i32 to vector<1x512xi32>
    %8 = arith.cmpi sge, %2, %7 : vector<1x512xi32>
    %c1_i32 = arith.constant 1 : i32
    %9 = vector.broadcast %c1_i32 : i32 to vector<1x512xi32>
    %10 = arith.cmpi sge, %2, %9 : vector<1x512xi32>
    %c15_i32_0 = arith.constant 15 : i32
    %11 = vector.broadcast %c15_i32_0 : i32 to vector<1x512xi32>
    %12 = arith.cmpi slt, %2, %11 : vector<1x512xi32>
    %c14_i32 = arith.constant 14 : i32
    %13 = vector.broadcast %c14_i32 : i32 to vector<1x512xi32>
    %14 = arith.cmpi slt, %2, %13 : vector<1x512xi32>
    %c13_i32 = arith.constant 13 : i32
    %15 = vector.broadcast %c13_i32 : i32 to vector<1x512xi32>
    %16 = arith.cmpi slt, %2, %15 : vector<1x512xi32>
    %c12_i32 = arith.constant 12 : i32
    %17 = vector.broadcast %c12_i32 : i32 to vector<1x512xi32>
    %18 = arith.cmpi slt, %2, %17 : vector<1x512xi32>
    %c0 = arith.constant 0 : index
    %c0_1 = arith.constant 0 : index
    %19 = vector.load %arg0[%c0, %c0_1] : memref<4x512xf32, #tpu.memory_space<vmem>>, vector<4x512xf32>
    %cst = arith.constant 0.000000e+00 : f32
    %20 = vector.broadcast %cst : f32 to vector<8x512xf32>
    %c4_i32_2 = arith.constant 4 : i32
    %21 = tpu.dynamic_rotate %19 by %c4_i32_2 dim 1 : vector<4x512xf32>, i32 -> vector<4x512xf32>
    %cst_3 = arith.constant 0.000000e+00 : f32
    %22 = vector.shape_cast %4 : vector<1x512xi1> to vector<1x512xi1>
    %23 = vector.broadcast %22 : vector<1x512xi1> to vector<4x512xi1>
    %24 = vector.broadcast %cst_3 : f32 to vector<4x512xf32>
    %25 = arith.select %23, %21, %24 : vector<4x512xi1>, vector<4x512xf32>
    %c0_4 = arith.constant 0 : index
    %c0_5 = arith.constant 0 : index
    %26 = vector.load %arg1[%c0_4, %c0_5] : memref<8x104xf32, #tpu.memory_space<vmem>>, vector<8x1xf32>
    %27 = vector.extract_strided_slice %25 {offsets = [0, 0], sizes = [1, 512], strides = [1, 1]} : vector<4x512xf32> to vector<1x512xf32>
    %28 = vector.broadcast %26 : vector<8x1xf32> to vector<8x512xf32>
    %29 = vector.broadcast %27 : vector<1x512xf32> to vector<8x512xf32>
    %30 = arith.mulf %28, %29 : vector<8x512xf32>
    %31 = arith.addf %20, %30 : vector<8x512xf32>
    %c0_6 = arith.constant 0 : index
    %c1 = arith.constant 1 : index
    %32 = vector.load %arg1[%c0_6, %c1] : memref<8x104xf32, #tpu.memory_space<vmem>>, vector<8x1xf32>
    %33 = vector.extract_strided_slice %25 {offsets = [1, 0], sizes = [1, 512], strides = [1, 1]} : vector<4x512xf32> to vector<1x512xf32>
    %34 = vector.broadcast %32 : vector<8x1xf32> to vector<8x512xf32>
    %35 = vector.broadcast %33 : vector<1x512xf32> to vector<8x512xf32>
    %36 = arith.mulf %34, %35 : vector<8x512xf32>
    %37 = arith.addf %31, %36 : vector<8x512xf32>
    %c0_7 = arith.constant 0 : index
    %c2 = arith.constant 2 : index
    %38 = vector.load %arg1[%c0_7, %c2] : memref<8x104xf32, #tpu.memory_space<vmem>>, vector<8x1xf32>
    %39 = vector.extract_strided_slice %25 {offsets = [2, 0], sizes = [1, 512], strides = [1, 1]} : vector<4x512xf32> to vector<1x512xf32>
    %40 = vector.broadcast %38 : vector<8x1xf32> to vector<8x512xf32>
    %41 = vector.broadcast %39 : vector<1x512xf32> to vector<8x512xf32>
    %42 = arith.mulf %40, %41 : vector<8x512xf32>
    %43 = arith.addf %37, %42 : vector<8x512xf32>
    %c0_8 = arith.constant 0 : index
    %c3 = arith.constant 3 : index
    %44 = vector.load %arg1[%c0_8, %c3] : memref<8x104xf32, #tpu.memory_space<vmem>>, vector<8x1xf32>
    %45 = vector.extract_strided_slice %25 {offsets = [3, 0], sizes = [1, 512], strides = [1, 1]} : vector<4x512xf32> to vector<1x512xf32>
    %46 = vector.broadcast %44 : vector<8x1xf32> to vector<8x512xf32>
    %47 = vector.broadcast %45 : vector<1x512xf32> to vector<8x512xf32>
    %48 = arith.mulf %46, %47 : vector<8x512xf32>
    %49 = arith.addf %43, %48 : vector<8x512xf32>
    %c3_i32_9 = arith.constant 3 : i32
    %50 = tpu.dynamic_rotate %19 by %c3_i32_9 dim 1 : vector<4x512xf32>, i32 -> vector<4x512xf32>
    %cst_10 = arith.constant 0.000000e+00 : f32
    %51 = vector.shape_cast %6 : vector<1x512xi1> to vector<1x512xi1>
    %52 = vector.broadcast %51 : vector<1x512xi1> to vector<4x512xi1>
    %53 = vector.broadcast %cst_10 : f32 to vector<4x512xf32>
    %54 = arith.select %52, %50, %53 : vector<4x512xi1>, vector<4x512xf32>
    %c0_11 = arith.constant 0 : index
    %c4 = arith.constant 4 : index
    %55 = vector.load %arg1[%c0_11, %c4] : memref<8x104xf32, #tpu.memory_space<vmem>>, vector<8x1xf32>
    %56 = vector.extract_strided_slice %54 {offsets = [0, 0], sizes = [1, 512], strides = [1, 1]} : vector<4x512xf32> to vector<1x512xf32>
    %57 = vector.broadcast %55 : vector<8x1xf32> to vector<8x512xf32>
    %58 = vector.broadcast %56 : vector<1x512xf32> to vector<8x512xf32>
    %59 = arith.mulf %57, %58 : vector<8x512xf32>
    %60 = arith.addf %49, %59 : vector<8x512xf32>
    %c0_12 = arith.constant 0 : index
    %c5 = arith.constant 5 : index
    %61 = vector.load %arg1[%c0_12, %c5] : memref<8x104xf32, #tpu.memory_space<vmem>>, vector<8x1xf32>
    %62 = vector.extract_strided_slice %54 {offsets = [1, 0], sizes = [1, 512], strides = [1, 1]} : vector<4x512xf32> to vector<1x512xf32>
    %63 = vector.broadcast %61 : vector<8x1xf32> to vector<8x512xf32>
    %64 = vector.broadcast %62 : vector<1x512xf32> to vector<8x512xf32>
    %65 = arith.mulf %63, %64 : vector<8x512xf32>
    %66 = arith.addf %60, %65 : vector<8x512xf32>
    %c0_13 = arith.constant 0 : index
    %c6 = arith.constant 6 : index
    %67 = vector.load %arg1[%c0_13, %c6] : memref<8x104xf32, #tpu.memory_space<vmem>>, vector<8x1xf32>
    %68 = vector.extract_strided_slice %54 {offsets = [2, 0], sizes = [1, 512], strides = [1, 1]} : vector<4x512xf32> to vector<1x512xf32>
    %69 = vector.broadcast %67 : vector<8x1xf32> to vector<8x512xf32>
    %70 = vector.broadcast %68 : vector<1x512xf32> to vector<8x512xf32>
    %71 = arith.mulf %69, %70 : vector<8x512xf32>
    %72 = arith.addf %66, %71 : vector<8x512xf32>
    %c0_14 = arith.constant 0 : index
    %c7 = arith.constant 7 : index
    %73 = vector.load %arg1[%c0_14, %c7] : memref<8x104xf32, #tpu.memory_space<vmem>>, vector<8x1xf32>
    %74 = vector.extract_strided_slice %54 {offsets = [3, 0], sizes = [1, 512], strides = [1, 1]} : vector<4x512xf32> to vector<1x512xf32>
    %75 = vector.broadcast %73 : vector<8x1xf32> to vector<8x512xf32>
    %76 = vector.broadcast %74 : vector<1x512xf32> to vector<8x512xf32>
    %77 = arith.mulf %75, %76 : vector<8x512xf32>
    %78 = arith.addf %72, %77 : vector<8x512xf32>
    %c2_i32_15 = arith.constant 2 : i32
    %79 = tpu.dynamic_rotate %19 by %c2_i32_15 dim 1 : vector<4x512xf32>, i32 -> vector<4x512xf32>
    %cst_16 = arith.constant 0.000000e+00 : f32
    %80 = vector.shape_cast %8 : vector<1x512xi1> to vector<1x512xi1>
    %81 = vector.broadcast %80 : vector<1x512xi1> to vector<4x512xi1>
    %82 = vector.broadcast %cst_16 : f32 to vector<4x512xf32>
    %83 = arith.select %81, %79, %82 : vector<4x512xi1>, vector<4x512xf32>
    %c0_17 = arith.constant 0 : index
    %c8 = arith.constant 8 : index
    %84 = vector.load %arg1[%c0_17, %c8] : memref<8x104xf32, #tpu.memory_space<vmem>>, vector<8x1xf32>
    %85 = vector.extract_strided_slice %83 {offsets = [0, 0], sizes = [1, 512], strides = [1, 1]} : vector<4x512xf32> to vector<1x512xf32>
    %86 = vector.broadcast %84 : vector<8x1xf32> to vector<8x512xf32>
    %87 = vector.broadcast %85 : vector<1x512xf32> to vector<8x512xf32>
    %88 = arith.mulf %86, %87 : vector<8x512xf32>
    %89 = arith.addf %78, %88 : vector<8x512xf32>
    %c0_18 = arith.constant 0 : index
    %c9 = arith.constant 9 : index
    %90 = vector.load %arg1[%c0_18, %c9] : memref<8x104xf32, #tpu.memory_space<vmem>>, vector<8x1xf32>
    %91 = vector.extract_strided_slice %83 {offsets = [1, 0], sizes = [1, 512], strides = [1, 1]} : vector<4x512xf32> to vector<1x512xf32>
    %92 = vector.broadcast %90 : vector<8x1xf32> to vector<8x512xf32>
    %93 = vector.broadcast %91 : vector<1x512xf32> to vector<8x512xf32>
    %94 = arith.mulf %92, %93 : vector<8x512xf32>
    %95 = arith.addf %89, %94 : vector<8x512xf32>
    %c0_19 = arith.constant 0 : index
    %c10 = arith.constant 10 : index
    %96 = vector.load %arg1[%c0_19, %c10] : memref<8x104xf32, #tpu.memory_space<vmem>>, vector<8x1xf32>
    %97 = vector.extract_strided_slice %83 {offsets = [2, 0], sizes = [1, 512], strides = [1, 1]} : vector<4x512xf32> to vector<1x512xf32>
    %98 = vector.broadcast %96 : vector<8x1xf32> to vector<8x512xf32>
    %99 = vector.broadcast %97 : vector<1x512xf32> to vector<8x512xf32>
    %100 = arith.mulf %98, %99 : vector<8x512xf32>
    %101 = arith.addf %95, %100 : vector<8x512xf32>
    %c0_20 = arith.constant 0 : index
    %c11 = arith.constant 11 : index
    %102 = vector.load %arg1[%c0_20, %c11] : memref<8x104xf32, #tpu.memory_space<vmem>>, vector<8x1xf32>
    %103 = vector.extract_strided_slice %83 {offsets = [3, 0], sizes = [1, 512], strides = [1, 1]} : vector<4x512xf32> to vector<1x512xf32>
    %104 = vector.broadcast %102 : vector<8x1xf32> to vector<8x512xf32>
    %105 = vector.broadcast %103 : vector<1x512xf32> to vector<8x512xf32>
    %106 = arith.mulf %104, %105 : vector<8x512xf32>
    %107 = arith.addf %101, %106 : vector<8x512xf32>
    %c1_i32_21 = arith.constant 1 : i32
    %108 = tpu.dynamic_rotate %19 by %c1_i32_21 dim 1 : vector<4x512xf32>, i32 -> vector<4x512xf32>
    %cst_22 = arith.constant 0.000000e+00 : f32
    %109 = vector.shape_cast %10 : vector<1x512xi1> to vector<1x512xi1>
    %110 = vector.broadcast %109 : vector<1x512xi1> to vector<4x512xi1>
    %111 = vector.broadcast %cst_22 : f32 to vector<4x512xf32>
    %112 = arith.select %110, %108, %111 : vector<4x512xi1>, vector<4x512xf32>
    %c0_23 = arith.constant 0 : index
    %c12 = arith.constant 12 : index
    %113 = vector.load %arg1[%c0_23, %c12] : memref<8x104xf32, #tpu.memory_space<vmem>>, vector<8x1xf32>
    %114 = vector.extract_strided_slice %112 {offsets = [0, 0], sizes = [1, 512], strides = [1, 1]} : vector<4x512xf32> to vector<1x512xf32>
    %115 = vector.broadcast %113 : vector<8x1xf32> to vector<8x512xf32>
    %116 = vector.broadcast %114 : vector<1x512xf32> to vector<8x512xf32>
    %117 = arith.mulf %115, %116 : vector<8x512xf32>
    %118 = arith.addf %107, %117 : vector<8x512xf32>
    %c0_24 = arith.constant 0 : index
    %c13 = arith.constant 13 : index
    %119 = vector.load %arg1[%c0_24, %c13] : memref<8x104xf32, #tpu.memory_space<vmem>>, vector<8x1xf32>
    %120 = vector.extract_strided_slice %112 {offsets = [1, 0], sizes = [1, 512], strides = [1, 1]} : vector<4x512xf32> to vector<1x512xf32>
    %121 = vector.broadcast %119 : vector<8x1xf32> to vector<8x512xf32>
    %122 = vector.broadcast %120 : vector<1x512xf32> to vector<8x512xf32>
    %123 = arith.mulf %121, %122 : vector<8x512xf32>
    %124 = arith.addf %118, %123 : vector<8x512xf32>
    %c0_25 = arith.constant 0 : index
    %c14 = arith.constant 14 : index
    %125 = vector.load %arg1[%c0_25, %c14] : memref<8x104xf32, #tpu.memory_space<vmem>>, vector<8x1xf32>
    %126 = vector.extract_strided_slice %112 {offsets = [2, 0], sizes = [1, 512], strides = [1, 1]} : vector<4x512xf32> to vector<1x512xf32>
    %127 = vector.broadcast %125 : vector<8x1xf32> to vector<8x512xf32>
    %128 = vector.broadcast %126 : vector<1x512xf32> to vector<8x512xf32>
    %129 = arith.mulf %127, %128 : vector<8x512xf32>
    %130 = arith.addf %124, %129 : vector<8x512xf32>
    %c0_26 = arith.constant 0 : index
    %c15 = arith.constant 15 : index
    %131 = vector.load %arg1[%c0_26, %c15] : memref<8x104xf32, #tpu.memory_space<vmem>>, vector<8x1xf32>
    %132 = vector.extract_strided_slice %112 {offsets = [3, 0], sizes = [1, 512], strides = [1, 1]} : vector<4x512xf32> to vector<1x512xf32>
    %133 = vector.broadcast %131 : vector<8x1xf32> to vector<8x512xf32>
    %134 = vector.broadcast %132 : vector<1x512xf32> to vector<8x512xf32>
    %135 = arith.mulf %133, %134 : vector<8x512xf32>
    %136 = arith.addf %130, %135 : vector<8x512xf32>
    %c0_27 = arith.constant 0 : index
    %c16 = arith.constant 16 : index
    %137 = vector.load %arg1[%c0_27, %c16] : memref<8x104xf32, #tpu.memory_space<vmem>>, vector<8x1xf32>
    %138 = vector.extract_strided_slice %19 {offsets = [0, 0], sizes = [1, 512], strides = [1, 1]} : vector<4x512xf32> to vector<1x512xf32>
    %139 = vector.broadcast %137 : vector<8x1xf32> to vector<8x512xf32>
    %140 = vector.broadcast %138 : vector<1x512xf32> to vector<8x512xf32>
    %141 = arith.mulf %139, %140 : vector<8x512xf32>
    %142 = arith.addf %136, %141 : vector<8x512xf32>
    %c0_28 = arith.constant 0 : index
    %c17 = arith.constant 17 : index
    %143 = vector.load %arg1[%c0_28, %c17] : memref<8x104xf32, #tpu.memory_space<vmem>>, vector<8x1xf32>
    %144 = vector.extract_strided_slice %19 {offsets = [1, 0], sizes = [1, 512], strides = [1, 1]} : vector<4x512xf32> to vector<1x512xf32>
    %145 = vector.broadcast %143 : vector<8x1xf32> to vector<8x512xf32>
    %146 = vector.broadcast %144 : vector<1x512xf32> to vector<8x512xf32>
    %147 = arith.mulf %145, %146 : vector<8x512xf32>
    %148 = arith.addf %142, %147 : vector<8x512xf32>
    %c0_29 = arith.constant 0 : index
    %c18 = arith.constant 18 : index
    %149 = vector.load %arg1[%c0_29, %c18] : memref<8x104xf32, #tpu.memory_space<vmem>>, vector<8x1xf32>
    %150 = vector.extract_strided_slice %19 {offsets = [2, 0], sizes = [1, 512], strides = [1, 1]} : vector<4x512xf32> to vector<1x512xf32>
    %151 = vector.broadcast %149 : vector<8x1xf32> to vector<8x512xf32>
    %152 = vector.broadcast %150 : vector<1x512xf32> to vector<8x512xf32>
    %153 = arith.mulf %151, %152 : vector<8x512xf32>
    %154 = arith.addf %148, %153 : vector<8x512xf32>
    %c0_30 = arith.constant 0 : index
    %c19 = arith.constant 19 : index
    %155 = vector.load %arg1[%c0_30, %c19] : memref<8x104xf32, #tpu.memory_space<vmem>>, vector<8x1xf32>
    %156 = vector.extract_strided_slice %19 {offsets = [3, 0], sizes = [1, 512], strides = [1, 1]} : vector<4x512xf32> to vector<1x512xf32>
    %157 = vector.broadcast %155 : vector<8x1xf32> to vector<8x512xf32>
    %158 = vector.broadcast %156 : vector<1x512xf32> to vector<8x512xf32>
    %159 = arith.mulf %157, %158 : vector<8x512xf32>
    %160 = arith.addf %154, %159 : vector<8x512xf32>
    %c511_i32 = arith.constant 511 : i32
    %161 = tpu.dynamic_rotate %19 by %c511_i32 dim 1 : vector<4x512xf32>, i32 -> vector<4x512xf32>
    %cst_31 = arith.constant 0.000000e+00 : f32
    %162 = vector.shape_cast %12 : vector<1x512xi1> to vector<1x512xi1>
    %163 = vector.broadcast %162 : vector<1x512xi1> to vector<4x512xi1>
    %164 = vector.broadcast %cst_31 : f32 to vector<4x512xf32>
    %165 = arith.select %163, %161, %164 : vector<4x512xi1>, vector<4x512xf32>
    %c0_32 = arith.constant 0 : index
    %c20 = arith.constant 20 : index
    %166 = vector.load %arg1[%c0_32, %c20] : memref<8x104xf32, #tpu.memory_space<vmem>>, vector<8x1xf32>
    %167 = vector.extract_strided_slice %165 {offsets = [0, 0], sizes = [1, 512], strides = [1, 1]} : vector<4x512xf32> to vector<1x512xf32>
    %168 = vector.broadcast %166 : vector<8x1xf32> to vector<8x512xf32>
    %169 = vector.broadcast %167 : vector<1x512xf32> to vector<8x512xf32>
    %170 = arith.mulf %168, %169 : vector<8x512xf32>
    %171 = arith.addf %160, %170 : vector<8x512xf32>
    %c0_33 = arith.constant 0 : index
    %c21 = arith.constant 21 : index
    %172 = vector.load %arg1[%c0_33, %c21] : memref<8x104xf32, #tpu.memory_space<vmem>>, vector<8x1xf32>
    %173 = vector.extract_strided_slice %165 {offsets = [1, 0], sizes = [1, 512], strides = [1, 1]} : vector<4x512xf32> to vector<1x512xf32>
    %174 = vector.broadcast %172 : vector<8x1xf32> to vector<8x512xf32>
    %175 = vector.broadcast %173 : vector<1x512xf32> to vector<8x512xf32>
    %176 = arith.mulf %174, %175 : vector<8x512xf32>
    %177 = arith.addf %171, %176 : vector<8x512xf32>
    %c0_34 = arith.constant 0 : index
    %c22 = arith.constant 22 : index
    %178 = vector.load %arg1[%c0_34, %c22] : memref<8x104xf32, #tpu.memory_space<vmem>>, vector<8x1xf32>
    %179 = vector.extract_strided_slice %165 {offsets = [2, 0], sizes = [1, 512], strides = [1, 1]} : vector<4x512xf32> to vector<1x512xf32>
    %180 = vector.broadcast %178 : vector<8x1xf32> to vector<8x512xf32>
    %181 = vector.broadcast %179 : vector<1x512xf32> to vector<8x512xf32>
    %182 = arith.mulf %180, %181 : vector<8x512xf32>
    %183 = arith.addf %177, %182 : vector<8x512xf32>
    %c0_35 = arith.constant 0 : index
    %c23 = arith.constant 23 : index
    %184 = vector.load %arg1[%c0_35, %c23] : memref<8x104xf32, #tpu.memory_space<vmem>>, vector<8x1xf32>
    %185 = vector.extract_strided_slice %165 {offsets = [3, 0], sizes = [1, 512], strides = [1, 1]} : vector<4x512xf32> to vector<1x512xf32>
    %186 = vector.broadcast %184 : vector<8x1xf32> to vector<8x512xf32>
    %187 = vector.broadcast %185 : vector<1x512xf32> to vector<8x512xf32>
    %188 = arith.mulf %186, %187 : vector<8x512xf32>
    %189 = arith.addf %183, %188 : vector<8x512xf32>
    %c510_i32 = arith.constant 510 : i32
    %190 = tpu.dynamic_rotate %19 by %c510_i32 dim 1 : vector<4x512xf32>, i32 -> vector<4x512xf32>
    %cst_36 = arith.constant 0.000000e+00 : f32
    %191 = vector.shape_cast %14 : vector<1x512xi1> to vector<1x512xi1>
    %192 = vector.broadcast %191 : vector<1x512xi1> to vector<4x512xi1>
    %193 = vector.broadcast %cst_36 : f32 to vector<4x512xf32>
    %194 = arith.select %192, %190, %193 : vector<4x512xi1>, vector<4x512xf32>
    %c0_37 = arith.constant 0 : index
    %c24 = arith.constant 24 : index
    %195 = vector.load %arg1[%c0_37, %c24] : memref<8x104xf32, #tpu.memory_space<vmem>>, vector<8x1xf32>
    %196 = vector.extract_strided_slice %194 {offsets = [0, 0], sizes = [1, 512], strides = [1, 1]} : vector<4x512xf32> to vector<1x512xf32>
    %197 = vector.broadcast %195 : vector<8x1xf32> to vector<8x512xf32>
    %198 = vector.broadcast %196 : vector<1x512xf32> to vector<8x512xf32>
    %199 = arith.mulf %197, %198 : vector<8x512xf32>
    %200 = arith.addf %189, %199 : vector<8x512xf32>
    %c0_38 = arith.constant 0 : index
    %c25 = arith.constant 25 : index
    %201 = vector.load %arg1[%c0_38, %c25] : memref<8x104xf32, #tpu.memory_space<vmem>>, vector<8x1xf32>
    %202 = vector.extract_strided_slice %194 {offsets = [1, 0], sizes = [1, 512], strides = [1, 1]} : vector<4x512xf32> to vector<1x512xf32>
    %203 = vector.broadcast %201 : vector<8x1xf32> to vector<8x512xf32>
    %204 = vector.broadcast %202 : vector<1x512xf32> to vector<8x512xf32>
    %205 = arith.mulf %203, %204 : vector<8x512xf32>
    %206 = arith.addf %200, %205 : vector<8x512xf32>
    %c0_39 = arith.constant 0 : index
    %c26 = arith.constant 26 : index
    %207 = vector.load %arg1[%c0_39, %c26] : memref<8x104xf32, #tpu.memory_space<vmem>>, vector<8x1xf32>
    %208 = vector.extract_strided_slice %194 {offsets = [2, 0], sizes = [1, 512], strides = [1, 1]} : vector<4x512xf32> to vector<1x512xf32>
    %209 = vector.broadcast %207 : vector<8x1xf32> to vector<8x512xf32>
    %210 = vector.broadcast %208 : vector<1x512xf32> to vector<8x512xf32>
    %211 = arith.mulf %209, %210 : vector<8x512xf32>
    %212 = arith.addf %206, %211 : vector<8x512xf32>
    %c0_40 = arith.constant 0 : index
    %c27 = arith.constant 27 : index
    %213 = vector.load %arg1[%c0_40, %c27] : memref<8x104xf32, #tpu.memory_space<vmem>>, vector<8x1xf32>
    %214 = vector.extract_strided_slice %194 {offsets = [3, 0], sizes = [1, 512], strides = [1, 1]} : vector<4x512xf32> to vector<1x512xf32>
    %215 = vector.broadcast %213 : vector<8x1xf32> to vector<8x512xf32>
    %216 = vector.broadcast %214 : vector<1x512xf32> to vector<8x512xf32>
    %217 = arith.mulf %215, %216 : vector<8x512xf32>
    %218 = arith.addf %212, %217 : vector<8x512xf32>
    %c509_i32 = arith.constant 509 : i32
    %219 = tpu.dynamic_rotate %19 by %c509_i32 dim 1 : vector<4x512xf32>, i32 -> vector<4x512xf32>
    %cst_41 = arith.constant 0.000000e+00 : f32
    %220 = vector.shape_cast %16 : vector<1x512xi1> to vector<1x512xi1>
    %221 = vector.broadcast %220 : vector<1x512xi1> to vector<4x512xi1>
    %222 = vector.broadcast %cst_41 : f32 to vector<4x512xf32>
    %223 = arith.select %221, %219, %222 : vector<4x512xi1>, vector<4x512xf32>
    %c0_42 = arith.constant 0 : index
    %c28 = arith.constant 28 : index
    %224 = vector.load %arg1[%c0_42, %c28] : memref<8x104xf32, #tpu.memory_space<vmem>>, vector<8x1xf32>
    %225 = vector.extract_strided_slice %223 {offsets = [0, 0], sizes = [1, 512], strides = [1, 1]} : vector<4x512xf32> to vector<1x512xf32>
    %226 = vector.broadcast %224 : vector<8x1xf32> to vector<8x512xf32>
    %227 = vector.broadcast %225 : vector<1x512xf32> to vector<8x512xf32>
    %228 = arith.mulf %226, %227 : vector<8x512xf32>
    %229 = arith.addf %218, %228 : vector<8x512xf32>
    %c0_43 = arith.constant 0 : index
    %c29 = arith.constant 29 : index
    %230 = vector.load %arg1[%c0_43, %c29] : memref<8x104xf32, #tpu.memory_space<vmem>>, vector<8x1xf32>
    %231 = vector.extract_strided_slice %223 {offsets = [1, 0], sizes = [1, 512], strides = [1, 1]} : vector<4x512xf32> to vector<1x512xf32>
    %232 = vector.broadcast %230 : vector<8x1xf32> to vector<8x512xf32>
    %233 = vector.broadcast %231 : vector<1x512xf32> to vector<8x512xf32>
    %234 = arith.mulf %232, %233 : vector<8x512xf32>
    %235 = arith.addf %229, %234 : vector<8x512xf32>
    %c0_44 = arith.constant 0 : index
    %c30 = arith.constant 30 : index
    %236 = vector.load %arg1[%c0_44, %c30] : memref<8x104xf32, #tpu.memory_space<vmem>>, vector<8x1xf32>
    %237 = vector.extract_strided_slice %223 {offsets = [2, 0], sizes = [1, 512], strides = [1, 1]} : vector<4x512xf32> to vector<1x512xf32>
    %238 = vector.broadcast %236 : vector<8x1xf32> to vector<8x512xf32>
    %239 = vector.broadcast %237 : vector<1x512xf32> to vector<8x512xf32>
    %240 = arith.mulf %238, %239 : vector<8x512xf32>
    %241 = arith.addf %235, %240 : vector<8x512xf32>
    %c0_45 = arith.constant 0 : index
    %c31 = arith.constant 31 : index
    %242 = vector.load %arg1[%c0_45, %c31] : memref<8x104xf32, #tpu.memory_space<vmem>>, vector<8x1xf32>
    %243 = vector.extract_strided_slice %223 {offsets = [3, 0], sizes = [1, 512], strides = [1, 1]} : vector<4x512xf32> to vector<1x512xf32>
    %244 = vector.broadcast %242 : vector<8x1xf32> to vector<8x512xf32>
    %245 = vector.broadcast %243 : vector<1x512xf32> to vector<8x512xf32>
    %246 = arith.mulf %244, %245 : vector<8x512xf32>
    %247 = arith.addf %241, %246 : vector<8x512xf32>
    %c508_i32 = arith.constant 508 : i32
    %248 = tpu.dynamic_rotate %19 by %c508_i32 dim 1 : vector<4x512xf32>, i32 -> vector<4x512xf32>
    %cst_46 = arith.constant 0.000000e+00 : f32
    %249 = vector.shape_cast %18 : vector<1x512xi1> to vector<1x512xi1>
    %250 = vector.broadcast %249 : vector<1x512xi1> to vector<4x512xi1>
    %251 = vector.broadcast %cst_46 : f32 to vector<4x512xf32>
    %252 = arith.select %250, %248, %251 : vector<4x512xi1>, vector<4x512xf32>
    %c0_47 = arith.constant 0 : index
    %c32 = arith.constant 32 : index
    %253 = vector.load %arg1[%c0_47, %c32] : memref<8x104xf32, #tpu.memory_space<vmem>>, vector<8x1xf32>
    %254 = vector.extract_strided_slice %252 {offsets = [0, 0], sizes = [1, 512], strides = [1, 1]} : vector<4x512xf32> to vector<1x512xf32>
    %255 = vector.broadcast %253 : vector<8x1xf32> to vector<8x512xf32>
    %256 = vector.broadcast %254 : vector<1x512xf32> to vector<8x512xf32>
    %257 = arith.mulf %255, %256 : vector<8x512xf32>
    %258 = arith.addf %247, %257 : vector<8x512xf32>
    %c0_48 = arith.constant 0 : index
    %c33 = arith.constant 33 : index
    %259 = vector.load %arg1[%c0_48, %c33] : memref<8x104xf32, #tpu.memory_space<vmem>>, vector<8x1xf32>
    %260 = vector.extract_strided_slice %252 {offsets = [1, 0], sizes = [1, 512], strides = [1, 1]} : vector<4x512xf32> to vector<1x512xf32>
    %261 = vector.broadcast %259 : vector<8x1xf32> to vector<8x512xf32>
    %262 = vector.broadcast %260 : vector<1x512xf32> to vector<8x512xf32>
    %263 = arith.mulf %261, %262 : vector<8x512xf32>
    %264 = arith.addf %258, %263 : vector<8x512xf32>
    %c0_49 = arith.constant 0 : index
    %c34 = arith.constant 34 : index
    %265 = vector.load %arg1[%c0_49, %c34] : memref<8x104xf32, #tpu.memory_space<vmem>>, vector<8x1xf32>
    %266 = vector.extract_strided_slice %252 {offsets = [2, 0], sizes = [1, 512], strides = [1, 1]} : vector<4x512xf32> to vector<1x512xf32>
    %267 = vector.broadcast %265 : vector<8x1xf32> to vector<8x512xf32>
    %268 = vector.broadcast %266 : vector<1x512xf32> to vector<8x512xf32>
    %269 = arith.mulf %267, %268 : vector<8x512xf32>
    %270 = arith.addf %264, %269 : vector<8x512xf32>
    %c0_50 = arith.constant 0 : index
    %c35 = arith.constant 35 : index
    %271 = vector.load %arg1[%c0_50, %c35] : memref<8x104xf32, #tpu.memory_space<vmem>>, vector<8x1xf32>
    %272 = vector.extract_strided_slice %252 {offsets = [3, 0], sizes = [1, 512], strides = [1, 1]} : vector<4x512xf32> to vector<1x512xf32>
    %273 = vector.broadcast %271 : vector<8x1xf32> to vector<8x512xf32>
    %274 = vector.broadcast %272 : vector<1x512xf32> to vector<8x512xf32>
    %275 = arith.mulf %273, %274 : vector<8x512xf32>
    %276 = arith.addf %270, %275 : vector<8x512xf32>
    %cst_51 = arith.constant dense<0.000000e+00> : vector<8xf32>
    %277 = vector.multi_reduction <add>, %276, %cst_51 [1] : vector<8x512xf32> to vector<8xf32>
    %278 = vector.shape_cast %277 : vector<8xf32> to vector<8x1xf32>
    %cst_52 = arith.constant 5.120000e+02 : f32
    %279 = vector.broadcast %cst_52 : f32 to vector<8x1xf32>
    %280 = arith.divf %278, %279 : vector<8x1xf32>
    %281 = arith.mulf %276, %276 : vector<8x512xf32>
    %cst_53 = arith.constant dense<0.000000e+00> : vector<8xf32>
    %282 = vector.multi_reduction <add>, %281, %cst_53 [1] : vector<8x512xf32> to vector<8xf32>
    %283 = vector.shape_cast %282 : vector<8xf32> to vector<8x1xf32>
    %cst_54 = arith.constant 5.120000e+02 : f32
    %284 = vector.broadcast %cst_54 : f32 to vector<8x1xf32>
    %285 = arith.divf %283, %284 : vector<8x1xf32>
    %286 = arith.mulf %280, %280 : vector<8x1xf32>
    %287 = arith.subf %285, %286 : vector<8x1xf32>
    %c0_55 = arith.constant 0 : index
    %c0_56 = arith.constant 0 : index
    %288 = vector.load %arg2[%c0_55, %c0_56] : memref<8x8xf32, #tpu.memory_space<vmem>>, vector<8x1xf32>
    %c0_57 = arith.constant 0 : index
    %c1_58 = arith.constant 1 : index
    %289 = vector.load %arg2[%c0_57, %c1_58] : memref<8x8xf32, #tpu.memory_space<vmem>>, vector<8x1xf32>
    %cst_59 = arith.constant 9.99999974E-6 : f32
    %290 = vector.broadcast %cst_59 : f32 to vector<8x1xf32>
    %291 = arith.addf %287, %290 : vector<8x1xf32>
    %292 = math.rsqrt %291 : vector<8x1xf32>
    %293 = arith.mulf %288, %292 : vector<8x1xf32>
    %294 = arith.mulf %280, %293 : vector<8x1xf32>
    %295 = arith.subf %289, %294 : vector<8x1xf32>
    %296 = vector.broadcast %293 : vector<8x1xf32> to vector<8x512xf32>
    %297 = arith.mulf %276, %296 : vector<8x512xf32>
    %298 = vector.broadcast %295 : vector<8x1xf32> to vector<8x512xf32>
    %299 = arith.addf %297, %298 : vector<8x512xf32>
    %cst_60 = arith.constant 0.000000e+00 : f32
    %300 = vector.broadcast %cst_60 : f32 to vector<8x512xf32>
    %301 = arith.maximumf %299, %300 : vector<8x512xf32>
    %cst_61 = arith.constant 0.000000e+00 : f32
    %302 = vector.broadcast %cst_61 : f32 to vector<8x512xf32>
    %c2_i32_62 = arith.constant 2 : i32
    %303 = tpu.dynamic_rotate %301 by %c2_i32_62 dim 1 : vector<8x512xf32>, i32 -> vector<8x512xf32>
    %cst_63 = arith.constant 0.000000e+00 : f32
    %304 = vector.shape_cast %8 : vector<1x512xi1> to vector<1x512xi1>
    %305 = vector.broadcast %304 : vector<1x512xi1> to vector<8x512xi1>
    %306 = vector.broadcast %cst_63 : f32 to vector<8x512xf32>
    %307 = arith.select %305, %303, %306 : vector<8x512xi1>, vector<8x512xf32>
    %c0_64 = arith.constant 0 : index
    %c36 = arith.constant 36 : index
    %308 = vector.load %arg1[%c0_64, %c36] : memref<8x104xf32, #tpu.memory_space<vmem>>, vector<8x1xf32>
    %309 = vector.extract_strided_slice %307 {offsets = [0, 0], sizes = [1, 512], strides = [1, 1]} : vector<8x512xf32> to vector<1x512xf32>
    %310 = vector.broadcast %308 : vector<8x1xf32> to vector<8x512xf32>
    %311 = vector.broadcast %309 : vector<1x512xf32> to vector<8x512xf32>
    %312 = arith.mulf %310, %311 : vector<8x512xf32>
    %313 = arith.addf %302, %312 : vector<8x512xf32>
    %c0_65 = arith.constant 0 : index
    %c37 = arith.constant 37 : index
    %314 = vector.load %arg1[%c0_65, %c37] : memref<8x104xf32, #tpu.memory_space<vmem>>, vector<8x1xf32>
    %315 = vector.extract_strided_slice %307 {offsets = [1, 0], sizes = [1, 512], strides = [1, 1]} : vector<8x512xf32> to vector<1x512xf32>
    %316 = vector.broadcast %314 : vector<8x1xf32> to vector<8x512xf32>
    %317 = vector.broadcast %315 : vector<1x512xf32> to vector<8x512xf32>
    %318 = arith.mulf %316, %317 : vector<8x512xf32>
    %319 = arith.addf %313, %318 : vector<8x512xf32>
    %c0_66 = arith.constant 0 : index
    %c38 = arith.constant 38 : index
    %320 = vector.load %arg1[%c0_66, %c38] : memref<8x104xf32, #tpu.memory_space<vmem>>, vector<8x1xf32>
    %321 = vector.extract_strided_slice %307 {offsets = [2, 0], sizes = [1, 512], strides = [1, 1]} : vector<8x512xf32> to vector<1x512xf32>
    %322 = vector.broadcast %320 : vector<8x1xf32> to vector<8x512xf32>
    %323 = vector.broadcast %321 : vector<1x512xf32> to vector<8x512xf32>
    %324 = arith.mulf %322, %323 : vector<8x512xf32>
    %325 = arith.addf %319, %324 : vector<8x512xf32>
    %c0_67 = arith.constant 0 : index
    %c39 = arith.constant 39 : index
    %326 = vector.load %arg1[%c0_67, %c39] : memref<8x104xf32, #tpu.memory_space<vmem>>, vector<8x1xf32>
    %327 = vector.extract_strided_slice %307 {offsets = [3, 0], sizes = [1, 512], strides = [1, 1]} : vector<8x512xf32> to vector<1x512xf32>
    %328 = vector.broadcast %326 : vector<8x1xf32> to vector<8x512xf32>
    %329 = vector.broadcast %327 : vector<1x512xf32> to vector<8x512xf32>
    %330 = arith.mulf %328, %329 : vector<8x512xf32>
    %331 = arith.addf %325, %330 : vector<8x512xf32>
    %c0_68 = arith.constant 0 : index
    %c40 = arith.constant 40 : index
    %332 = vector.load %arg1[%c0_68, %c40] : memref<8x104xf32, #tpu.memory_space<vmem>>, vector<8x1xf32>
    %333 = vector.extract_strided_slice %307 {offsets = [4, 0], sizes = [1, 512], strides = [1, 1]} : vector<8x512xf32> to vector<1x512xf32>
    %334 = vector.broadcast %332 : vector<8x1xf32> to vector<8x512xf32>
    %335 = vector.broadcast %333 : vector<1x512xf32> to vector<8x512xf32>
    %336 = arith.mulf %334, %335 : vector<8x512xf32>
    %337 = arith.addf %331, %336 : vector<8x512xf32>
    %c0_69 = arith.constant 0 : index
    %c41 = arith.constant 41 : index
    %338 = vector.load %arg1[%c0_69, %c41] : memref<8x104xf32, #tpu.memory_space<vmem>>, vector<8x1xf32>
    %339 = vector.extract_strided_slice %307 {offsets = [5, 0], sizes = [1, 512], strides = [1, 1]} : vector<8x512xf32> to vector<1x512xf32>
    %340 = vector.broadcast %338 : vector<8x1xf32> to vector<8x512xf32>
    %341 = vector.broadcast %339 : vector<1x512xf32> to vector<8x512xf32>
    %342 = arith.mulf %340, %341 : vector<8x512xf32>
    %343 = arith.addf %337, %342 : vector<8x512xf32>
    %c0_70 = arith.constant 0 : index
    %c42 = arith.constant 42 : index
    %344 = vector.load %arg1[%c0_70, %c42] : memref<8x104xf32, #tpu.memory_space<vmem>>, vector<8x1xf32>
    %345 = vector.extract_strided_slice %307 {offsets = [6, 0], sizes = [1, 512], strides = [1, 1]} : vector<8x512xf32> to vector<1x512xf32>
    %346 = vector.broadcast %344 : vector<8x1xf32> to vector<8x512xf32>
    %347 = vector.broadcast %345 : vector<1x512xf32> to vector<8x512xf32>
    %348 = arith.mulf %346, %347 : vector<8x512xf32>
    %349 = arith.addf %343, %348 : vector<8x512xf32>
    %c0_71 = arith.constant 0 : index
    %c43 = arith.constant 43 : index
    %350 = vector.load %arg1[%c0_71, %c43] : memref<8x104xf32, #tpu.memory_space<vmem>>, vector<8x1xf32>
    %351 = vector.extract_strided_slice %307 {offsets = [7, 0], sizes = [1, 512], strides = [1, 1]} : vector<8x512xf32> to vector<1x512xf32>
    %352 = vector.broadcast %350 : vector<8x1xf32> to vector<8x512xf32>
    %353 = vector.broadcast %351 : vector<1x512xf32> to vector<8x512xf32>
    %354 = arith.mulf %352, %353 : vector<8x512xf32>
    %355 = arith.addf %349, %354 : vector<8x512xf32>
    %c1_i32_72 = arith.constant 1 : i32
    %356 = tpu.dynamic_rotate %301 by %c1_i32_72 dim 1 : vector<8x512xf32>, i32 -> vector<8x512xf32>
    %cst_73 = arith.constant 0.000000e+00 : f32
    %357 = vector.shape_cast %10 : vector<1x512xi1> to vector<1x512xi1>
    %358 = vector.broadcast %357 : vector<1x512xi1> to vector<8x512xi1>
    %359 = vector.broadcast %cst_73 : f32 to vector<8x512xf32>
    %360 = arith.select %358, %356, %359 : vector<8x512xi1>, vector<8x512xf32>
    %c0_74 = arith.constant 0 : index
    %c44 = arith.constant 44 : index
    %361 = vector.load %arg1[%c0_74, %c44] : memref<8x104xf32, #tpu.memory_space<vmem>>, vector<8x1xf32>
    %362 = vector.extract_strided_slice %360 {offsets = [0, 0], sizes = [1, 512], strides = [1, 1]} : vector<8x512xf32> to vector<1x512xf32>
    %363 = vector.broadcast %361 : vector<8x1xf32> to vector<8x512xf32>
    %364 = vector.broadcast %362 : vector<1x512xf32> to vector<8x512xf32>
    %365 = arith.mulf %363, %364 : vector<8x512xf32>
    %366 = arith.addf %355, %365 : vector<8x512xf32>
    %c0_75 = arith.constant 0 : index
    %c45 = arith.constant 45 : index
    %367 = vector.load %arg1[%c0_75, %c45] : memref<8x104xf32, #tpu.memory_space<vmem>>, vector<8x1xf32>
    %368 = vector.extract_strided_slice %360 {offsets = [1, 0], sizes = [1, 512], strides = [1, 1]} : vector<8x512xf32> to vector<1x512xf32>
    %369 = vector.broadcast %367 : vector<8x1xf32> to vector<8x512xf32>
    %370 = vector.broadcast %368 : vector<1x512xf32> to vector<8x512xf32>
    %371 = arith.mulf %369, %370 : vector<8x512xf32>
    %372 = arith.addf %366, %371 : vector<8x512xf32>
    %c0_76 = arith.constant 0 : index
    %c46 = arith.constant 46 : index
    %373 = vector.load %arg1[%c0_76, %c46] : memref<8x104xf32, #tpu.memory_space<vmem>>, vector<8x1xf32>
    %374 = vector.extract_strided_slice %360 {offsets = [2, 0], sizes = [1, 512], strides = [1, 1]} : vector<8x512xf32> to vector<1x512xf32>
    %375 = vector.broadcast %373 : vector<8x1xf32> to vector<8x512xf32>
    %376 = vector.broadcast %374 : vector<1x512xf32> to vector<8x512xf32>
    %377 = arith.mulf %375, %376 : vector<8x512xf32>
    %378 = arith.addf %372, %377 : vector<8x512xf32>
    %c0_77 = arith.constant 0 : index
    %c47 = arith.constant 47 : index
    %379 = vector.load %arg1[%c0_77, %c47] : memref<8x104xf32, #tpu.memory_space<vmem>>, vector<8x1xf32>
    %380 = vector.extract_strided_slice %360 {offsets = [3, 0], sizes = [1, 512], strides = [1, 1]} : vector<8x512xf32> to vector<1x512xf32>
    %381 = vector.broadcast %379 : vector<8x1xf32> to vector<8x512xf32>
    %382 = vector.broadcast %380 : vector<1x512xf32> to vector<8x512xf32>
    %383 = arith.mulf %381, %382 : vector<8x512xf32>
    %384 = arith.addf %378, %383 : vector<8x512xf32>
    %c0_78 = arith.constant 0 : index
    %c48 = arith.constant 48 : index
    %385 = vector.load %arg1[%c0_78, %c48] : memref<8x104xf32, #tpu.memory_space<vmem>>, vector<8x1xf32>
    %386 = vector.extract_strided_slice %360 {offsets = [4, 0], sizes = [1, 512], strides = [1, 1]} : vector<8x512xf32> to vector<1x512xf32>
    %387 = vector.broadcast %385 : vector<8x1xf32> to vector<8x512xf32>
    %388 = vector.broadcast %386 : vector<1x512xf32> to vector<8x512xf32>
    %389 = arith.mulf %387, %388 : vector<8x512xf32>
    %390 = arith.addf %384, %389 : vector<8x512xf32>
    %c0_79 = arith.constant 0 : index
    %c49 = arith.constant 49 : index
    %391 = vector.load %arg1[%c0_79, %c49] : memref<8x104xf32, #tpu.memory_space<vmem>>, vector<8x1xf32>
    %392 = vector.extract_strided_slice %360 {offsets = [5, 0], sizes = [1, 512], strides = [1, 1]} : vector<8x512xf32> to vector<1x512xf32>
    %393 = vector.broadcast %391 : vector<8x1xf32> to vector<8x512xf32>
    %394 = vector.broadcast %392 : vector<1x512xf32> to vector<8x512xf32>
    %395 = arith.mulf %393, %394 : vector<8x512xf32>
    %396 = arith.addf %390, %395 : vector<8x512xf32>
    %c0_80 = arith.constant 0 : index
    %c50 = arith.constant 50 : index
    %397 = vector.load %arg1[%c0_80, %c50] : memref<8x104xf32, #tpu.memory_space<vmem>>, vector<8x1xf32>
    %398 = vector.extract_strided_slice %360 {offsets = [6, 0], sizes = [1, 512], strides = [1, 1]} : vector<8x512xf32> to vector<1x512xf32>
    %399 = vector.broadcast %397 : vector<8x1xf32> to vector<8x512xf32>
    %400 = vector.broadcast %398 : vector<1x512xf32> to vector<8x512xf32>
    %401 = arith.mulf %399, %400 : vector<8x512xf32>
    %402 = arith.addf %396, %401 : vector<8x512xf32>
    %c0_81 = arith.constant 0 : index
    %c51 = arith.constant 51 : index
    %403 = vector.load %arg1[%c0_81, %c51] : memref<8x104xf32, #tpu.memory_space<vmem>>, vector<8x1xf32>
    %404 = vector.extract_strided_slice %360 {offsets = [7, 0], sizes = [1, 512], strides = [1, 1]} : vector<8x512xf32> to vector<1x512xf32>
    %405 = vector.broadcast %403 : vector<8x1xf32> to vector<8x512xf32>
    %406 = vector.broadcast %404 : vector<1x512xf32> to vector<8x512xf32>
    %407 = arith.mulf %405, %406 : vector<8x512xf32>
    %408 = arith.addf %402, %407 : vector<8x512xf32>
    %c0_82 = arith.constant 0 : index
    %c52 = arith.constant 52 : index
    %409 = vector.load %arg1[%c0_82, %c52] : memref<8x104xf32, #tpu.memory_space<vmem>>, vector<8x1xf32>
    %410 = vector.extract_strided_slice %301 {offsets = [0, 0], sizes = [1, 512], strides = [1, 1]} : vector<8x512xf32> to vector<1x512xf32>
    %411 = vector.broadcast %409 : vector<8x1xf32> to vector<8x512xf32>
    %412 = vector.broadcast %410 : vector<1x512xf32> to vector<8x512xf32>
    %413 = arith.mulf %411, %412 : vector<8x512xf32>
    %414 = arith.addf %408, %413 : vector<8x512xf32>
    %c0_83 = arith.constant 0 : index
    %c53 = arith.constant 53 : index
    %415 = vector.load %arg1[%c0_83, %c53] : memref<8x104xf32, #tpu.memory_space<vmem>>, vector<8x1xf32>
    %416 = vector.extract_strided_slice %301 {offsets = [1, 0], sizes = [1, 512], strides = [1, 1]} : vector<8x512xf32> to vector<1x512xf32>
    %417 = vector.broadcast %415 : vector<8x1xf32> to vector<8x512xf32>
    %418 = vector.broadcast %416 : vector<1x512xf32> to vector<8x512xf32>
    %419 = arith.mulf %417, %418 : vector<8x512xf32>
    %420 = arith.addf %414, %419 : vector<8x512xf32>
    %c0_84 = arith.constant 0 : index
    %c54 = arith.constant 54 : index
    %421 = vector.load %arg1[%c0_84, %c54] : memref<8x104xf32, #tpu.memory_space<vmem>>, vector<8x1xf32>
    %422 = vector.extract_strided_slice %301 {offsets = [2, 0], sizes = [1, 512], strides = [1, 1]} : vector<8x512xf32> to vector<1x512xf32>
    %423 = vector.broadcast %421 : vector<8x1xf32> to vector<8x512xf32>
    %424 = vector.broadcast %422 : vector<1x512xf32> to vector<8x512xf32>
    %425 = arith.mulf %423, %424 : vector<8x512xf32>
    %426 = arith.addf %420, %425 : vector<8x512xf32>
    %c0_85 = arith.constant 0 : index
    %c55 = arith.constant 55 : index
    %427 = vector.load %arg1[%c0_85, %c55] : memref<8x104xf32, #tpu.memory_space<vmem>>, vector<8x1xf32>
    %428 = vector.extract_strided_slice %301 {offsets = [3, 0], sizes = [1, 512], strides = [1, 1]} : vector<8x512xf32> to vector<1x512xf32>
    %429 = vector.broadcast %427 : vector<8x1xf32> to vector<8x512xf32>
    %430 = vector.broadcast %428 : vector<1x512xf32> to vector<8x512xf32>
    %431 = arith.mulf %429, %430 : vector<8x512xf32>
    %432 = arith.addf %426, %431 : vector<8x512xf32>
    %c0_86 = arith.constant 0 : index
    %c56 = arith.constant 56 : index
    %433 = vector.load %arg1[%c0_86, %c56] : memref<8x104xf32, #tpu.memory_space<vmem>>, vector<8x1xf32>
    %434 = vector.extract_strided_slice %301 {offsets = [4, 0], sizes = [1, 512], strides = [1, 1]} : vector<8x512xf32> to vector<1x512xf32>
    %435 = vector.broadcast %433 : vector<8x1xf32> to vector<8x512xf32>
    %436 = vector.broadcast %434 : vector<1x512xf32> to vector<8x512xf32>
    %437 = arith.mulf %435, %436 : vector<8x512xf32>
    %438 = arith.addf %432, %437 : vector<8x512xf32>
    %c0_87 = arith.constant 0 : index
    %c57 = arith.constant 57 : index
    %439 = vector.load %arg1[%c0_87, %c57] : memref<8x104xf32, #tpu.memory_space<vmem>>, vector<8x1xf32>
    %440 = vector.extract_strided_slice %301 {offsets = [5, 0], sizes = [1, 512], strides = [1, 1]} : vector<8x512xf32> to vector<1x512xf32>
    %441 = vector.broadcast %439 : vector<8x1xf32> to vector<8x512xf32>
    %442 = vector.broadcast %440 : vector<1x512xf32> to vector<8x512xf32>
    %443 = arith.mulf %441, %442 : vector<8x512xf32>
    %444 = arith.addf %438, %443 : vector<8x512xf32>
    %c0_88 = arith.constant 0 : index
    %c58 = arith.constant 58 : index
    %445 = vector.load %arg1[%c0_88, %c58] : memref<8x104xf32, #tpu.memory_space<vmem>>, vector<8x1xf32>
    %446 = vector.extract_strided_slice %301 {offsets = [6, 0], sizes = [1, 512], strides = [1, 1]} : vector<8x512xf32> to vector<1x512xf32>
    %447 = vector.broadcast %445 : vector<8x1xf32> to vector<8x512xf32>
    %448 = vector.broadcast %446 : vector<1x512xf32> to vector<8x512xf32>
    %449 = arith.mulf %447, %448 : vector<8x512xf32>
    %450 = arith.addf %444, %449 : vector<8x512xf32>
    %c0_89 = arith.constant 0 : index
    %c59 = arith.constant 59 : index
    %451 = vector.load %arg1[%c0_89, %c59] : memref<8x104xf32, #tpu.memory_space<vmem>>, vector<8x1xf32>
    %452 = vector.extract_strided_slice %301 {offsets = [7, 0], sizes = [1, 512], strides = [1, 1]} : vector<8x512xf32> to vector<1x512xf32>
    %453 = vector.broadcast %451 : vector<8x1xf32> to vector<8x512xf32>
    %454 = vector.broadcast %452 : vector<1x512xf32> to vector<8x512xf32>
    %455 = arith.mulf %453, %454 : vector<8x512xf32>
    %456 = arith.addf %450, %455 : vector<8x512xf32>
    %c511_i32_90 = arith.constant 511 : i32
    %457 = tpu.dynamic_rotate %301 by %c511_i32_90 dim 1 : vector<8x512xf32>, i32 -> vector<8x512xf32>
    %cst_91 = arith.constant 0.000000e+00 : f32
    %458 = vector.shape_cast %12 : vector<1x512xi1> to vector<1x512xi1>
    %459 = vector.broadcast %458 : vector<1x512xi1> to vector<8x512xi1>
    %460 = vector.broadcast %cst_91 : f32 to vector<8x512xf32>
    %461 = arith.select %459, %457, %460 : vector<8x512xi1>, vector<8x512xf32>
    %c0_92 = arith.constant 0 : index
    %c60 = arith.constant 60 : index
    %462 = vector.load %arg1[%c0_92, %c60] : memref<8x104xf32, #tpu.memory_space<vmem>>, vector<8x1xf32>
    %463 = vector.extract_strided_slice %461 {offsets = [0, 0], sizes = [1, 512], strides = [1, 1]} : vector<8x512xf32> to vector<1x512xf32>
    %464 = vector.broadcast %462 : vector<8x1xf32> to vector<8x512xf32>
    %465 = vector.broadcast %463 : vector<1x512xf32> to vector<8x512xf32>
    %466 = arith.mulf %464, %465 : vector<8x512xf32>
    %467 = arith.addf %456, %466 : vector<8x512xf32>
    %c0_93 = arith.constant 0 : index
    %c61 = arith.constant 61 : index
    %468 = vector.load %arg1[%c0_93, %c61] : memref<8x104xf32, #tpu.memory_space<vmem>>, vector<8x1xf32>
    %469 = vector.extract_strided_slice %461 {offsets = [1, 0], sizes = [1, 512], strides = [1, 1]} : vector<8x512xf32> to vector<1x512xf32>
    %470 = vector.broadcast %468 : vector<8x1xf32> to vector<8x512xf32>
    %471 = vector.broadcast %469 : vector<1x512xf32> to vector<8x512xf32>
    %472 = arith.mulf %470, %471 : vector<8x512xf32>
    %473 = arith.addf %467, %472 : vector<8x512xf32>
    %c0_94 = arith.constant 0 : index
    %c62 = arith.constant 62 : index
    %474 = vector.load %arg1[%c0_94, %c62] : memref<8x104xf32, #tpu.memory_space<vmem>>, vector<8x1xf32>
    %475 = vector.extract_strided_slice %461 {offsets = [2, 0], sizes = [1, 512], strides = [1, 1]} : vector<8x512xf32> to vector<1x512xf32>
    %476 = vector.broadcast %474 : vector<8x1xf32> to vector<8x512xf32>
    %477 = vector.broadcast %475 : vector<1x512xf32> to vector<8x512xf32>
    %478 = arith.mulf %476, %477 : vector<8x512xf32>
    %479 = arith.addf %473, %478 : vector<8x512xf32>
    %c0_95 = arith.constant 0 : index
    %c63 = arith.constant 63 : index
    %480 = vector.load %arg1[%c0_95, %c63] : memref<8x104xf32, #tpu.memory_space<vmem>>, vector<8x1xf32>
    %481 = vector.extract_strided_slice %461 {offsets = [3, 0], sizes = [1, 512], strides = [1, 1]} : vector<8x512xf32> to vector<1x512xf32>
    %482 = vector.broadcast %480 : vector<8x1xf32> to vector<8x512xf32>
    %483 = vector.broadcast %481 : vector<1x512xf32> to vector<8x512xf32>
    %484 = arith.mulf %482, %483 : vector<8x512xf32>
    %485 = arith.addf %479, %484 : vector<8x512xf32>
    %c0_96 = arith.constant 0 : index
    %c64 = arith.constant 64 : index
    %486 = vector.load %arg1[%c0_96, %c64] : memref<8x104xf32, #tpu.memory_space<vmem>>, vector<8x1xf32>
    %487 = vector.extract_strided_slice %461 {offsets = [4, 0], sizes = [1, 512], strides = [1, 1]} : vector<8x512xf32> to vector<1x512xf32>
    %488 = vector.broadcast %486 : vector<8x1xf32> to vector<8x512xf32>
    %489 = vector.broadcast %487 : vector<1x512xf32> to vector<8x512xf32>
    %490 = arith.mulf %488, %489 : vector<8x512xf32>
    %491 = arith.addf %485, %490 : vector<8x512xf32>
    %c0_97 = arith.constant 0 : index
    %c65 = arith.constant 65 : index
    %492 = vector.load %arg1[%c0_97, %c65] : memref<8x104xf32, #tpu.memory_space<vmem>>, vector<8x1xf32>
    %493 = vector.extract_strided_slice %461 {offsets = [5, 0], sizes = [1, 512], strides = [1, 1]} : vector<8x512xf32> to vector<1x512xf32>
    %494 = vector.broadcast %492 : vector<8x1xf32> to vector<8x512xf32>
    %495 = vector.broadcast %493 : vector<1x512xf32> to vector<8x512xf32>
    %496 = arith.mulf %494, %495 : vector<8x512xf32>
    %497 = arith.addf %491, %496 : vector<8x512xf32>
    %c0_98 = arith.constant 0 : index
    %c66 = arith.constant 66 : index
    %498 = vector.load %arg1[%c0_98, %c66] : memref<8x104xf32, #tpu.memory_space<vmem>>, vector<8x1xf32>
    %499 = vector.extract_strided_slice %461 {offsets = [6, 0], sizes = [1, 512], strides = [1, 1]} : vector<8x512xf32> to vector<1x512xf32>
    %500 = vector.broadcast %498 : vector<8x1xf32> to vector<8x512xf32>
    %501 = vector.broadcast %499 : vector<1x512xf32> to vector<8x512xf32>
    %502 = arith.mulf %500, %501 : vector<8x512xf32>
    %503 = arith.addf %497, %502 : vector<8x512xf32>
    %c0_99 = arith.constant 0 : index
    %c67 = arith.constant 67 : index
    %504 = vector.load %arg1[%c0_99, %c67] : memref<8x104xf32, #tpu.memory_space<vmem>>, vector<8x1xf32>
    %505 = vector.extract_strided_slice %461 {offsets = [7, 0], sizes = [1, 512], strides = [1, 1]} : vector<8x512xf32> to vector<1x512xf32>
    %506 = vector.broadcast %504 : vector<8x1xf32> to vector<8x512xf32>
    %507 = vector.broadcast %505 : vector<1x512xf32> to vector<8x512xf32>
    %508 = arith.mulf %506, %507 : vector<8x512xf32>
    %509 = arith.addf %503, %508 : vector<8x512xf32>
    %c510_i32_100 = arith.constant 510 : i32
    %510 = tpu.dynamic_rotate %301 by %c510_i32_100 dim 1 : vector<8x512xf32>, i32 -> vector<8x512xf32>
    %cst_101 = arith.constant 0.000000e+00 : f32
    %511 = vector.shape_cast %14 : vector<1x512xi1> to vector<1x512xi1>
    %512 = vector.broadcast %511 : vector<1x512xi1> to vector<8x512xi1>
    %513 = vector.broadcast %cst_101 : f32 to vector<8x512xf32>
    %514 = arith.select %512, %510, %513 : vector<8x512xi1>, vector<8x512xf32>
    %c0_102 = arith.constant 0 : index
    %c68 = arith.constant 68 : index
    %515 = vector.load %arg1[%c0_102, %c68] : memref<8x104xf32, #tpu.memory_space<vmem>>, vector<8x1xf32>
    %516 = vector.extract_strided_slice %514 {offsets = [0, 0], sizes = [1, 512], strides = [1, 1]} : vector<8x512xf32> to vector<1x512xf32>
    %517 = vector.broadcast %515 : vector<8x1xf32> to vector<8x512xf32>
    %518 = vector.broadcast %516 : vector<1x512xf32> to vector<8x512xf32>
    %519 = arith.mulf %517, %518 : vector<8x512xf32>
    %520 = arith.addf %509, %519 : vector<8x512xf32>
    %c0_103 = arith.constant 0 : index
    %c69 = arith.constant 69 : index
    %521 = vector.load %arg1[%c0_103, %c69] : memref<8x104xf32, #tpu.memory_space<vmem>>, vector<8x1xf32>
    %522 = vector.extract_strided_slice %514 {offsets = [1, 0], sizes = [1, 512], strides = [1, 1]} : vector<8x512xf32> to vector<1x512xf32>
    %523 = vector.broadcast %521 : vector<8x1xf32> to vector<8x512xf32>
    %524 = vector.broadcast %522 : vector<1x512xf32> to vector<8x512xf32>
    %525 = arith.mulf %523, %524 : vector<8x512xf32>
    %526 = arith.addf %520, %525 : vector<8x512xf32>
    %c0_104 = arith.constant 0 : index
    %c70 = arith.constant 70 : index
    %527 = vector.load %arg1[%c0_104, %c70] : memref<8x104xf32, #tpu.memory_space<vmem>>, vector<8x1xf32>
    %528 = vector.extract_strided_slice %514 {offsets = [2, 0], sizes = [1, 512], strides = [1, 1]} : vector<8x512xf32> to vector<1x512xf32>
    %529 = vector.broadcast %527 : vector<8x1xf32> to vector<8x512xf32>
    %530 = vector.broadcast %528 : vector<1x512xf32> to vector<8x512xf32>
    %531 = arith.mulf %529, %530 : vector<8x512xf32>
    %532 = arith.addf %526, %531 : vector<8x512xf32>
    %c0_105 = arith.constant 0 : index
    %c71 = arith.constant 71 : index
    %533 = vector.load %arg1[%c0_105, %c71] : memref<8x104xf32, #tpu.memory_space<vmem>>, vector<8x1xf32>
    %534 = vector.extract_strided_slice %514 {offsets = [3, 0], sizes = [1, 512], strides = [1, 1]} : vector<8x512xf32> to vector<1x512xf32>
    %535 = vector.broadcast %533 : vector<8x1xf32> to vector<8x512xf32>
    %536 = vector.broadcast %534 : vector<1x512xf32> to vector<8x512xf32>
    %537 = arith.mulf %535, %536 : vector<8x512xf32>
    %538 = arith.addf %532, %537 : vector<8x512xf32>
    %c0_106 = arith.constant 0 : index
    %c72 = arith.constant 72 : index
    %539 = vector.load %arg1[%c0_106, %c72] : memref<8x104xf32, #tpu.memory_space<vmem>>, vector<8x1xf32>
    %540 = vector.extract_strided_slice %514 {offsets = [4, 0], sizes = [1, 512], strides = [1, 1]} : vector<8x512xf32> to vector<1x512xf32>
    %541 = vector.broadcast %539 : vector<8x1xf32> to vector<8x512xf32>
    %542 = vector.broadcast %540 : vector<1x512xf32> to vector<8x512xf32>
    %543 = arith.mulf %541, %542 : vector<8x512xf32>
    %544 = arith.addf %538, %543 : vector<8x512xf32>
    %c0_107 = arith.constant 0 : index
    %c73 = arith.constant 73 : index
    %545 = vector.load %arg1[%c0_107, %c73] : memref<8x104xf32, #tpu.memory_space<vmem>>, vector<8x1xf32>
    %546 = vector.extract_strided_slice %514 {offsets = [5, 0], sizes = [1, 512], strides = [1, 1]} : vector<8x512xf32> to vector<1x512xf32>
    %547 = vector.broadcast %545 : vector<8x1xf32> to vector<8x512xf32>
    %548 = vector.broadcast %546 : vector<1x512xf32> to vector<8x512xf32>
    %549 = arith.mulf %547, %548 : vector<8x512xf32>
    %550 = arith.addf %544, %549 : vector<8x512xf32>
    %c0_108 = arith.constant 0 : index
    %c74 = arith.constant 74 : index
    %551 = vector.load %arg1[%c0_108, %c74] : memref<8x104xf32, #tpu.memory_space<vmem>>, vector<8x1xf32>
    %552 = vector.extract_strided_slice %514 {offsets = [6, 0], sizes = [1, 512], strides = [1, 1]} : vector<8x512xf32> to vector<1x512xf32>
    %553 = vector.broadcast %551 : vector<8x1xf32> to vector<8x512xf32>
    %554 = vector.broadcast %552 : vector<1x512xf32> to vector<8x512xf32>
    %555 = arith.mulf %553, %554 : vector<8x512xf32>
    %556 = arith.addf %550, %555 : vector<8x512xf32>
    %c0_109 = arith.constant 0 : index
    %c75 = arith.constant 75 : index
    %557 = vector.load %arg1[%c0_109, %c75] : memref<8x104xf32, #tpu.memory_space<vmem>>, vector<8x1xf32>
    %558 = vector.extract_strided_slice %514 {offsets = [7, 0], sizes = [1, 512], strides = [1, 1]} : vector<8x512xf32> to vector<1x512xf32>
    %559 = vector.broadcast %557 : vector<8x1xf32> to vector<8x512xf32>
    %560 = vector.broadcast %558 : vector<1x512xf32> to vector<8x512xf32>
    %561 = arith.mulf %559, %560 : vector<8x512xf32>
    %562 = arith.addf %556, %561 : vector<8x512xf32>
    %cst_110 = arith.constant dense<0.000000e+00> : vector<8xf32>
    %563 = vector.multi_reduction <add>, %562, %cst_110 [1] : vector<8x512xf32> to vector<8xf32>
    %564 = vector.shape_cast %563 : vector<8xf32> to vector<8x1xf32>
    %cst_111 = arith.constant 5.120000e+02 : f32
    %565 = vector.broadcast %cst_111 : f32 to vector<8x1xf32>
    %566 = arith.divf %564, %565 : vector<8x1xf32>
    %567 = arith.mulf %562, %562 : vector<8x512xf32>
    %cst_112 = arith.constant dense<0.000000e+00> : vector<8xf32>
    %568 = vector.multi_reduction <add>, %567, %cst_112 [1] : vector<8x512xf32> to vector<8xf32>
    %569 = vector.shape_cast %568 : vector<8xf32> to vector<8x1xf32>
    %cst_113 = arith.constant 5.120000e+02 : f32
    %570 = vector.broadcast %cst_113 : f32 to vector<8x1xf32>
    %571 = arith.divf %569, %570 : vector<8x1xf32>
    %572 = arith.mulf %566, %566 : vector<8x1xf32>
    %573 = arith.subf %571, %572 : vector<8x1xf32>
    %c0_114 = arith.constant 0 : index
    %c2_115 = arith.constant 2 : index
    %574 = vector.load %arg2[%c0_114, %c2_115] : memref<8x8xf32, #tpu.memory_space<vmem>>, vector<8x1xf32>
    %c0_116 = arith.constant 0 : index
    %c3_117 = arith.constant 3 : index
    %575 = vector.load %arg2[%c0_116, %c3_117] : memref<8x8xf32, #tpu.memory_space<vmem>>, vector<8x1xf32>
    %cst_118 = arith.constant 9.99999974E-6 : f32
    %576 = vector.broadcast %cst_118 : f32 to vector<8x1xf32>
    %577 = arith.addf %573, %576 : vector<8x1xf32>
    %578 = math.rsqrt %577 : vector<8x1xf32>
    %579 = arith.mulf %574, %578 : vector<8x1xf32>
    %580 = arith.mulf %566, %579 : vector<8x1xf32>
    %581 = arith.subf %575, %580 : vector<8x1xf32>
    %582 = vector.broadcast %579 : vector<8x1xf32> to vector<8x512xf32>
    %583 = arith.mulf %562, %582 : vector<8x512xf32>
    %584 = vector.broadcast %581 : vector<8x1xf32> to vector<8x512xf32>
    %585 = arith.addf %583, %584 : vector<8x512xf32>
    %cst_119 = arith.constant 0.000000e+00 : f32
    %586 = vector.broadcast %cst_119 : f32 to vector<8x512xf32>
    %587 = arith.maximumf %585, %586 : vector<8x512xf32>
    %cst_120 = arith.constant 0.000000e+00 : f32
    %588 = vector.broadcast %cst_120 : f32 to vector<8x512xf32>
    %c0_121 = arith.constant 0 : index
    %c100 = arith.constant 100 : index
    %589 = vector.load %arg1[%c0_121, %c100] : memref<8x104xf32, #tpu.memory_space<vmem>>, vector<8x1xf32>
    %590 = vector.extract_strided_slice %19 {offsets = [0, 0], sizes = [1, 512], strides = [1, 1]} : vector<4x512xf32> to vector<1x512xf32>
    %591 = vector.broadcast %589 : vector<8x1xf32> to vector<8x512xf32>
    %592 = vector.broadcast %590 : vector<1x512xf32> to vector<8x512xf32>
    %593 = arith.mulf %591, %592 : vector<8x512xf32>
    %594 = arith.addf %588, %593 : vector<8x512xf32>
    %c0_122 = arith.constant 0 : index
    %c101 = arith.constant 101 : index
    %595 = vector.load %arg1[%c0_122, %c101] : memref<8x104xf32, #tpu.memory_space<vmem>>, vector<8x1xf32>
    %596 = vector.extract_strided_slice %19 {offsets = [1, 0], sizes = [1, 512], strides = [1, 1]} : vector<4x512xf32> to vector<1x512xf32>
    %597 = vector.broadcast %595 : vector<8x1xf32> to vector<8x512xf32>
    %598 = vector.broadcast %596 : vector<1x512xf32> to vector<8x512xf32>
    %599 = arith.mulf %597, %598 : vector<8x512xf32>
    %600 = arith.addf %594, %599 : vector<8x512xf32>
    %c0_123 = arith.constant 0 : index
    %c102 = arith.constant 102 : index
    %601 = vector.load %arg1[%c0_123, %c102] : memref<8x104xf32, #tpu.memory_space<vmem>>, vector<8x1xf32>
    %602 = vector.extract_strided_slice %19 {offsets = [2, 0], sizes = [1, 512], strides = [1, 1]} : vector<4x512xf32> to vector<1x512xf32>
    %603 = vector.broadcast %601 : vector<8x1xf32> to vector<8x512xf32>
    %604 = vector.broadcast %602 : vector<1x512xf32> to vector<8x512xf32>
    %605 = arith.mulf %603, %604 : vector<8x512xf32>
    %606 = arith.addf %600, %605 : vector<8x512xf32>
    %c0_124 = arith.constant 0 : index
    %c103 = arith.constant 103 : index
    %607 = vector.load %arg1[%c0_124, %c103] : memref<8x104xf32, #tpu.memory_space<vmem>>, vector<8x1xf32>
    %608 = vector.extract_strided_slice %19 {offsets = [3, 0], sizes = [1, 512], strides = [1, 1]} : vector<4x512xf32> to vector<1x512xf32>
    %609 = vector.broadcast %607 : vector<8x1xf32> to vector<8x512xf32>
    %610 = vector.broadcast %608 : vector<1x512xf32> to vector<8x512xf32>
    %611 = arith.mulf %609, %610 : vector<8x512xf32>
    %612 = arith.addf %606, %611 : vector<8x512xf32>
    %cst_125 = arith.constant dense<0.000000e+00> : vector<8xf32>
    %613 = vector.multi_reduction <add>, %612, %cst_125 [1] : vector<8x512xf32> to vector<8xf32>
    %614 = vector.shape_cast %613 : vector<8xf32> to vector<8x1xf32>
    %cst_126 = arith.constant 5.120000e+02 : f32
    %615 = vector.broadcast %cst_126 : f32 to vector<8x1xf32>
    %616 = arith.divf %614, %615 : vector<8x1xf32>
    %617 = arith.mulf %612, %612 : vector<8x512xf32>
    %cst_127 = arith.constant dense<0.000000e+00> : vector<8xf32>
    %618 = vector.multi_reduction <add>, %617, %cst_127 [1] : vector<8x512xf32> to vector<8xf32>
    %619 = vector.shape_cast %618 : vector<8xf32> to vector<8x1xf32>
    %cst_128 = arith.constant 5.120000e+02 : f32
    %620 = vector.broadcast %cst_128 : f32 to vector<8x1xf32>
    %621 = arith.divf %619, %620 : vector<8x1xf32>
    %622 = arith.mulf %616, %616 : vector<8x1xf32>
    %623 = arith.subf %621, %622 : vector<8x1xf32>
    %c0_129 = arith.constant 0 : index
    %c6_130 = arith.constant 6 : index
    %624 = vector.load %arg2[%c0_129, %c6_130] : memref<8x8xf32, #tpu.memory_space<vmem>>, vector<8x1xf32>
    %c0_131 = arith.constant 0 : index
    %c7_132 = arith.constant 7 : index
    %625 = vector.load %arg2[%c0_131, %c7_132] : memref<8x8xf32, #tpu.memory_space<vmem>>, vector<8x1xf32>
    %cst_133 = arith.constant 9.99999974E-6 : f32
    %626 = vector.broadcast %cst_133 : f32 to vector<8x1xf32>
    %627 = arith.addf %623, %626 : vector<8x1xf32>
    %628 = math.rsqrt %627 : vector<8x1xf32>
    %629 = arith.mulf %624, %628 : vector<8x1xf32>
    %630 = arith.mulf %616, %629 : vector<8x1xf32>
    %631 = arith.subf %625, %630 : vector<8x1xf32>
    %632 = vector.broadcast %629 : vector<8x1xf32> to vector<8x512xf32>
    %633 = arith.mulf %612, %632 : vector<8x512xf32>
    %634 = vector.broadcast %631 : vector<8x1xf32> to vector<8x512xf32>
    %635 = arith.addf %633, %634 : vector<8x512xf32>
    %cst_134 = arith.constant 0.000000e+00 : f32
    %636 = vector.broadcast %cst_134 : f32 to vector<8x512xf32>
    %c1_i32_135 = arith.constant 1 : i32
    %637 = tpu.dynamic_rotate %587 by %c1_i32_135 dim 1 : vector<8x512xf32>, i32 -> vector<8x512xf32>
    %cst_136 = arith.constant 0.000000e+00 : f32
    %638 = vector.shape_cast %10 : vector<1x512xi1> to vector<1x512xi1>
    %639 = vector.broadcast %638 : vector<1x512xi1> to vector<8x512xi1>
    %640 = vector.broadcast %cst_136 : f32 to vector<8x512xf32>
    %641 = arith.select %639, %637, %640 : vector<8x512xi1>, vector<8x512xf32>
    %c0_137 = arith.constant 0 : index
    %c76 = arith.constant 76 : index
    %642 = vector.load %arg1[%c0_137, %c76] : memref<8x104xf32, #tpu.memory_space<vmem>>, vector<8x1xf32>
    %643 = vector.extract_strided_slice %641 {offsets = [0, 0], sizes = [1, 512], strides = [1, 1]} : vector<8x512xf32> to vector<1x512xf32>
    %644 = vector.broadcast %642 : vector<8x1xf32> to vector<8x512xf32>
    %645 = vector.broadcast %643 : vector<1x512xf32> to vector<8x512xf32>
    %646 = arith.mulf %644, %645 : vector<8x512xf32>
    %647 = arith.addf %636, %646 : vector<8x512xf32>
    %c0_138 = arith.constant 0 : index
    %c77 = arith.constant 77 : index
    %648 = vector.load %arg1[%c0_138, %c77] : memref<8x104xf32, #tpu.memory_space<vmem>>, vector<8x1xf32>
    %649 = vector.extract_strided_slice %641 {offsets = [1, 0], sizes = [1, 512], strides = [1, 1]} : vector<8x512xf32> to vector<1x512xf32>
    %650 = vector.broadcast %648 : vector<8x1xf32> to vector<8x512xf32>
    %651 = vector.broadcast %649 : vector<1x512xf32> to vector<8x512xf32>
    %652 = arith.mulf %650, %651 : vector<8x512xf32>
    %653 = arith.addf %647, %652 : vector<8x512xf32>
    %c0_139 = arith.constant 0 : index
    %c78 = arith.constant 78 : index
    %654 = vector.load %arg1[%c0_139, %c78] : memref<8x104xf32, #tpu.memory_space<vmem>>, vector<8x1xf32>
    %655 = vector.extract_strided_slice %641 {offsets = [2, 0], sizes = [1, 512], strides = [1, 1]} : vector<8x512xf32> to vector<1x512xf32>
    %656 = vector.broadcast %654 : vector<8x1xf32> to vector<8x512xf32>
    %657 = vector.broadcast %655 : vector<1x512xf32> to vector<8x512xf32>
    %658 = arith.mulf %656, %657 : vector<8x512xf32>
    %659 = arith.addf %653, %658 : vector<8x512xf32>
    %c0_140 = arith.constant 0 : index
    %c79 = arith.constant 79 : index
    %660 = vector.load %arg1[%c0_140, %c79] : memref<8x104xf32, #tpu.memory_space<vmem>>, vector<8x1xf32>
    %661 = vector.extract_strided_slice %641 {offsets = [3, 0], sizes = [1, 512], strides = [1, 1]} : vector<8x512xf32> to vector<1x512xf32>
    %662 = vector.broadcast %660 : vector<8x1xf32> to vector<8x512xf32>
    %663 = vector.broadcast %661 : vector<1x512xf32> to vector<8x512xf32>
    %664 = arith.mulf %662, %663 : vector<8x512xf32>
    %665 = arith.addf %659, %664 : vector<8x512xf32>
    %c0_141 = arith.constant 0 : index
    %c80 = arith.constant 80 : index
    %666 = vector.load %arg1[%c0_141, %c80] : memref<8x104xf32, #tpu.memory_space<vmem>>, vector<8x1xf32>
    %667 = vector.extract_strided_slice %641 {offsets = [4, 0], sizes = [1, 512], strides = [1, 1]} : vector<8x512xf32> to vector<1x512xf32>
    %668 = vector.broadcast %666 : vector<8x1xf32> to vector<8x512xf32>
    %669 = vector.broadcast %667 : vector<1x512xf32> to vector<8x512xf32>
    %670 = arith.mulf %668, %669 : vector<8x512xf32>
    %671 = arith.addf %665, %670 : vector<8x512xf32>
    %c0_142 = arith.constant 0 : index
    %c81 = arith.constant 81 : index
    %672 = vector.load %arg1[%c0_142, %c81] : memref<8x104xf32, #tpu.memory_space<vmem>>, vector<8x1xf32>
    %673 = vector.extract_strided_slice %641 {offsets = [5, 0], sizes = [1, 512], strides = [1, 1]} : vector<8x512xf32> to vector<1x512xf32>
    %674 = vector.broadcast %672 : vector<8x1xf32> to vector<8x512xf32>
    %675 = vector.broadcast %673 : vector<1x512xf32> to vector<8x512xf32>
    %676 = arith.mulf %674, %675 : vector<8x512xf32>
    %677 = arith.addf %671, %676 : vector<8x512xf32>
    %c0_143 = arith.constant 0 : index
    %c82 = arith.constant 82 : index
    %678 = vector.load %arg1[%c0_143, %c82] : memref<8x104xf32, #tpu.memory_space<vmem>>, vector<8x1xf32>
    %679 = vector.extract_strided_slice %641 {offsets = [6, 0], sizes = [1, 512], strides = [1, 1]} : vector<8x512xf32> to vector<1x512xf32>
    %680 = vector.broadcast %678 : vector<8x1xf32> to vector<8x512xf32>
    %681 = vector.broadcast %679 : vector<1x512xf32> to vector<8x512xf32>
    %682 = arith.mulf %680, %681 : vector<8x512xf32>
    %683 = arith.addf %677, %682 : vector<8x512xf32>
    %c0_144 = arith.constant 0 : index
    %c83 = arith.constant 83 : index
    %684 = vector.load %arg1[%c0_144, %c83] : memref<8x104xf32, #tpu.memory_space<vmem>>, vector<8x1xf32>
    %685 = vector.extract_strided_slice %641 {offsets = [7, 0], sizes = [1, 512], strides = [1, 1]} : vector<8x512xf32> to vector<1x512xf32>
    %686 = vector.broadcast %684 : vector<8x1xf32> to vector<8x512xf32>
    %687 = vector.broadcast %685 : vector<1x512xf32> to vector<8x512xf32>
    %688 = arith.mulf %686, %687 : vector<8x512xf32>
    %689 = arith.addf %683, %688 : vector<8x512xf32>
    %c0_145 = arith.constant 0 : index
    %c84 = arith.constant 84 : index
    %690 = vector.load %arg1[%c0_145, %c84] : memref<8x104xf32, #tpu.memory_space<vmem>>, vector<8x1xf32>
    %691 = vector.extract_strided_slice %587 {offsets = [0, 0], sizes = [1, 512], strides = [1, 1]} : vector<8x512xf32> to vector<1x512xf32>
    %692 = vector.broadcast %690 : vector<8x1xf32> to vector<8x512xf32>
    %693 = vector.broadcast %691 : vector<1x512xf32> to vector<8x512xf32>
    %694 = arith.mulf %692, %693 : vector<8x512xf32>
    %695 = arith.addf %689, %694 : vector<8x512xf32>
    %c0_146 = arith.constant 0 : index
    %c85 = arith.constant 85 : index
    %696 = vector.load %arg1[%c0_146, %c85] : memref<8x104xf32, #tpu.memory_space<vmem>>, vector<8x1xf32>
    %697 = vector.extract_strided_slice %587 {offsets = [1, 0], sizes = [1, 512], strides = [1, 1]} : vector<8x512xf32> to vector<1x512xf32>
    %698 = vector.broadcast %696 : vector<8x1xf32> to vector<8x512xf32>
    %699 = vector.broadcast %697 : vector<1x512xf32> to vector<8x512xf32>
    %700 = arith.mulf %698, %699 : vector<8x512xf32>
    %701 = arith.addf %695, %700 : vector<8x512xf32>
    %c0_147 = arith.constant 0 : index
    %c86 = arith.constant 86 : index
    %702 = vector.load %arg1[%c0_147, %c86] : memref<8x104xf32, #tpu.memory_space<vmem>>, vector<8x1xf32>
    %703 = vector.extract_strided_slice %587 {offsets = [2, 0], sizes = [1, 512], strides = [1, 1]} : vector<8x512xf32> to vector<1x512xf32>
    %704 = vector.broadcast %702 : vector<8x1xf32> to vector<8x512xf32>
    %705 = vector.broadcast %703 : vector<1x512xf32> to vector<8x512xf32>
    %706 = arith.mulf %704, %705 : vector<8x512xf32>
    %707 = arith.addf %701, %706 : vector<8x512xf32>
    %c0_148 = arith.constant 0 : index
    %c87 = arith.constant 87 : index
    %708 = vector.load %arg1[%c0_148, %c87] : memref<8x104xf32, #tpu.memory_space<vmem>>, vector<8x1xf32>
    %709 = vector.extract_strided_slice %587 {offsets = [3, 0], sizes = [1, 512], strides = [1, 1]} : vector<8x512xf32> to vector<1x512xf32>
    %710 = vector.broadcast %708 : vector<8x1xf32> to vector<8x512xf32>
    %711 = vector.broadcast %709 : vector<1x512xf32> to vector<8x512xf32>
    %712 = arith.mulf %710, %711 : vector<8x512xf32>
    %713 = arith.addf %707, %712 : vector<8x512xf32>
    %c0_149 = arith.constant 0 : index
    %c88 = arith.constant 88 : index
    %714 = vector.load %arg1[%c0_149, %c88] : memref<8x104xf32, #tpu.memory_space<vmem>>, vector<8x1xf32>
    %715 = vector.extract_strided_slice %587 {offsets = [4, 0], sizes = [1, 512], strides = [1, 1]} : vector<8x512xf32> to vector<1x512xf32>
    %716 = vector.broadcast %714 : vector<8x1xf32> to vector<8x512xf32>
    %717 = vector.broadcast %715 : vector<1x512xf32> to vector<8x512xf32>
    %718 = arith.mulf %716, %717 : vector<8x512xf32>
    %719 = arith.addf %713, %718 : vector<8x512xf32>
    %c0_150 = arith.constant 0 : index
    %c89 = arith.constant 89 : index
    %720 = vector.load %arg1[%c0_150, %c89] : memref<8x104xf32, #tpu.memory_space<vmem>>, vector<8x1xf32>
    %721 = vector.extract_strided_slice %587 {offsets = [5, 0], sizes = [1, 512], strides = [1, 1]} : vector<8x512xf32> to vector<1x512xf32>
    %722 = vector.broadcast %720 : vector<8x1xf32> to vector<8x512xf32>
    %723 = vector.broadcast %721 : vector<1x512xf32> to vector<8x512xf32>
    %724 = arith.mulf %722, %723 : vector<8x512xf32>
    %725 = arith.addf %719, %724 : vector<8x512xf32>
    %c0_151 = arith.constant 0 : index
    %c90 = arith.constant 90 : index
    %726 = vector.load %arg1[%c0_151, %c90] : memref<8x104xf32, #tpu.memory_space<vmem>>, vector<8x1xf32>
    %727 = vector.extract_strided_slice %587 {offsets = [6, 0], sizes = [1, 512], strides = [1, 1]} : vector<8x512xf32> to vector<1x512xf32>
    %728 = vector.broadcast %726 : vector<8x1xf32> to vector<8x512xf32>
    %729 = vector.broadcast %727 : vector<1x512xf32> to vector<8x512xf32>
    %730 = arith.mulf %728, %729 : vector<8x512xf32>
    %731 = arith.addf %725, %730 : vector<8x512xf32>
    %c0_152 = arith.constant 0 : index
    %c91 = arith.constant 91 : index
    %732 = vector.load %arg1[%c0_152, %c91] : memref<8x104xf32, #tpu.memory_space<vmem>>, vector<8x1xf32>
    %733 = vector.extract_strided_slice %587 {offsets = [7, 0], sizes = [1, 512], strides = [1, 1]} : vector<8x512xf32> to vector<1x512xf32>
    %734 = vector.broadcast %732 : vector<8x1xf32> to vector<8x512xf32>
    %735 = vector.broadcast %733 : vector<1x512xf32> to vector<8x512xf32>
    %736 = arith.mulf %734, %735 : vector<8x512xf32>
    %737 = arith.addf %731, %736 : vector<8x512xf32>
    %c511_i32_153 = arith.constant 511 : i32
    %738 = tpu.dynamic_rotate %587 by %c511_i32_153 dim 1 : vector<8x512xf32>, i32 -> vector<8x512xf32>
    %cst_154 = arith.constant 0.000000e+00 : f32
    %739 = vector.shape_cast %12 : vector<1x512xi1> to vector<1x512xi1>
    %740 = vector.broadcast %739 : vector<1x512xi1> to vector<8x512xi1>
    %741 = vector.broadcast %cst_154 : f32 to vector<8x512xf32>
    %742 = arith.select %740, %738, %741 : vector<8x512xi1>, vector<8x512xf32>
    %c0_155 = arith.constant 0 : index
    %c92 = arith.constant 92 : index
    %743 = vector.load %arg1[%c0_155, %c92] : memref<8x104xf32, #tpu.memory_space<vmem>>, vector<8x1xf32>
    %744 = vector.extract_strided_slice %742 {offsets = [0, 0], sizes = [1, 512], strides = [1, 1]} : vector<8x512xf32> to vector<1x512xf32>
    %745 = vector.broadcast %743 : vector<8x1xf32> to vector<8x512xf32>
    %746 = vector.broadcast %744 : vector<1x512xf32> to vector<8x512xf32>
    %747 = arith.mulf %745, %746 : vector<8x512xf32>
    %748 = arith.addf %737, %747 : vector<8x512xf32>
    %c0_156 = arith.constant 0 : index
    %c93 = arith.constant 93 : index
    %749 = vector.load %arg1[%c0_156, %c93] : memref<8x104xf32, #tpu.memory_space<vmem>>, vector<8x1xf32>
    %750 = vector.extract_strided_slice %742 {offsets = [1, 0], sizes = [1, 512], strides = [1, 1]} : vector<8x512xf32> to vector<1x512xf32>
    %751 = vector.broadcast %749 : vector<8x1xf32> to vector<8x512xf32>
    %752 = vector.broadcast %750 : vector<1x512xf32> to vector<8x512xf32>
    %753 = arith.mulf %751, %752 : vector<8x512xf32>
    %754 = arith.addf %748, %753 : vector<8x512xf32>
    %c0_157 = arith.constant 0 : index
    %c94 = arith.constant 94 : index
    %755 = vector.load %arg1[%c0_157, %c94] : memref<8x104xf32, #tpu.memory_space<vmem>>, vector<8x1xf32>
    %756 = vector.extract_strided_slice %742 {offsets = [2, 0], sizes = [1, 512], strides = [1, 1]} : vector<8x512xf32> to vector<1x512xf32>
    %757 = vector.broadcast %755 : vector<8x1xf32> to vector<8x512xf32>
    %758 = vector.broadcast %756 : vector<1x512xf32> to vector<8x512xf32>
    %759 = arith.mulf %757, %758 : vector<8x512xf32>
    %760 = arith.addf %754, %759 : vector<8x512xf32>
    %c0_158 = arith.constant 0 : index
    %c95 = arith.constant 95 : index
    %761 = vector.load %arg1[%c0_158, %c95] : memref<8x104xf32, #tpu.memory_space<vmem>>, vector<8x1xf32>
    %762 = vector.extract_strided_slice %742 {offsets = [3, 0], sizes = [1, 512], strides = [1, 1]} : vector<8x512xf32> to vector<1x512xf32>
    %763 = vector.broadcast %761 : vector<8x1xf32> to vector<8x512xf32>
    %764 = vector.broadcast %762 : vector<1x512xf32> to vector<8x512xf32>
    %765 = arith.mulf %763, %764 : vector<8x512xf32>
    %766 = arith.addf %760, %765 : vector<8x512xf32>
    %c0_159 = arith.constant 0 : index
    %c96 = arith.constant 96 : index
    %767 = vector.load %arg1[%c0_159, %c96] : memref<8x104xf32, #tpu.memory_space<vmem>>, vector<8x1xf32>
    %768 = vector.extract_strided_slice %742 {offsets = [4, 0], sizes = [1, 512], strides = [1, 1]} : vector<8x512xf32> to vector<1x512xf32>
    %769 = vector.broadcast %767 : vector<8x1xf32> to vector<8x512xf32>
    %770 = vector.broadcast %768 : vector<1x512xf32> to vector<8x512xf32>
    %771 = arith.mulf %769, %770 : vector<8x512xf32>
    %772 = arith.addf %766, %771 : vector<8x512xf32>
    %c0_160 = arith.constant 0 : index
    %c97 = arith.constant 97 : index
    %773 = vector.load %arg1[%c0_160, %c97] : memref<8x104xf32, #tpu.memory_space<vmem>>, vector<8x1xf32>
    %774 = vector.extract_strided_slice %742 {offsets = [5, 0], sizes = [1, 512], strides = [1, 1]} : vector<8x512xf32> to vector<1x512xf32>
    %775 = vector.broadcast %773 : vector<8x1xf32> to vector<8x512xf32>
    %776 = vector.broadcast %774 : vector<1x512xf32> to vector<8x512xf32>
    %777 = arith.mulf %775, %776 : vector<8x512xf32>
    %778 = arith.addf %772, %777 : vector<8x512xf32>
    %c0_161 = arith.constant 0 : index
    %c98 = arith.constant 98 : index
    %779 = vector.load %arg1[%c0_161, %c98] : memref<8x104xf32, #tpu.memory_space<vmem>>, vector<8x1xf32>
    %780 = vector.extract_strided_slice %742 {offsets = [6, 0], sizes = [1, 512], strides = [1, 1]} : vector<8x512xf32> to vector<1x512xf32>
    %781 = vector.broadcast %779 : vector<8x1xf32> to vector<8x512xf32>
    %782 = vector.broadcast %780 : vector<1x512xf32> to vector<8x512xf32>
    %783 = arith.mulf %781, %782 : vector<8x512xf32>
    %784 = arith.addf %778, %783 : vector<8x512xf32>
    %c0_162 = arith.constant 0 : index
    %c99 = arith.constant 99 : index
    %785 = vector.load %arg1[%c0_162, %c99] : memref<8x104xf32, #tpu.memory_space<vmem>>, vector<8x1xf32>
    %786 = vector.extract_strided_slice %742 {offsets = [7, 0], sizes = [1, 512], strides = [1, 1]} : vector<8x512xf32> to vector<1x512xf32>
    %787 = vector.broadcast %785 : vector<8x1xf32> to vector<8x512xf32>
    %788 = vector.broadcast %786 : vector<1x512xf32> to vector<8x512xf32>
    %789 = arith.mulf %787, %788 : vector<8x512xf32>
    %790 = arith.addf %784, %789 : vector<8x512xf32>
    %cst_163 = arith.constant dense<0.000000e+00> : vector<8xf32>
    %791 = vector.multi_reduction <add>, %790, %cst_163 [1] : vector<8x512xf32> to vector<8xf32>
    %792 = vector.shape_cast %791 : vector<8xf32> to vector<8x1xf32>
    %cst_164 = arith.constant 5.120000e+02 : f32
    %793 = vector.broadcast %cst_164 : f32 to vector<8x1xf32>
    %794 = arith.divf %792, %793 : vector<8x1xf32>
    %795 = arith.mulf %790, %790 : vector<8x512xf32>
    %cst_165 = arith.constant dense<0.000000e+00> : vector<8xf32>
    %796 = vector.multi_reduction <add>, %795, %cst_165 [1] : vector<8x512xf32> to vector<8xf32>
    %797 = vector.shape_cast %796 : vector<8xf32> to vector<8x1xf32>
    %cst_166 = arith.constant 5.120000e+02 : f32
    %798 = vector.broadcast %cst_166 : f32 to vector<8x1xf32>
    %799 = arith.divf %797, %798 : vector<8x1xf32>
    %800 = arith.mulf %794, %794 : vector<8x1xf32>
    %801 = arith.subf %799, %800 : vector<8x1xf32>
    %c0_167 = arith.constant 0 : index
    %c4_168 = arith.constant 4 : index
    %802 = vector.load %arg2[%c0_167, %c4_168] : memref<8x8xf32, #tpu.memory_space<vmem>>, vector<8x1xf32>
    %c0_169 = arith.constant 0 : index
    %c5_170 = arith.constant 5 : index
    %803 = vector.load %arg2[%c0_169, %c5_170] : memref<8x8xf32, #tpu.memory_space<vmem>>, vector<8x1xf32>
    %cst_171 = arith.constant 9.99999974E-6 : f32
    %804 = vector.broadcast %cst_171 : f32 to vector<8x1xf32>
    %805 = arith.addf %801, %804 : vector<8x1xf32>
    %806 = math.rsqrt %805 : vector<8x1xf32>
    %807 = arith.mulf %802, %806 : vector<8x1xf32>
    %808 = arith.mulf %794, %807 : vector<8x1xf32>
    %809 = arith.subf %803, %808 : vector<8x1xf32>
    %810 = vector.broadcast %807 : vector<8x1xf32> to vector<8x512xf32>
    %811 = arith.mulf %790, %810 : vector<8x512xf32>
    %812 = vector.broadcast %809 : vector<8x1xf32> to vector<8x512xf32>
    %813 = arith.addf %811, %812 : vector<8x512xf32>
    %814 = arith.addf %813, %635 : vector<8x512xf32>
    %cst_172 = arith.constant 0.000000e+00 : f32
    %815 = vector.broadcast %cst_172 : f32 to vector<8x512xf32>
    %816 = arith.maximumf %814, %815 : vector<8x512xf32>
    %c0_173 = arith.constant 0 : index
    %c0_174 = arith.constant 0 : index
    %817 = vector.load %arg3[%c0_173, %c0_174] : memref<8x512xf32, #tpu.memory_space<vmem>>, vector<8x512xf32>
    tpu.vector_store %arg3[%c0_173, %c0_174], %816 {strides = array<i32>} : memref<8x512xf32, #tpu.memory_space<vmem>>, vector<8x512xf32>,
    return
  }
}

</mosaic_0001>

<bundles_post_ra>
// kernel: tpu_custom_call.1
= control target key start
LH: loop header
LB: loop body
LE: loop exit
PB: predicated region body
PF: predicated region fallthrough
CT: control target
= control target key end

     0   :  { %8 = vsyncpa [#allocation3], 0  ;;  %s4986_s0 = inlined_call_operand.hbm [shape: f32[4,512], index: 0, kind: input, shape index: {}]   ;;  %s4987_s1 = inlined_call_operand.hbm [shape: f32[8,104], index: 1, kind: input, shape index: {}]   ;;  %s4988_s2 = inlined_call_operand.hbm [shape: f32[8,8], index: 2, kind: input, shape index: {}]   ;;  %s4989_s3 = inlined_call_operand.hbm [shape: f32[8,512], index: 3, kind: output, shape index: {}]  }
   0x1   :  { %9 = vsyncpa [#allocation6], 0  ;;  %s27_s14 = sshll.u32 %s4987_s1, 4  ;;  %s28_s14 = int_to_ptr.hbm [resolvable:$true] %s27_s14 }
   0x2   :  { %10 = vsyncpa [#allocation4], 0  ;;  %s2789_s15 = smov [#allocation5]   ;;  %s16_s19 = sshll.u32 %s4986_s0, 4  ;;  %s17_s19 = int_to_ptr.hbm [resolvable:$true] %s16_s19 }
   0x3   :  { %s29_s16 = sshll.u32 %s2789_s15, 4  ;;  %s2790_s20 = smov [#allocation2]   ;;  %s30_s16 = int_to_ptr.vmem [resolvable:$true] %s29_s16 }
   0x4   :  { %32 = dma.hbm_to_vmem [thread:$0]  %s28_s14, 128, %s30_s16, [#allocation6]  }
   0x5   :  { %s18_s21 = sshll.u32 %s2790_s20, 4  ;;  %s38_s24 = sshll.u32 %s4988_s2, 4  ;;  %s19_s21 = int_to_ptr.vmem [resolvable:$true] %s18_s21  ;;  %s39_s24 = int_to_ptr.hbm [resolvable:$true] %s38_s24 }
   0x6   :  { %21 = dma.hbm_to_vmem [thread:$0]  %s17_s19, 256, %s19_s21, [#allocation3]  }
   0x7   :  { %s2791_s1 = smov [#allocation7]  }
   0x8   :  { %s40_s25 = sshll.u32 %s2791_s1, 4  ;;  %s41_s25 = int_to_ptr.vmem [resolvable:$true] %s40_s25 }
   0x9   :  { %43 = dma.hbm_to_vmem [thread:$0]  %s39_s24, 128, %s41_s25, [#allocation6]  }
   0xa   :  { %2783 = dma.done.wait [#allocation3], 256  }
   0xb   :  { %2784 = vsyncadd [#allocation3], 4294967040 }
   0xc   :  { %2785 = dma.done.wait [#allocation6], 256  }
   0xd   :  { %2786 = vsyncadd [#allocation6], 4294967040  ;;  %v4995_v0 = vmov 3   ;;  %v4998_v1 = vmov 0   ;;  %v4996_v2 = vmov 2   ;;  %v2938_v3 = vld [vmem:[#allocation5] sm:$0xff] }
   0xe   :  { %2563 = vset.pattern.permute.xlu1 %v4995_v0  ;;  %2560 = vset.pattern.permute.xlu2 %v4998_v1  ;;  %v2940_v4 = vld [vmem:[#allocation2 + $0x8] sm:$0xff]  ;;  %v2942_v5 = vld [vmem:[#allocation2] sm:$0xff]  ;;  %s2795_s0 = smov 4   ;;  %v4997_v9 = vmov 1   ;;  %v4993_v11 = vmov 4   ;;  %v4990_v16 = vmov 5  }
   0xf   :  { %2562 = vset.pattern.permute.xlu0 %v4996_v2  ;;  %188 = vperm.xlu1 %2563, %v2938_v3   ;;  %103 = vst [vmem:[#allocation1 + $0x10] ss:$2 sm:$0xff] %v2940_v4  ;;  %s2799_s2 = smov 3   ;;  %v4994_v21 = vmov 6   ;;  %v4992_v22 = vmov 7   ;;  %s2802_s26 = smov 2  }
  0x10   :  { %140 = vperm.xlu2 %2560, %v2938_v3   ;;  %101 = vst [vmem:[#allocation1] ss:$2 sm:$0xff] %v2942_v5  ;;  %v2803_v25 = vmov 9   ;;  %v2804_v27 = vmov 10   ;;  %v2805_v28 = vmov 8   ;;  %s2806_s27 = smov 1  }
  0x11   :  { %v2807_v32 = vmov 11   ;;  %v2808_v33 = vmov 14   ;;  %v2809_v34 = vmov 13   ;;  %v2810_v37 = vmov 12   ;;  %s2811_s28 = smov 127   ;;  %s2815_s29 = smov 126  }
  0x12   :  { %v2812_v38 = vmov 19   ;;  %v2813_v41 = vmov 15   ;;  %v2814_v44 = vmov 16   ;;  %v2816_v46 = vmov 23   ;;  %s2821_s30 = smov 125   ;;  %s2824_s4 = smov 124  }
  0x13   :  { %v2817_v47 = vmov 17   ;;  %v2818_v49 = vmov 18   ;;  %v2819_v51 = vmov 21   ;;  %v2820_v52 = vmov 20   ;;  %s2905_s5 = smov [#allocation8]   ;;  %s2432_s9 = sshll.u32 %s4989_s3, 4  ;;  %s2433_s9 = int_to_ptr.hbm [resolvable:$true] %s2432_s9 }
  0x14   :  { %v2822_v54 = vmov 27   ;;  %v2823_v60 = vmov 22   ;;  %v2825_v63 = vmov 31   ;;  %s2430_s6 = sshll.u32 %s2905_s5, 4  ;;  %s2431_s6 = int_to_ptr.vmem [resolvable:$true] %s2430_s6 }
  0x16   :  { %v106_v6 = vld.sshfl [vmem:[#allocation1 + $0x10] sm:$0xff pattern:$0x75316420]  ;;  %v107_v7 = vld.sshfl [vmem:[#allocation1 + $0x18] sm:$0xff pattern:$0x75316420] }
  0x17   :  { %116 = vrot.lane.b32.xlu1 %v106_v6, %s2795_s0  ;;  %v104_v8 = vld.sshfl [vmem:[#allocation1] sm:$0xff pattern:$0x75316420]  ;;  %205 = vst [vmem:[#allocation1 + $0x10] ss:$2 sm:$0xff] %v2940_v4 }
  0x18   :  { %2561 = vset.pattern.permute.xlu2 %v4997_v9  ;;  %112 = vrot.lane.b32.xlu0 %v104_v8, %s2795_s0  ;;  %v105_v10 = vld.sshfl [vmem:[#allocation1 + $0x8] sm:$0xff pattern:$0x75316420]  ;;  %v2827_v8 = vmov 24  }
  0x19   :  { %156 = vperm.xlu2 %2561, %v2938_v3   ;;  %203 = vst [vmem:[#allocation1] ss:$2 sm:$0xff] %v2942_v5  ;;  %2564 = vset.pattern.permute.xlu1 %v4993_v11 }
  0x1e   :  { %v209_v12 = vld.sshfl [vmem:[#allocation1 + $0x18] sm:$0xff pattern:$0x75316420]  ;;  %v208_v13 = vld.sshfl [vmem:[#allocation1 + $0x10] sm:$0xff pattern:$0x75316420] }
  0x1f   :  { %118 = vrot.lane.b32.xlu1 %v107_v7, %s2795_s0  ;;  %307 = vst [vmem:[#allocation1 + $0x10] ss:$2 sm:$0xff] %v2940_v4  ;;  %v2826_v7 = vmov 25  }
  0x20   :  { %114 = vrot.lane.b32.xlu0 %v105_v10, %s2795_s0  ;;  %v207_v14 = vld.sshfl [vmem:[#allocation1 + $0x8] sm:$0xff pattern:$0x75316420]  ;;  %v206_v15 = vld.sshfl [vmem:[#allocation1] sm:$0xff pattern:$0x75316420] }
  0x21   :  { %2565 = vset.pattern.permute.xlu2 %v4990_v16  ;;  %305 = vst [vmem:[#allocation1] ss:$2 sm:$0xff] %v2942_v5 }
  0x22   :  { %214 = vrot.lane.b32.xlu2 %v206_v15, %s2799_s2 }
  0x26   :  { %v310_v17 = vld.sshfl [vmem:[#allocation1 + $0x10] sm:$0xff pattern:$0x75316420]  ;;  %v311_v20 = vld.sshfl [vmem:[#allocation1 + $0x18] sm:$0xff pattern:$0x75316420] }
  0x27   :  { %216 = vrot.lane.b32.xlu1 %v207_v14, %s2799_s2  ;;  %409 = vst [vmem:[#allocation1 + $0x10] ss:$2 sm:$0xff] %v2940_v4 }
  0x28   :  { %172 = vperm.xlu0 %2562, %v2938_v3   ;;  %v309_v18 = vld.sshfl [vmem:[#allocation1 + $0x8] sm:$0xff pattern:$0x75316420]  ;;  %v308_v19 = vld.sshfl [vmem:[#allocation1] sm:$0xff pattern:$0x75316420] }
  0x29   :  { %407 = vst [vmem:[#allocation1] ss:$2 sm:$0xff] %v2942_v5 }
  0x2a   :  { %218 = vrot.lane.b32.xlu2 %v208_v13, %s2799_s2 }
  0x2e   :  { %v413_v26 = vld.sshfl [vmem:[#allocation1 + $0x18] sm:$0xff pattern:$0x75316420]  ;;  %v412_v29 = vld.sshfl [vmem:[#allocation1 + $0x10] sm:$0xff pattern:$0x75316420] }
  0x2f   :  { %242 = vperm.xlu1 %2564, %v2938_v3   ;;  %607 = vst [vmem:[#allocation1 + $0x10] ss:$2 sm:$0xff] %v2940_v4 }
  0x30   :  { %220 = vrot.lane.b32.xlu0 %v209_v12, %s2799_s2  ;;  %v411_v23 = vld.sshfl [vmem:[#allocation1 + $0x8] sm:$0xff pattern:$0x75316420]  ;;  %v410_v24 = vld.sshfl [vmem:[#allocation1] sm:$0xff pattern:$0x75316420] }
  0x31   :  { %2566 = vset.pattern.permute.xlu0 %v4994_v21  ;;  %605 = vst [vmem:[#allocation1] ss:$2 sm:$0xff] %v2942_v5 }
  0x32   :  { %258 = vperm.xlu2 %2565, %v2938_v3  }
  0x36   :  { %v610_v39 = vld.sshfl [vmem:[#allocation1 + $0x10] sm:$0xff pattern:$0x75316420]  ;;  %v611_v40 = vld.sshfl [vmem:[#allocation1 + $0x18] sm:$0xff pattern:$0x75316420] }
  0x37   :  { %2567 = vset.pattern.permute.xlu1 %v4992_v22  ;;  %709 = vst [vmem:[#allocation1 + $0x10] ss:$2 sm:$0xff] %v2940_v4 }
  0x38   :  { %274 = vperm.xlu0 %2566, %v2938_v3   ;;  %290 = vperm.xlu1 %2567, %v2938_v3   ;;  %v608_v30 = vld.sshfl [vmem:[#allocation1] sm:$0xff pattern:$0x75316420]  ;;  %v609_v31 = vld.sshfl [vmem:[#allocation1 + $0x8] sm:$0xff pattern:$0x75316420] }
  0x39   :  { %707 = vst [vmem:[#allocation1] ss:$2 sm:$0xff] %v2942_v5 }
  0x3a   :  { %316 = vrot.lane.b32.xlu2 %v308_v19, %s2802_s26  ;;  %v2828_v19 = vmov 26  }
  0x3b   :  { %2569 = vset.pattern.permute.xlu2 %v2803_v25  ;;  %v2829_v25 = vmov 29  }
  0x3e   :  { %v713_v55 = vld.sshfl [vmem:[#allocation1 + $0x18] sm:$0xff pattern:$0x75316420]  ;;  %v712_v56 = vld.sshfl [vmem:[#allocation1 + $0x10] sm:$0xff pattern:$0x75316420] }
  0x3f   :  { %811 = vst [vmem:[#allocation1 + $0x10] ss:$2 sm:$0xff] %v2940_v4 }
  0x40   :  { %322 = vrot.lane.b32.xlu0 %v311_v20, %s2802_s26  ;;  %318 = vrot.lane.b32.xlu1 %v309_v18, %s2802_s26  ;;  %v710_v35 = vld.sshfl [vmem:[#allocation1] sm:$0xff pattern:$0x75316420]  ;;  %v2978_v36 = vld.sshfl [vmem:[#allocation1 + $0x8] sm:$0xff pattern:$0x75316420] }
  0x41   :  { %2570 = vset.pattern.permute.xlu0 %v2804_v27  ;;  %2568 = vset.pattern.permute.xlu1 %v2805_v28  ;;  %809 = vst [vmem:[#allocation1] ss:$2 sm:$0xff] %v2942_v5  ;;  %v2830_v27 = vmov 28   ;;  %v2831_v28 = vmov 35  }
  0x42   :  { %320 = vrot.lane.b32.xlu2 %v310_v17, %s2802_s26 }
  0x46   :  { %v815_v12 = vld.sshfl [vmem:[#allocation1 + $0x18] sm:$0xff pattern:$0x75316420]  ;;  %v814_v13 = vld.sshfl [vmem:[#allocation1 + $0x10] sm:$0xff pattern:$0x75316420] }
  0x47   :  { %913 = vst [vmem:[#allocation1 + $0x10] ss:$2 sm:$0xff] %v2940_v4 }
  0x48   :  { %376 = vperm.xlu0 %2570, %v2938_v3   ;;  %344 = vperm.xlu1 %2568, %v2938_v3   ;;  %v2991_v43 = vld.sshfl [vmem:[#allocation1 + $0x8] sm:$0xff pattern:$0x75316420]  ;;  %v812_v45 = vld.sshfl [vmem:[#allocation1] sm:$0xff pattern:$0x75316420] }
  0x49   :  { %911 = vst [vmem:[#allocation1] ss:$2 sm:$0xff] %v2942_v5 }
  0x4a   :  { %360 = vperm.xlu2 %2569, %v2938_v3  }
  0x50   :  { %424 = vrot.lane.b32.xlu0 %v413_v26, %s2806_s27  ;;  %2571 = vset.pattern.permute.xlu1 %v2807_v32  ;;  %v914_v61 = vld.sshfl [vmem:[#allocation1] sm:$0xff pattern:$0x75316420]  ;;  %v56_v26 = vlaneseq }
  0x51   :  { %392 = vperm.xlu1 %2571, %v2938_v3   ;;  %2574 = vset.pattern.permute.xlu0 %v2808_v33 }
  0x52   :  { %418 = vrot.lane.b32.xlu2 %v410_v24, %s2806_s27 }
  0x53   :  { %2573 = vset.pattern.permute.xlu2 %v2809_v34 }
  0x58   :  { %478 = vperm.xlu0 %2574, %v2938_v3  }
  0x59   :  { %420 = vrot.lane.b32.xlu1 %v411_v23, %s2806_s27 }
  0x5a   :  { %2572 = vset.pattern.permute.xlu1 %v2810_v37  ;;  %422 = vrot.lane.b32.xlu2 %v412_v29, %s2806_s27  ;;  %v3049_v29 = vand.u32 127, %v56_v26 }
  0x5c   :  { %v60_v33 = vadd.s32 384, %v3049_v29  ;;  %v58_v34 = vadd.s32 128, %v3049_v29  ;;  %v59_v37 = vadd.s32 256, %v3049_v29  ;;  %vm120_vm0 = vcmp.lt.s32.totalorder %v3049_v29, 4 }
  0x5d   :  { %vm222_vm5 = vcmp.lt.s32.totalorder %v3049_v29, 3  ;;  %vm324_vm11 = vcmp.lt.s32.totalorder %v3049_v29, 2  ;;  %vm426_vm15 = vcmp.lt.s32.totalorder %v3049_v29, 1 }
  0x60   :  { %616 = vrot.lane.b32.xlu0 %v608_v30, %s2811_s28 }
  0x61   :  { %446 = vperm.xlu1 %2572, %v2938_v3   ;;  %2579 = vset.pattern.permute.xlu0 %v2812_v38 }
  0x62   :  { %462 = vperm.xlu2 %2573, %v2938_v3  }
  0x68   :  { %582 = vperm.xlu0 %2579, %v2938_v3  }
  0x69   :  { %2575 = vset.pattern.permute.xlu1 %v2813_v41 }
  0x6a   :  { %v2989_v42 = vpop.permute.xlu2 %140  ;;  %494 = vperm.xlu1 %2575, %v2938_v3   ;;  %2576 = vset.pattern.permute.xlu2 %v2814_v44 }
  0x6b   :  { %510 = vperm.xlu2 %2576, %v2938_v3  }
  0x70   :  { %718 = vrot.lane.b32.xlu0 %v710_v35, %s2815_s29  ;;  %v3062_v35 = vand.u32 15, %v3049_v29 }
  0x71   :  { %2583 = vset.pattern.permute.xlu0 %v2816_v46  ;;  %v2832_v46 = vmov 30  }
  0x72   :  { %2577 = vset.pattern.permute.xlu1 %v2817_v47  ;;  %5040 = vst [vmem:[#allocation12_spill] sm:$0xff] %v3062_v35  ;;  %vm65_vm1 = vcmp.ge.s32.totalorder %v3062_v35, 4  ;;  %vm69_vm8 = vcmp.ge.s32.totalorder %v3062_v35, 3  ;;  %vm73_vm10 = vcmp.ge.s32.totalorder %v3062_v35, 2 }
  0x73   :  { %v2997_v48 = vpop.permute.xlu2 %156  ;;  %534 = vperm.xlu1 %2577, %v2938_v3   ;;  %2578 = vset.pattern.permute.xlu2 %v2818_v49  ;;  %v915_v49 = vld.sshfl [vmem:[#allocation1 + $0x8] sm:$0xff pattern:$0x75316420] }
  0x74   :  { %558 = vperm.xlu2 %2578, %v2938_v3  }
  0x78   :  { %692 = vperm.xlu0 %2583, %v2938_v3  }
  0x7b   :  { %618 = vrot.lane.b32.xlu1 %v609_v31, %s2811_s28 }
  0x7c   :  { %v3003_v50 = vpop.permute.xlu2 %214  ;;  %620 = vrot.lane.b32.xlu2 %v610_v39, %s2811_s28  ;;  %2581 = vset.pattern.permute.xlu1 %v2819_v51  ;;  %v3071_v39 = vand.u32 15, %v58_v34 }
  0x7d   :  { %2580 = vset.pattern.permute.xlu2 %v2820_v52 }
  0x7e   :  { %5042 = vst [vmem:[#allocation14_spill] sm:$0xff] %v3071_v39  ;;  %vm66_vm3 = vcmp.ge.s32.totalorder %v3071_v39, 4  ;;  %vm70_vm6 = vcmp.ge.s32.totalorder %v3071_v39, 3  ;;  %vm74_vm13 = vcmp.ge.s32.totalorder %v3071_v39, 2 }
  0x80   :  { %820 = vrot.lane.b32.xlu0 %v812_v45, %s2821_s30  ;;  %v3082_v45 = vand.u32 15, %v59_v37  ;;  %v917_v37 = vld.sshfl [vmem:[#allocation1 + $0x18] sm:$0xff pattern:$0x75316420] }
  0x81   :  { %v3007_v53 = vpop.permute.xlu1 %188  ;;  %2587 = vset.pattern.permute.xlu0 %v2822_v54 }
  0x82   :  { %5043 = vst [vmem:[#allocation15_spill] sm:$0xff] %v3082_v45  ;;  %vm67_vm4 = vcmp.ge.s32.totalorder %v3082_v45, 4  ;;  %vm71_vm7 = vcmp.ge.s32.totalorder %v3082_v45, 3  ;;  %vm75_vm14 = vcmp.ge.s32.totalorder %v3082_v45, 2 }
  0x83   :  { %622 = vrot.lane.b32.xlu1 %v611_v40, %s2811_s28 }
  0x84   :  { %v3010_v57 = vpop.permute.xlu2 %218  ;;  %644 = vperm.xlu2 %2580, %v2938_v3  }
  0x88   :  { %794 = vperm.xlu0 %2587, %v2938_v3  }
  0x89   :  { %v3015_v58 = vpop.permute.xlu1 %116 }
  0x8a   :  { %v113_v15 = vpop.permute.xlu0 %112 }
  0x8b   :  { %660 = vperm.xlu1 %2581, %v2938_v3  }
  0x8c   :  { %v3018_v59 = vpop.permute.xlu2 %258  ;;  %2582 = vset.pattern.permute.xlu2 %v2823_v60 }
  0x8d   :  { %676 = vperm.xlu2 %2582, %v2938_v3  }
  0x90   :  { %922 = vrot.lane.b32.xlu0 %v914_v61, %s2824_s4 }
  0x91   :  { %v119_v62 = vpop.permute.xlu1 %118  ;;  %2591 = vset.pattern.permute.xlu0 %v2825_v63  ;;  %v2833_v63 = vmov 33  }
  0x92   :  { %v115_v20 = vpop.permute.xlu0 %114  ;;  %v124_v44 = vsel %vm120_vm0, %v119_v62, %v113_v15 }
  0x93   :  { %720 = vrot.lane.b32.xlu1 %v2978_v36, %s2815_s29  ;;  %v3064_v36 = vand.u32 15, %v60_v33  ;;  %v123_v47 = vsel %vm120_vm0, %v113_v15, %v115_v20  ;;  %v3088_v51 = vsel %vm65_vm1, %v124_v44, 0.0  ;;  %v122_v54 = vsel %vm120_vm0, %v115_v20, %v3015_v58 }
  0x94   :  { %v3024_v6 = vpop.permute.xlu2 %316  ;;  %2585 = vset.pattern.permute.xlu1 %v2826_v7  ;;  %v143_v60 = vperm.slane %v3088_v51, 0  ;;  %v159_v7 = vperm.slane %v3088_v51, 1  ;;  %v191_v15 = vperm.slane %v3088_v51, 3  ;;  %vm78_vm1 = vcmp.ge.s32.totalorder %v3071_v39, 1 }
  0x95   :  { %722 = vrot.lane.b32.xlu2 %v712_v56, %s2815_s29  ;;  %5041 = vst [vmem:[#allocation13_spill] sm:$0xff] %v3064_v36  ;;  %vm68_vm2 = vcmp.ge.s32.totalorder %v3064_v36, 4  ;;  %vm72_vm9 = vcmp.ge.s32.totalorder %v3064_v36, 3  ;;  %vm76_vm12 = vcmp.ge.s32.totalorder %v3064_v36, 2 }
  0x96   :  { %2584 = vset.pattern.permute.xlu2 %v2827_v8  ;;  %v163_v44 = vmul.f32 %v159_v7, %v2997_v48 }
  0x98   :  { %896 = vperm.xlu0 %2591, %v2938_v3  }
  0x99   :  { %v3028_v10 = vpop.permute.xlu1 %216 }
  0x9a   :  { %v3053_v31 = vpop.permute.xlu0 %172 }
  0x9b   :  { %724 = vrot.lane.b32.xlu1 %v713_v55, %s2815_s29  ;;  %v3096_v55 = vsel %vm66_vm3, %v123_v47, 0.0  ;;  %v175_v47 = vperm.slane %v3088_v51, 2  ;;  %vm79_vm3 = vcmp.ge.s32.totalorder %v3082_v45, 1 }
  0x9c   :  { %v3032_v14 = vpop.permute.xlu2 %320  ;;  %v160_v20 = vperm.slane %v3096_v55, 1 }
  0x9d   :  { %746 = vperm.xlu2 %2584, %v2938_v3   ;;  %v179_v51 = vmul.f32 %v175_v47, %v3053_v31 }
  0xa0   :  { %2595 = vset.pattern.permute.xlu0 %v2831_v28 }
  0xa1   :  { %v3035_v17 = vpop.permute.xlu1 %242  ;;  %998 = vperm.xlu0 %2595, %v2938_v3  }
  0xa2   :  { %v221_v40 = vpop.permute.xlu0 %220 }
  0xa3   :  { %762 = vperm.xlu1 %2585, %v2938_v3  }
  0xa4   :  { %v3038_v18 = vpop.permute.xlu2 %360 }
  0xa5   :  { %2586 = vset.pattern.permute.xlu2 %v2828_v19 }
  0xa6   :  { %778 = vperm.xlu2 %2586, %v2938_v3  }
  0xaa   :  { %v3041_v23 = vpop.permute.xlu1 %290  ;;  %v3121_v26 = vpop.permute.xlu0 %274 }
  0xab   :  { %822 = vrot.lane.b32.xlu1 %v2991_v43, %s2821_s30  ;;  %v121_v43 = vsel %vm120_vm0, %v3015_v58, %v119_v62  ;;  %v916_v62 = vld.sshfl [vmem:[#allocation1 + $0x10] sm:$0xff pattern:$0x75316420]  ;;  %v3106_v58 = vsel %vm67_vm4, %v122_v54, 0.0  ;;  %vm77_vm0 = vcmp.ge.s32.totalorder %v3062_v35, 1  ;;  %vm624_vm4 = vcmp.lt.s32.totalorder %v3049_v29, 127 }
  0xac   :  { %v3045_v24 = vpop.permute.xlu2 %418  ;;  %2589 = vset.pattern.permute.xlu1 %v2829_v25  ;;  %v3090_v52 = vsel %vm68_vm2, %v121_v43, 0.0  ;;  %v226_v25 = vsel %vm222_vm5, %v221_v40, %v3003_v50  ;;  %v145_v33 = vperm.slane %v3106_v58, 0  ;;  %v161_v34 = vperm.slane %v3106_v58, 1 }
  0xad   :  { %v146_v61 = vperm.slane %v3090_v52, 0  ;;  %v194_v19 = vperm.slane %v3090_v52, 3  ;;  %v2834_v43 = vmov 32   ;;  %v178_v7 = vperm.slane %v3090_v52, 2 }
  0xae   :  { %824 = vrot.lane.b32.xlu2 %v814_v13, %s2821_s30  ;;  %v144_v13 = vperm.slane %v3096_v55, 0  ;;  %vm80_vm2 = vcmp.ge.s32.totalorder %v3064_v36, 1 }
  0xaf   :  { %2588 = vset.pattern.permute.xlu2 %v2830_v27  ;;  %v147_v27 = vmul.f32 %v143_v60, %v2989_v42  ;;  %v150_v28 = vmul.f32 %v146_v61, %v2989_v42  ;;  %v177_v61 = vperm.slane %v3106_v58, 2  ;;  %v182_v47 = vmul.f32 %v178_v7, %v3053_v31 }
  0xb0   :  { %v148_v60 = vmul.f32 %v144_v13, %v2989_v42  ;;  %v149_v13 = vmul.f32 %v145_v33, %v2989_v42  ;;  %v192_v42 = vperm.slane %v3096_v55, 3  ;;  %v198_v7 = vmul.f32 %v194_v19, %v3007_v53 }
  0xb2   :  { %v3051_v30 = vpop.permute.xlu1 %318 }
  0xb3   :  { %826 = vrot.lane.b32.xlu1 %v815_v12, %s2821_s30  ;;  %v162_v12 = vperm.slane %v3090_v52, 1  ;;  %v224_v52 = vsel %vm222_vm5, %v3028_v10, %v3010_v57 }
  0xb4   :  { %v3056_v32 = vpop.permute.xlu2 %422 }
  0xb5   :  { %v166_v54 = vmul.f32 %v162_v12, %v2997_v48 }
  0xb6   :  { %848 = vperm.xlu2 %2588, %v2938_v3  }
  0xb7   :  { %v170_v33 = vadd.f32 %v166_v54, %v150_v28 }
  0xb9   :  { %v186_v54 = vadd.f32 %v182_v47, %v170_v33 }
  0xba   :  { %v3067_v38 = vpop.permute.xlu1 %344 }
  0xbb   :  { %864 = vperm.xlu1 %2589, %v2938_v3  }
  0xbc   :  { %v3074_v41 = vpop.permute.xlu2 %462 }
  0xbe   :  { %2590 = vset.pattern.permute.xlu2 %v2832_v46  ;;  %v176_v46 = vperm.slane %v3096_v55, 2  ;;  %v195_v55 = vmul.f32 %v191_v15, %v3007_v53 }
  0xbf   :  { %880 = vperm.xlu2 %2590, %v2938_v3  }
  0xc3   :  { %v3099_v56 = vpop.permute.xlu1 %392  ;;  %924 = vrot.lane.b32.xlu1 %v915_v49, %s2824_s4  ;;  %v223_v49 = vsel %vm222_vm5, %v3010_v57, %v221_v40  ;;  %v225_v40 = vsel %vm222_vm5, %v3003_v50, %v3028_v10  ;;  %v180_v50 = vmul.f32 %v176_v46, %v3053_v31  ;;  %vm5002_vm5 = vcmp.lt.s32.totalorder %v3062_v35, 15 }
  0xc4   :  { %2593 = vset.pattern.permute.xlu1 %v2833_v63  ;;  %v164_v63 = vmul.f32 %v160_v20, %v2997_v48  ;;  %v3159_v20 = vsel %vm72_vm9, %v223_v49, 0.0  ;;  %vm5003_vm9 = vcmp.lt.s32.totalorder %v3062_v35, 14 }
  0xc5   :  { %v3109_v8 = vpop.permute.xlu2 %510  ;;  %v264_v33 = vperm.slane %v3159_v20, 1 }
  0xc6   :  { %v168_v10 = vadd.f32 %v164_v63, %v148_v60  ;;  %v3182_v63 = vpop.permute.xlu0 %322 }
  0xc7   :  { %926 = vrot.lane.b32.xlu2 %v916_v62, %s2824_s4  ;;  %v3139_v62 = vsel %vm69_vm8, %v226_v25, 0.0  ;;  %v165_v25 = vmul.f32 %v161_v34, %v2997_v48  ;;  %v181_v48 = vmul.f32 %v177_v61, %v3053_v31  ;;  %v3168_v34 = vsel %vm70_vm6, %v225_v40, 0.0 }
  0xc8   :  { %2592 = vset.pattern.permute.xlu2 %v2834_v43  ;;  %v167_v43 = vadd.f32 %v163_v44, %v147_v27  ;;  %v3174_v27 = vsel %vm71_vm7, %v224_v52, 0.0  ;;  %v248_v44 = vperm.slane %v3159_v20, 0  ;;  %v193_v31 = vperm.slane %v3106_v58, 3 }
  0xc9   :  { %v169_v28 = vadd.f32 %v165_v25, %v149_v13  ;;  %v184_v46 = vadd.f32 %v180_v50, %v168_v10  ;;  %v246_v61 = vperm.slane %v3168_v34, 0  ;;  %v247_v52 = vperm.slane %v3174_v27, 0 }
  0xca   :  { %v183_v49 = vadd.f32 %v179_v51, %v167_v43  ;;  %v196_v51 = vmul.f32 %v192_v42, %v3007_v53  ;;  %v261_v15 = vperm.slane %v3139_v62, 1  ;;  %v252_v13 = vmul.f32 %v248_v44, %v3035_v17 }
  0xcb   :  { %v3148_v12 = vpop.permute.xlu1 %420  ;;  %928 = vrot.lane.b32.xlu1 %v917_v37, %s2824_s4  ;;  %v245_v37 = vperm.slane %v3139_v62, 0  ;;  %v185_v40 = vadd.f32 %v181_v48, %v169_v28  ;;  %v250_v58 = vmul.f32 %v246_v61, %v3035_v17  ;;  %v197_v50 = vmul.f32 %v193_v31, %v3007_v53 }
  0xcc   :  { %v199_v43 = vadd.f32 %v195_v55, %v183_v49  ;;  %v262_v19 = vperm.slane %v3168_v34, 1  ;;  %v251_v47 = vmul.f32 %v247_v52, %v3035_v17  ;;  %v202_v42 = vadd.f32 %v198_v7, %v186_v54 }
  0xcd   :  { %v249_v60 = vmul.f32 %v245_v37, %v3035_v17  ;;  %v200_v37 = vadd.f32 %v196_v51, %v184_v46  ;;  %v201_v10 = vadd.f32 %v197_v50, %v185_v40  ;;  %v263_v49 = vperm.slane %v3174_v27, 1 }
  0xce   :  { %v3170_v57 = vpop.permute.xlu2 %558  ;;  %v278_v44 = vperm.slane %v3168_v34, 2  ;;  %v265_v53 = vmul.f32 %v261_v15, %v3018_v59  ;;  %v277_v17 = vperm.slane %v3139_v62, 2  ;;  %v256_v28 = vadd.f32 %v252_v13, %v202_v42  ;;  %v3219_v42 = vpop.permute.xlu0 %376 }
  0xcf   :  { %950 = vperm.xlu2 %2592, %v2938_v3   ;;  %v253_v48 = vadd.f32 %v249_v60, %v199_v43  ;;  %v254_v31 = vadd.f32 %v250_v58, %v200_v37  ;;  %v2835_v46 = vmov 34   ;;  %v266_v54 = vmul.f32 %v262_v19, %v3018_v59 }
  0xd0   :  { %v280_v61 = vperm.slane %v3159_v20, 2  ;;  %v255_v60 = vadd.f32 %v251_v47, %v201_v10  ;;  %v279_v7 = vperm.slane %v3174_v27, 2  ;;  %v268_v51 = vmul.f32 %v264_v33, %v3018_v59 }
  0xd1   :  { %v269_v40 = vadd.f32 %v265_v53, %v253_v48  ;;  %v281_v52 = vmul.f32 %v277_v17, %v3121_v26  ;;  %v282_v43 = vmul.f32 %v278_v44, %v3121_v26  ;;  %v267_v15 = vmul.f32 %v263_v49, %v3018_v59 }
  0xd2   :  { %v294_v58 = vperm.slane %v3168_v34, 3  ;;  %v295_v13 = vperm.slane %v3174_v27, 3  ;;  %v293_v50 = vperm.slane %v3139_v62, 3  ;;  %v270_v19 = vadd.f32 %v266_v54, %v254_v31 }
  0xd3   :  { %v3190_v25 = vpop.permute.xlu1 %446  ;;  %966 = vperm.xlu1 %2593, %v2938_v3   ;;  %v272_v47 = vadd.f32 %v268_v51, %v256_v28  ;;  %v283_v37 = vmul.f32 %v279_v7, %v3121_v26  ;;  %v296_v33 = vperm.slane %v3159_v20, 3  ;;  %v271_v48 = vadd.f32 %v267_v15, %v255_v60 }
  0xd4   :  { %v285_v34 = vadd.f32 %v281_v52, %v269_v40  ;;  %v286_v27 = vadd.f32 %v282_v43, %v270_v19  ;;  %v297_v62 = vmul.f32 %v293_v50, %v3041_v23  ;;  %v298_v10 = vmul.f32 %v294_v58, %v3041_v23 }
  0xd5   :  { %v299_v49 = vmul.f32 %v295_v13, %v3041_v23  ;;  %v328_v20 = vsel %vm324_vm11, %v3182_v63, %v3024_v6  ;;  %v327_v44 = vsel %vm324_vm11, %v3024_v6, %v3051_v30  ;;  %v287_v17 = vadd.f32 %v283_v37, %v271_v48 }
  0xd6   :  { %v3201_v55 = vpop.permute.xlu2 %620  ;;  %v325_v28 = vsel %vm324_vm11, %v3032_v14, %v3182_v63  ;;  %v3254_v6 = vsel %vm74_vm13, %v327_v44, 0.0  ;;  %v301_v54 = vadd.f32 %v297_v62, %v285_v34  ;;  %v302_v60 = vadd.f32 %v298_v10, %v286_v27  ;;  %v425_v50 = vpop.permute.xlu0 %424 }
  0xd7   :  { %2594 = vset.pattern.permute.xlu2 %v2835_v46  ;;  %v3250_v46 = vsel %vm73_vm10, %v328_v20, 0.0  ;;  %v303_v7 = vadd.f32 %v299_v49, %v287_v17  ;;  %v348_v52 = vperm.slane %v3254_v6, 0  ;;  %v514_v43 = vperm.slane %v2942_v5, 4 }
  0xd8   :  { %982 = vperm.xlu2 %2594, %v2938_v3   ;;  %v284_v3 = vmul.f32 %v280_v61, %v3121_v26  ;;  %v300_v26 = vmul.f32 %v296_v33, %v3041_v23  ;;  %v326_v23 = vsel %vm324_vm11, %v3051_v30, %v3032_v14  ;;  %v3258_v61 = vsel %vm76_vm12, %v325_v28, 0.0 }
  0xd9   :  { %v3262_v63 = vsel %vm75_vm14, %v326_v23, 0.0  ;;  %v513_v30 = vperm.slane %v2942_v5, 0  ;;  %v347_v51 = vperm.slane %v3250_v46, 0  ;;  %v363_v40 = vperm.slane %v3250_v46, 1 }
  0xda   :  { %v288_v31 = vadd.f32 %v284_v3, %v272_v47  ;;  %v350_v15 = vperm.slane %v3258_v61, 0  ;;  %v366_v58 = vperm.slane %v3258_v61, 1  ;;  %v349_v13 = vperm.slane %v3262_v63, 0 }
  0xdb   :  { %v515_v19 = vperm.slane %v2940_v4, 0  ;;  %v379_v37 = vperm.slane %v3250_v46, 2  ;;  %v351_v3 = vmul.f32 %v347_v51, %v3067_v38  ;;  %v352_v33 = vmul.f32 %v348_v52, %v3067_v38 }
  0xdc   :  { %v3224_v59 = vpop.permute.xlu1 %494  ;;  %v304_v14 = vadd.f32 %v300_v26, %v288_v31  ;;  %v516_v48 = vperm.slane %v2940_v4, 4  ;;  %v382_v34 = vperm.slane %v3258_v61, 2  ;;  %v364_v27 = vperm.slane %v3254_v6, 1 }
  0xdd   :  { %v353_v62 = vmul.f32 %v349_v13, %v3067_v38  ;;  %v354_v10 = vmul.f32 %v350_v15, %v3067_v38  ;;  %v367_v26 = vmul.f32 %v363_v40, %v3038_v18  ;;  %v395_v20 = vperm.slane %v3250_v46, 3 }
  0xde   :  { %v3238_v53 = vpop.permute.xlu2 %644  ;;  %v398_v44 = vperm.slane %v3258_v61, 3  ;;  %v365_v17 = vperm.slane %v3262_v63, 1  ;;  %v370_v31 = vmul.f32 %v366_v58, %v3038_v18  ;;  %v396_v28 = vperm.slane %v3254_v6, 3 }
  0xdf   :  { %v397_v38 = vperm.slane %v3262_v63, 3  ;;  %v380_v23 = vperm.slane %v3254_v6, 2  ;;  %v381_v51 = vperm.slane %v3262_v63, 2  ;;  %v355_v52 = vadd.f32 %v351_v3, %v301_v54 }
  0xe0   :  { %v356_v15 = vadd.f32 %v352_v33, %v302_v60  ;;  %v3299_v13 = vperm.slane %v513_v30, 0  ;;  %v368_v46 = vmul.f32 %v364_v27, %v3038_v18  ;;  %v357_v40 = vadd.f32 %v353_v62, %v303_v7 }
  0xe1   :  { %v358_v61 = vadd.f32 %v354_v10, %v304_v14  ;;  %v3302_v16 = vperm.slane %v514_v43, 0  ;;  %v369_v58 = vmul.f32 %v365_v17, %v3038_v18  ;;  %v3305_v22 = vperm.slane %v515_v19, 0 }
  0xe2   :  { %5044 = vst [vmem:[#allocation16_spill] sm:$0xff] %v3299_v13  ;;  %v3307_v11 = vperm.slane %v516_v48, 0  ;;  %v561_v6 = vperm.slane %v2942_v5, 2  ;;  %v383_v63 = vmul.f32 %v379_v37, %v3219_v42  ;;  %v562_v54 = vperm.slane %v2942_v5, 6  ;;  %v3326_v48 = vpop.permute.xlu0 %478 }
  0xe3   :  { %5045 = vst [vmem:[#allocation17_spill] sm:$0xff] %v3302_v16  ;;  %v563_v60 = vperm.slane %v2940_v4, 2  ;;  %v564_v30 = vperm.slane %v2940_v4, 6  ;;  %v371_v14 = vadd.f32 %v367_v26, %v355_v52  ;;  %v372_v43 = vadd.f32 %v368_v46, %v356_v15 }
  0xe4   :  { %5046 = vst [vmem:[#allocation18_spill] sm:$0xff] %v3305_v22  ;;  %v430_v18 = vsel %vm426_vm15, %v425_v50, %v3045_v24  ;;  %v429_v19 = vsel %vm426_vm15, %v3045_v24, %v3148_v12  ;;  %v373_v37 = vadd.f32 %v369_v58, %v357_v40  ;;  %v374_v3 = vadd.f32 %v370_v31, %v358_v61 }
  0xe5   :  { %v3274_v47 = vpop.permute.xlu1 %534  ;;  %5047 = vst [vmem:[#allocation19_spill] sm:$0xff] %v3307_v11  ;;  %v427_v33 = vsel %vm426_vm15, %v3056_v32, %v425_v50  ;;  %v428_v27 = vsel %vm426_vm15, %v3148_v12, %v3056_v32  ;;  %v384_v62 = vmul.f32 %v380_v23, %v3219_v42  ;;  %v385_v10 = vmul.f32 %v381_v51, %v3219_v42 }
  0xe6   :  { %v386_v26 = vmul.f32 %v382_v34, %v3219_v42  ;;  %v3335_v24 = vperm.slane %v561_v6, 2  ;;  %v3339_v17 = vsel %vm77_vm0, %v430_v18, 0.0  ;;  %v3343_v50 = vsel %vm78_vm1, %v429_v19, 0.0 }
  0xe7   :  { %v3288_v49 = vpop.permute.xlu2 %676  ;;  %v3345_v31 = vperm.slane %v562_v54, 2  ;;  %v3347_v52 = vperm.slane %v563_v60, 2  ;;  %v3353_v12 = vsel %vm80_vm2, %v427_v33, 0.0  ;;  %v3357_v42 = vsel %vm79_vm3, %v428_v27, 0.0 }
  0xe8   :  { %5048 = vst [vmem:[#allocation20_spill] sm:$0xff] %v3335_v24  ;;  %v3359_v34 = vperm.slane %v564_v30, 2  ;;  %v585_v23 = vperm.slane %v2942_v5, 3  ;;  %v387_v51 = vadd.f32 %v383_v63, %v371_v14  ;;  %v388_v15 = vadd.f32 %v384_v62, %v372_v43 }
  0xe9   :  { %5049 = vst [vmem:[#allocation21_spill] sm:$0xff] %v3345_v31  ;;  %v389_v46 = vadd.f32 %v385_v10, %v373_v37  ;;  %v390_v40 = vadd.f32 %v386_v26, %v374_v3  ;;  %v449_v61 = vperm.slane %v3339_v17, 0  ;;  %v399_v58 = vmul.f32 %v395_v20, %v3099_v56 }
  0xea   :  { %5050 = vst [vmem:[#allocation22_spill] sm:$0xff] %v3347_v52  ;;  %v400_v6 = vmul.f32 %v396_v28, %v3099_v56  ;;  %v450_v54 = vperm.slane %v3343_v50, 0  ;;  %v452_v60 = vperm.slane %v3353_v12, 0  ;;  %v401_v18 = vmul.f32 %v397_v38, %v3099_v56 }
  0xeb   :  { %5051 = vst [vmem:[#allocation23_spill] sm:$0xff] %v3359_v34  ;;  %v402_v30 = vmul.f32 %v398_v44, %v3099_v56  ;;  %v451_v19 = vperm.slane %v3357_v42, 0  ;;  %v453_v14 = vmul.f32 %v449_v61, %v3190_v25  ;;  %v586_v20 = vperm.slane %v2942_v5, 7  ;;  %v3380_v44 = vpop.permute.xlu0 %616 }
  0xec   :  { %v454_v43 = vmul.f32 %v450_v54, %v3190_v25  ;;  %v587_v28 = vperm.slane %v2940_v4, 3  ;;  %v465_v37 = vperm.slane %v3339_v17, 1  ;;  %v468_v3 = vperm.slane %v3353_v12, 1 }
  0xed   :  { %v3314_v7 = vpop.permute.xlu1 %618  ;;  %v455_v38 = vmul.f32 %v451_v19, %v3190_v25  ;;  %v456_v56 = vmul.f32 %v452_v60, %v3190_v25  ;;  %v481_v33 = vperm.slane %v3339_v17, 2  ;;  %v403_v27 = vadd.f32 %v399_v58, %v387_v51 }
  0xee   :  { %v404_v62 = vadd.f32 %v400_v6, %v388_v15  ;;  %v466_v10 = vperm.slane %v3343_v50, 1  ;;  %v484_v26 = vperm.slane %v3353_v12, 2  ;;  %v405_v61 = vadd.f32 %v401_v18, %v389_v46 }
  0xef   :  { %v3349_v32 = vpop.permute.xlu2 %722  ;;  %v406_v54 = vadd.f32 %v402_v30, %v390_v40  ;;  %v467_v21 = vperm.slane %v3357_v42, 1  ;;  %v497_v0 = vperm.slane %v3339_v17, 3  ;;  %v500_v19 = vperm.slane %v3353_v12, 3 }
  0xf0   :  { %v457_v2 = vadd.f32 %v453_v14, %v403_v27  ;;  %v458_v25 = vadd.f32 %v454_v43, %v404_v62  ;;  %v469_v60 = vmul.f32 %v465_v37, %v3074_v41  ;;  %v472_v9 = vmul.f32 %v468_v3, %v3074_v41 }
  0xf1   :  { %v459_v51 = vadd.f32 %v455_v38, %v405_v61  ;;  %v460_v15 = vadd.f32 %v456_v56, %v406_v54  ;;  %v470_v6 = vmul.f32 %v466_v10, %v3074_v41  ;;  %v482_v46 = vperm.slane %v3343_v50, 2 }
  0xf2   :  { %v525_v40 = vmul.f32 %v3299_v13, %v3109_v8  ;;  %v588_v17 = vperm.slane %v2940_v4, 7  ;;  %v471_v12 = vmul.f32 %v467_v21, %v3074_v41  ;;  %v483_v18 = vperm.slane %v3357_v42, 2 }
  0xf3   :  { %v537_v30 = vperm.slane %v2942_v5, 1  ;;  %v538_v14 = vperm.slane %v2942_v5, 5  ;;  %v498_v37 = vperm.slane %v3343_v50, 3  ;;  %v473_v3 = vadd.f32 %v469_v60, %v457_v2  ;;  %v583_v60 = vpop.permute.xlu0 %582 }
  0xf4   :  { %v474_v38 = vadd.f32 %v470_v6, %v458_v25  ;;  %v539_v56 = vperm.slane %v2940_v4, 1  ;;  %v499_v27 = vperm.slane %v3357_v42, 3  ;;  %v475_v62 = vadd.f32 %v471_v12, %v459_v51 }
  0xf5   :  { %v3370_v63 = vpop.permute.xlu1 %622  ;;  %v476_v10 = vadd.f32 %v472_v9, %v460_v15  ;;  %v540_v21 = vperm.slane %v2940_v4, 5  ;;  %v485_v41 = vmul.f32 %v481_v33, %v3326_v48  ;;  %v486_v61 = vmul.f32 %v482_v46, %v3326_v48 }
  0xf6   :  { %v501_v54 = vmul.f32 %v497_v0, %v3224_v59  ;;  %v502_v1 = vmul.f32 %v498_v37, %v3224_v59  ;;  %v488_v50 = vmul.f32 %v484_v26, %v3326_v48  ;;  %v487_v2 = vmul.f32 %v483_v18, %v3326_v48 }
  0xf7   :  { %v3390_v58 = vpop.permute.xlu2 %746  ;;  %v503_v25 = vmul.f32 %v499_v27, %v3224_v59  ;;  %v504_v42 = vmul.f32 %v500_v19, %v3224_v59  ;;  %v489_v9 = vadd.f32 %v485_v41, %v473_v3  ;;  %v490_v51 = vadd.f32 %v486_v61, %v474_v38 }
  0xf8   :  { %v3415_v15 = vperm.slane %v537_v30, 1  ;;  %v3417_v33 = vperm.slane %v538_v14, 1  ;;  %v491_v6 = vadd.f32 %v487_v2, %v475_v62  ;;  %v492_v46 = vadd.f32 %v488_v50, %v476_v10 }
  0xf9   :  { %v3419_v0 = vperm.slane %v539_v56, 1  ;;  %v3421_v12 = vperm.slane %v540_v21, 1  ;;  %v526_v48 = vmul.f32 %v3302_v16, %v3109_v8  ;;  %v527_v26 = vmul.f32 %v3305_v22, %v3109_v8 }
  0xfa   :  { %5052 = vst [vmem:[#allocation24_spill] sm:$0xff] %v3415_v15  ;;  %v505_v59 = vadd.f32 %v501_v54, %v489_v9  ;;  %v506_v19 = vadd.f32 %v502_v1, %v490_v51  ;;  %v528_v18 = vmul.f32 %v3307_v11, %v3109_v8  ;;  %v507_v30 = vadd.f32 %v503_v25, %v491_v6 }
  0xfb   :  { %5053 = vst [vmem:[#allocation25_spill] sm:$0xff] %v3417_v33  ;;  %v508_v14 = vadd.f32 %v504_v42, %v492_v46  ;;  %v3431_v37 = vperm.slane %v585_v23, 3  ;;  %v3439_v56 = vperm.slane %v586_v20, 3  ;;  %v3443_v1 = vperm.slane %v587_v28, 3  ;;  %v3468_v54 = vpop.permute.xlu0 %718 }
  0xfc   :  { %5054 = vst [vmem:[#allocation26_spill] sm:$0xff] %v3419_v0  ;;  %v549_v8 = vmul.f32 %v3415_v15, %v3274_v47  ;;  %v550_v27 = vmul.f32 %v3417_v33, %v3274_v47  ;;  %v3449_v23 = vperm.slane %v588_v17, 3  ;;  %v551_v62 = vmul.f32 %v3419_v0, %v3274_v47 }
  0xfd   :  { %v3401_v43 = vpop.permute.xlu1 %660  ;;  %5055 = vst [vmem:[#allocation27_spill] sm:$0xff] %v3421_v12  ;;  %v552_v5 = vmul.f32 %v3421_v12, %v3274_v47  ;;  %v529_v20 = vadd.f32 %v525_v40, %v505_v59  ;;  %v530_v4 = vadd.f32 %v526_v48, %v506_v19  ;;  %vm5000_vm6 = vcmp.lt.s32.totalorder %v3071_v39, 15 }
  0xfe   :  { %5056 = vst [vmem:[#allocation28_spill] sm:$0xff] %v3431_v37  ;;  %v531_v28 = vadd.f32 %v527_v26, %v507_v30  ;;  %v532_v10 = vadd.f32 %v528_v18, %v508_v14  ;;  %vm4999_vm7 = vcmp.lt.s32.totalorder %v3082_v45, 15  ;;  %vm5001_vm8 = vcmp.lt.s32.totalorder %v3064_v36, 15 }
  0xff   :  { %5057 = vst [vmem:[#allocation29_spill] sm:$0xff] %v3439_v56  ;;  %v553_v17 = vadd.f32 %v549_v8, %v529_v20  ;;  %v554_v21 = vadd.f32 %v550_v27, %v530_v4  ;;  %v626_v47 = vsel %vm624_vm4, %v3314_v7, %v3201_v55  ;;  %v627_v40 = vsel %vm624_vm4, %v3380_v44, %v3314_v7 }
 0x100   :  { %v3435_v38 = vpop.permute.xlu2 %778  ;;  %5058 = vst [vmem:[#allocation30_spill] sm:$0xff] %v3443_v1  ;;  %v555_v41 = vadd.f32 %v551_v62, %v531_v28  ;;  %v556_v61 = vadd.f32 %v552_v5, %v532_v10  ;;  %v625_v50 = vsel %vm624_vm4, %v3201_v55, %v3370_v63  ;;  %v628_v2 = vsel %vm624_vm4, %v3370_v63, %v3380_v44 }
 0x101   :  { %5059 = vst [vmem:[#allocation31_spill] sm:$0xff] %v3449_v23  ;;  %v573_v25 = vmul.f32 %v3335_v24, %v3170_v57  ;;  %v574_v7 = vmul.f32 %v3345_v31, %v3170_v57  ;;  %v575_v42 = vmul.f32 %v3347_v52, %v3170_v57  ;;  %v576_v9 = vmul.f32 %v3359_v34, %v3170_v57 }
 0x102   :  { %v597_v51 = vmul.f32 %v3431_v37, %v583_v60  ;;  %v598_v55 = vmul.f32 %v3439_v56, %v583_v60  ;;  %v3490_v6 = vsel %vm5002_vm5, %v627_v40, 0.0  ;;  %v3494_v63 = vsel %vm5000_vm6, %v626_v47, 0.0 }
 0x103   :  { %v599_v46 = vmul.f32 %v3443_v1, %v583_v60  ;;  %v600_v48 = vmul.f32 %v3449_v23, %v583_v60  ;;  %v3500_v57 = vsel %vm4999_vm7, %v625_v50, 0.0  ;;  %v3504_v26 = vsel %vm5001_vm8, %v628_v2, 0.0  ;;  %v693_v40 = vpop.permute.xlu0 %692 }
 0x104   :  { %v577_v59 = vadd.f32 %v573_v25, %v553_v17  ;;  %v578_v19 = vadd.f32 %v574_v7, %v554_v21  ;;  %v579_v18 = vadd.f32 %v575_v42, %v555_v41  ;;  %v580_v30 = vadd.f32 %v576_v9, %v556_v61 }
 0x105   :  { %v3433_v3 = vpop.permute.xlu1 %720  ;;  %v647_v8 = vperm.slane %v3490_v6, 0  ;;  %v648_v27 = vperm.slane %v3494_v63, 0  ;;  %v649_v60 = vperm.slane %v3500_v57, 0  ;;  %v650_v62 = vperm.slane %v3504_v26, 0 }
 0x106   :  { %vm5004_vm7 = vcmp.lt.s32.totalorder %v3071_v39, 14  ;;  %vm5007_vm6 = vcmp.lt.s32.totalorder %v3049_v29, 126  ;;  %v601_v5 = vadd.f32 %v597_v51, %v577_v59  ;;  %v602_v20 = vadd.f32 %v598_v55, %v578_v19 }
 0x107   :  { %v603_v4 = vadd.f32 %v599_v46, %v579_v18  ;;  %v604_v28 = vadd.f32 %v600_v48, %v580_v30  ;;  %vm5006_vm8 = vcmp.lt.s32.totalorder %v3082_v45, 14  ;;  %vm5005_vm5 = vcmp.lt.s32.totalorder %v3064_v36, 14 }
 0x108   :  { %v3506_v14 = vpop.permute.xlu2 %824  ;;  %v651_v10 = vmul.f32 %v647_v8, %v3238_v53  ;;  %v652_v17 = vmul.f32 %v648_v27, %v3238_v53  ;;  %v663_v21 = vperm.slane %v3490_v6, 1  ;;  %v664_v47 = vperm.slane %v3494_v63, 1 }
 0x109   :  { %v653_v41 = vmul.f32 %v649_v60, %v3238_v53  ;;  %v654_v61 = vmul.f32 %v650_v62, %v3238_v53  ;;  %v665_v50 = vperm.slane %v3500_v57, 1  ;;  %v666_v2 = vperm.slane %v3504_v26, 1 }
 0x10a   :  { %v679_v7 = vperm.slane %v3490_v6, 2  ;;  %v680_v42 = vperm.slane %v3494_v63, 2  ;;  %v667_v9 = vmul.f32 %v663_v21, %v3401_v43  ;;  %v668_v51 = vmul.f32 %v664_v47, %v3401_v43 }
 0x10b   :  { %v695_v55 = vperm.slane %v3490_v6, 3  ;;  %v696_v46 = vperm.slane %v3494_v63, 3  ;;  %v669_v53 = vmul.f32 %v665_v50, %v3401_v43  ;;  %v670_v48 = vmul.f32 %v666_v2, %v3401_v43 }
 0x10c   :  { %v681_v59 = vperm.slane %v3500_v57, 2  ;;  %v682_v19 = vperm.slane %v3504_v26, 2  ;;  %v655_v18 = vadd.f32 %v651_v10, %v601_v5  ;;  %v656_v30 = vadd.f32 %v652_v17, %v602_v20 }
 0x10d   :  { %v725_v44 = vpop.permute.xlu1 %724  ;;  %v657_v8 = vadd.f32 %v653_v41, %v603_v4  ;;  %v658_v27 = vadd.f32 %v654_v61, %v604_v28  ;;  %v728_v60 = vsel %vm5007_vm6, %v3433_v3, %v3349_v32  ;;  %v729_v6 = vsel %vm5007_vm6, %v3468_v54, %v3433_v3 }
 0x10e   :  { %v683_v43 = vmul.f32 %v679_v7, %v3288_v49  ;;  %v684_v62 = vmul.f32 %v680_v42, %v3288_v49  ;;  %v671_v5 = vadd.f32 %v667_v9, %v655_v18  ;;  %v672_v20 = vadd.f32 %v668_v51, %v656_v30  ;;  %v821_v7 = vpop.permute.xlu0 %820 }
 0x10f   :  { %v673_v4 = vadd.f32 %v669_v53, %v657_v8  ;;  %v674_v28 = vadd.f32 %v670_v48, %v658_v27  ;;  %v727_v10 = vsel %vm5007_vm6, %v3349_v32, %v725_v44  ;;  %v730_v17 = vsel %vm5007_vm6, %v725_v44, %v3468_v54 }
 0x110   :  { %v3545_v63 = vpop.permute.xlu2 %848  ;;  %v697_v3 = vperm.slane %v3500_v57, 3  ;;  %v698_v21 = vperm.slane %v3504_v26, 3  ;;  %v3559_v47 = vsel %vm5003_vm9, %v729_v6, 0.0  ;;  %v3563_v41 = vsel %vm5004_vm7, %v728_v60, 0.0 }
 0x111   :  { %v699_v61 = vmul.f32 %v695_v55, %v693_v40  ;;  %v700_v50 = vmul.f32 %v696_v46, %v693_v40  ;;  %v685_v32 = vmul.f32 %v681_v59, %v3288_v49  ;;  %v686_v2 = vmul.f32 %v682_v19, %v3288_v49 }
 0x112   :  { %v687_v44 = vadd.f32 %v683_v43, %v671_v5  ;;  %v688_v57 = vadd.f32 %v684_v62, %v672_v20  ;;  %v3569_v26 = vsel %vm5006_vm8, %v727_v10, 0.0  ;;  %v3573_v42 = vsel %vm5005_vm5, %v730_v17, 0.0 }
 0x113   :  { %v689_v9 = vadd.f32 %v685_v32, %v673_v4  ;;  %v690_v51 = vadd.f32 %v686_v2, %v674_v28  ;;  %v749_v55 = vperm.slane %v3559_v47, 0  ;;  %v750_v46 = vperm.slane %v3563_v41, 0 }
 0x114   :  { %v701_v53 = vmul.f32 %v697_v3, %v693_v40  ;;  %v702_v49 = vmul.f32 %v698_v21, %v693_v40  ;;  %vm89_vm9 = vcmp.lt.s32.totalorder %v3062_v35, 13  ;;  %vm90_vm7 = vcmp.lt.s32.totalorder %v3071_v39, 13 }
 0x115   :  { %v3525_v25 = vpop.permute.xlu1 %762  ;;  %v781_v48 = vperm.slane %v3559_v47, 2  ;;  %v751_v59 = vperm.slane %v3569_v26, 0  ;;  %v752_v19 = vperm.slane %v3573_v42, 0  ;;  %vm828_vm5 = vcmp.lt.s32.totalorder %v3049_v29, 125 }
 0x116   :  { %v703_v18 = vadd.f32 %v699_v61, %v687_v44  ;;  %v704_v30 = vadd.f32 %v700_v50, %v688_v57  ;;  %vm91_vm8 = vcmp.lt.s32.totalorder %v3082_v45, 13  ;;  %vm92_vm6 = vcmp.lt.s32.totalorder %v3064_v36, 13  ;;  %v795_v2 = vpop.permute.xlu0 %794 }
 0x117   :  { %v753_v40 = vmul.f32 %v749_v55, %v3390_v58  ;;  %v754_v8 = vmul.f32 %v750_v46, %v3390_v58  ;;  %v705_v27 = vadd.f32 %v701_v53, %v689_v9  ;;  %v706_v60 = vadd.f32 %v702_v49, %v690_v51 }
 0x118   :  { %v765_v43 = vperm.slane %v3559_v47, 1  ;;  %v766_v62 = vperm.slane %v3563_v41, 1  ;;  %v782_v5 = vperm.slane %v3563_v41, 2  ;;  %v797_v20 = vperm.slane %v3559_v47, 3 }
 0x119   :  { %v3587_v6 = vpop.permute.xlu2 %880  ;;  %v798_v4 = vperm.slane %v3563_v41, 3  ;;  %v785_v28 = vmul.f32 %v781_v48, %v3435_v38  ;;  %v755_v10 = vmul.f32 %v751_v59, %v3390_v58  ;;  %v756_v17 = vmul.f32 %v752_v19, %v3390_v58 }
 0x11a   :  { %v767_v21 = vperm.slane %v3569_v26, 1  ;;  %v768_v61 = vperm.slane %v3573_v42, 1  ;;  %v769_v50 = vmul.f32 %v765_v43, %v3525_v25  ;;  %v770_v32 = vmul.f32 %v766_v62, %v3525_v25 }
 0x11b   :  { %v757_v44 = vadd.f32 %v753_v40, %v703_v18  ;;  %v758_v47 = vadd.f32 %v754_v8, %v704_v30  ;;  %v783_v58 = vperm.slane %v3569_v26, 2  ;;  %v784_v46 = vperm.slane %v3573_v42, 2 }
 0x11c   :  { %v771_v9 = vmul.f32 %v767_v21, %v3525_v25  ;;  %v772_v51 = vmul.f32 %v768_v61, %v3525_v25  ;;  %v759_v53 = vadd.f32 %v755_v10, %v705_v27  ;;  %v760_v49 = vadd.f32 %v756_v17, %v706_v60 }
 0x11d   :  { %v823_v54 = vpop.permute.xlu1 %822  ;;  %v773_v59 = vadd.f32 %v769_v50, %v757_v44  ;;  %v774_v19 = vadd.f32 %v770_v32, %v758_v47  ;;  %v786_v18 = vmul.f32 %v782_v5, %v3435_v38  ;;  %v799_v30 = vperm.slane %v3569_v26, 3 }
 0x11e   :  { %v830_v41 = vsel %vm828_vm5, %v823_v54, %v3506_v14  ;;  %v831_v57 = vsel %vm828_vm5, %v821_v7, %v823_v54  ;;  %v775_v8 = vadd.f32 %v771_v9, %v759_v53  ;;  %v776_v27 = vadd.f32 %v772_v51, %v760_v49  ;;  %v3641_v50 = vpop.permute.xlu0 %922 }
 0x11f   :  { %v3617_v54 = vsel %vm89_vm9, %v831_v57, 0.0  ;;  %v3621_v25 = vsel %vm90_vm7, %v830_v41, 0.0  ;;  %v802_v43 = vmul.f32 %v798_v4, %v795_v2  ;;  %v787_v62 = vmul.f32 %v783_v58, %v3435_v38 }
 0x120   :  { %v851_v5 = vperm.slane %v3617_v54, 0  ;;  %v788_v17 = vmul.f32 %v784_v46, %v3435_v38  ;;  %v803_v61 = vmul.f32 %v799_v30, %v795_v2  ;;  %vm930_vm7 = vcmp.lt.s32.totalorder %v3049_v29, 124 }
 0x121   :  { %v3637_v26 = vpop.permute.xlu2 %926  ;;  %v791_v44 = vadd.f32 %v787_v62, %v775_v8  ;;  %v867_v41 = vperm.slane %v3617_v54, 1  ;;  %v868_v57 = vperm.slane %v3621_v25, 1  ;;  %vm96_vm9 = vcmp.lt.s32.totalorder %v3064_v36, 12 }
 0x122   :  { %v792_v47 = vadd.f32 %v788_v17, %v776_v27  ;;  %v855_v38 = vmul.f32 %v851_v5, %v3545_v63  ;;  %v2863_v23 = vmov 62  }
 0x125   :  { %v827_v3 = vpop.permute.xlu1 %826 }
 0x126   :  { %v829_v55 = vsel %vm828_vm5, %v3506_v14, %v827_v3  ;;  %v832_v48 = vsel %vm828_vm5, %v827_v3, %v821_v7  ;;  %v801_v14 = vmul.f32 %v797_v20, %v795_v2  ;;  %v800_v7 = vperm.slane %v3573_v42, 3 }
 0x127   :  { %v3627_v40 = vsel %vm91_vm8, %v829_v55, 0.0  ;;  %v3632_v60 = vsel %vm92_vm6, %v832_v48, 0.0  ;;  %v852_v20 = vperm.slane %v3621_v25, 0  ;;  %v789_v3 = vadd.f32 %v785_v28, %v773_v59 }
 0x128   :  { %v790_v42 = vadd.f32 %v786_v18, %v774_v19  ;;  %v853_v21 = vperm.slane %v3627_v40, 0  ;;  %v854_v4 = vperm.slane %v3632_v60, 0  ;;  %vm93_vm5 = vcmp.lt.s32.totalorder %v3062_v35, 12 }
 0x129   :  { %vm94_vm6 = vcmp.lt.s32.totalorder %v3071_v39, 12  ;;  %v804_v32 = vmul.f32 %v800_v7, %v795_v2  ;;  %v856_v28 = vmul.f32 %v852_v20, %v3545_v63  ;;  %v869_v9 = vperm.slane %v3627_v40, 1 }
 0x12a   :  { %v857_v58 = vmul.f32 %v853_v21, %v3545_v63  ;;  %v805_v51 = vadd.f32 %v801_v14, %v789_v3  ;;  %v806_v55 = vadd.f32 %v802_v43, %v790_v42  ;;  %v858_v2 = vmul.f32 %v854_v4, %v3545_v63  ;;  %v951_v42 = vpop.permute.xlu2 %950 }
 0x12b   :  { %v870_v46 = vperm.slane %v3632_v60, 1  ;;  %v883_v48 = vperm.slane %v3617_v54, 2  ;;  %v884_v59 = vperm.slane %v3621_v25, 2  ;;  %v807_v19 = vadd.f32 %v803_v61, %v791_v44  ;;  %v897_v44 = vpop.permute.xlu0 %896 }
 0x12c   :  { %v808_v18 = vadd.f32 %v804_v32, %v792_v47  ;;  %v859_v30 = vadd.f32 %v855_v38, %v805_v51  ;;  %v860_v7 = vadd.f32 %v856_v28, %v806_v55  ;;  %v885_v14 = vperm.slane %v3627_v40, 2 }
 0x12d   :  { %v865_v10 = vpop.permute.xlu1 %864  ;;  %v886_v43 = vperm.slane %v3632_v60, 2  ;;  %v861_v63 = vadd.f32 %v857_v58, %v807_v19  ;;  %v900_v61 = vperm.slane %v3621_v25, 3  ;;  %v887_v4 = vmul.f32 %v883_v48, %v3587_v6 }
 0x12e   :  { %v871_v53 = vmul.f32 %v867_v41, %v865_v10  ;;  %v872_v49 = vmul.f32 %v868_v57, %v865_v10  ;;  %v873_v8 = vmul.f32 %v869_v9, %v865_v10  ;;  %v874_v27 = vmul.f32 %v870_v46, %v865_v10 }
 0x12f   :  { %v862_v20 = vadd.f32 %v858_v2, %v808_v18  ;;  %v899_v10 = vperm.slane %v3617_v54, 3  ;;  %v888_v32 = vmul.f32 %v884_v59, %v3587_v6  ;;  %v901_v41 = vperm.slane %v3627_v40, 3 }
 0x130   :  { %v875_v17 = vadd.f32 %v871_v53, %v859_v30  ;;  %v876_v3 = vadd.f32 %v872_v49, %v860_v7  ;;  %v877_v47 = vadd.f32 %v873_v8, %v861_v63  ;;  %v902_v57 = vperm.slane %v3632_v60, 3 }
 0x131   :  { %v878_v38 = vadd.f32 %v874_v27, %v862_v20  ;;  %v889_v25 = vmul.f32 %v885_v14, %v3587_v6  ;;  %v890_v58 = vmul.f32 %v886_v43, %v3587_v6  ;;  %v903_v55 = vmul.f32 %v899_v10, %v897_v44 }
 0x132   :  { %v891_v9 = vadd.f32 %v887_v4, %v875_v17  ;;  %v892_v51 = vadd.f32 %v888_v32, %v876_v3  ;;  %vm95_vm8 = vcmp.lt.s32.totalorder %v3082_v45, 12  ;;  %v904_v40 = vmul.f32 %v900_v61, %v897_v44  ;;  %v983_v20 = vpop.permute.xlu2 %982 }
 0x133   :  { %v893_v46 = vadd.f32 %v889_v25, %v877_v47  ;;  %v894_v60 = vadd.f32 %v890_v58, %v878_v38  ;;  %v905_v48 = vmul.f32 %v901_v41, %v897_v44  ;;  %v906_v59 = vmul.f32 %v902_v57, %v897_v44 }
 0x134   :  { %v907_v7 = vadd.f32 %v903_v55, %v891_v9  ;;  %v908_v8 = vadd.f32 %v904_v40, %v892_v51 }
 0x135   :  { %v925_v62 = vpop.permute.xlu1 %924  ;;  %v909_v17 = vadd.f32 %v905_v48, %v893_v46  ;;  %v910_v3 = vadd.f32 %v906_v59, %v894_v60 }
 0x136   :  { %v933_v5 = vsel %vm930_vm7, %v3641_v50, %v925_v62  ;;  %v932_v21 = vsel %vm930_vm7, %v925_v62, %v3637_v26 }
 0x137   :  { %v3671_v28 = vsel %vm93_vm5, %v933_v5, 0.0  ;;  %v3677_v54 = vsel %vm94_vm6, %v932_v21, 0.0 }
 0x138   :  { %v953_v2 = vperm.slane %v3671_v28, 0  ;;  %v954_v53 = vperm.slane %v3677_v54, 0  ;;  %v985_v62 = vperm.slane %v3671_v28, 2  ;;  %v969_v5 = vperm.slane %v3671_v28, 1 }
 0x139   :  { %v986_v21 = vperm.slane %v3677_v54, 2  ;;  %v1001_v61 = vperm.slane %v3671_v28, 3  ;;  %v1002_v4 = vperm.slane %v3677_v54, 3 }
 0x13a   :  { %v957_v27 = vmul.f32 %v953_v2, %v951_v42  ;;  %v958_v63 = vmul.f32 %v954_v53, %v951_v42  ;;  %v989_v47 = vmul.f32 %v985_v62, %v983_v20  ;;  %v999_v2 = vpop.permute.xlu0 %998 }
 0x13b   :  { %v990_v53 = vmul.f32 %v986_v21, %v983_v20  ;;  %v1005_v62 = vmul.f32 %v1001_v61, %v999_v2 }
 0x13c   :  { %v961_v57 = vadd.f32 %v957_v27, %v907_v7  ;;  %v962_v9 = vadd.f32 %v958_v63, %v908_v8  ;;  %v1006_v7 = vmul.f32 %v1002_v4, %v999_v2 }
 0x13d   :  { %v929_v49 = vpop.permute.xlu1 %928 }
 0x13e   :  { %v931_v6 = vsel %vm930_vm7, %v3637_v26, %v929_v49  ;;  %v934_v19 = vsel %vm930_vm7, %v929_v49, %v3641_v50  ;;  %v970_v26 = vperm.slane %v3677_v54, 1 }
 0x13f   :  { %v945_v18 = vsel %vm95_vm8, %v931_v6, 0.0  ;;  %v946_v30 = vsel %vm96_vm9, %v934_v19, 0.0  ;;  %vm5130_vm9 = vcmp.lt.s32.totalorder %v3082_v45, 14 }
 0x140   :  { %v955_v14 = vperm.slane %v945_v18, 0  ;;  %v956_v43 = vperm.slane %v946_v30, 0  ;;  %v987_v32 = vperm.slane %v945_v18, 2  ;;  %v988_v44 = vperm.slane %v946_v30, 2 }
 0x141   :  { %v971_v38 = vperm.slane %v945_v18, 1  ;;  %v972_v41 = vperm.slane %v946_v30, 1  ;;  %v1003_v25 = vperm.slane %v945_v18, 3  ;;  %v1004_v54 = vperm.slane %v946_v30, 3 }
 0x142   :  { %v959_v50 = vmul.f32 %v955_v14, %v951_v42  ;;  %v960_v10 = vmul.f32 %v956_v43, %v951_v42  ;;  %v991_v28 = vmul.f32 %v987_v32, %v983_v20  ;;  %v992_v49 = vmul.f32 %v988_v44, %v983_v20 }
 0x143   :  { %v1007_v18 = vmul.f32 %v1003_v25, %v999_v2  ;;  %v1008_v63 = vmul.f32 %v1004_v54, %v999_v2  ;;  %v2838_v54 = vmov 37  }
 0x144   :  { %v963_v51 = vadd.f32 %v959_v50, %v909_v17  ;;  %v964_v55 = vadd.f32 %v960_v10, %v910_v3  ;;  %2597 = vset.pattern.permute.xlu1 %v2838_v54  ;;  %v2859_v54 = vmov 54  }
 0x145   :  { %v967_v58 = vpop.permute.xlu1 %966 }
 0x146   :  { %v973_v40 = vmul.f32 %v969_v5, %v967_v58  ;;  %v974_v46 = vmul.f32 %v970_v26, %v967_v58  ;;  %v975_v60 = vmul.f32 %v971_v38, %v967_v58  ;;  %v976_v42 = vmul.f32 %v972_v41, %v967_v58 }
 0x147   :  { %v2836_v38 = vmov 512.0  }
 0x148   :  { %v977_v48 = vadd.f32 %v973_v40, %v961_v57  ;;  %v978_v59 = vadd.f32 %v974_v46, %v962_v9  ;;  %v979_v6 = vadd.f32 %v975_v60, %v963_v51  ;;  %v980_v19 = vadd.f32 %v976_v42, %v964_v55  ;;  %v3717_v51 = vld [vmem:[#allocation5] sm:$0xff] }
 0x149   :  { %2673 = vrcp.f32 %v2836_v38  ;;  %v2837_v9 = vmov 38   ;;  %v5061_v46 = vmov 0   ;;  %v2850_v38 = vmov 44  }
 0x14a   :  { %v993_v27 = vadd.f32 %v989_v47, %v977_v48  ;;  %v994_v8 = vadd.f32 %v990_v53, %v978_v59  ;;  %v995_v14 = vadd.f32 %v991_v28, %v979_v6  ;;  %v996_v43 = vadd.f32 %v992_v49, %v980_v19  ;;  %2598 = vset.pattern.permute.xlu0 %v2837_v9 }
 0x14b   :  { %1128 = vperm.xlu0 %2598, %v3717_v51   ;;  %v2839_v59 = vmov 36   ;;  %v2840_v19 = vmov 40   ;;  %v2854_v9 = vmov 58  }
 0x14c   :  { %v3697_v5 = vadd.f32 %v1005_v62, %v993_v27  ;;  %v3699_v17 = vadd.f32 %v1006_v7, %v994_v8  ;;  %v3701_v3 = vadd.f32 %v1007_v18, %v995_v14  ;;  %v3703_v20 = vadd.f32 %v1008_v63, %v996_v43  ;;  %2596 = vset.pattern.permute.xlu2 %v2839_v59  ;;  %v1038_v14 = vld [vmem:[#allocation7] sm:$0xff] }
 0x14d   :  { %v2841_v7 = vmov 39   ;;  %v2842_v63 = vmov 42  }
 0x14e   :  { %v1013_v30 = vadd.f32 %v3699_v17, %v3697_v5  ;;  %v1026_v26 = vmul.f32 %v3697_v5, %v3697_v5  ;;  %v1027_v21 = vmul.f32 %v3699_v17, %v3699_v17  ;;  %v1028_v10 = vmul.f32 %v3701_v3, %v3701_v3 }
 0x14f   :  { %v1029_v32 = vmul.f32 %v3703_v20, %v3703_v20  ;;  %v2674_v41 = vpop.eup %2673 }
 0x150   :  { %v1014_v50 = vadd.f32 %v1013_v30, %v3701_v3  ;;  %v1030_v61 = vadd.f32 %v1027_v21, %v1026_v26  ;;  %v1019_v57 = vmul.f32 512.0, %v2674_v41  ;;  %vm1023_vm5 = vweird.f32 %v2674_v41 }
 0x151   :  { %v2843_v30 = vmov 41  }
 0x152   :  { %v1015_v4 = vadd.f32 %v1014_v50, %v3703_v20  ;;  %v1031_v44 = vadd.f32 %v1030_v61, %v1028_v10  ;;  %v1020_v25 = vsub.f32 1.0, %v1019_v57  ;;  %v2844_v50 = vmov 46  }
 0x153   :  { %2603 = vset.pattern.permute.xlu0 %v5061_v46  ;;  %v2845_v61 = vmov 48   ;;  %v2852_v57 = vmov 56   ;;  %v2856_v46 = vmov 55  }
 0x154   :  { %1016 = vadd.xlane.f32.xlu1 %v1015_v4  ;;  %v1032_v47 = vadd.f32 %v1031_v44, %v1029_v32  ;;  %v1021_v58 = vmul.f32 %v2674_v41, %v1020_v25  ;;  %v2846_v4 = vmov 51   ;;  %v2847_v32 = vmov 43  }
 0x155   :  { %v2848_v44 = vmov 45   ;;  %v5062_v25 = vmov 1  }
 0x156   :  { %1033 = vadd.xlane.f32.xlu2 %v1032_v47  ;;  %v1022_v55 = vadd.f32 %v2674_v41, %v1021_v58  ;;  %v2849_v47 = vmov 53   ;;  %v2853_v58 = vmov 50  }
 0x158   :  { %v3720_v2 = vsel %vm1023_vm5, %v2674_v41, %v1022_v55  ;;  %v2851_v41 = vmov 47   ;;  %v2855_v55 = vmov 52   ;;  %vm5136_vm5 = vcmp.lt.s32.totalorder %v3071_v39, 15 }
 0x159   :  { %5060 = vst [vmem:[#allocation32_spill] sm:$0xff] %v3720_v2 }
 0x16d   :  { %1112 = vperm.xlu1 %2597, %v3717_v51  }
 0x16e   :  { %1096 = vperm.xlu2 %2596, %v3717_v51  }
 0x175   :  { %2600 = vset.pattern.permute.xlu1 %v2840_v19 }
 0x176   :  { %1160 = vperm.xlu1 %2600, %v3717_v51   ;;  %2599 = vset.pattern.permute.xlu2 %v2841_v7 }
 0x177   :  { %1144 = vperm.xlu2 %2599, %v3717_v51  }
 0x17e   :  { %2602 = vset.pattern.permute.xlu1 %v2842_v63 }
 0x17f   :  { %1192 = vperm.xlu1 %2602, %v3717_v51   ;;  %2601 = vset.pattern.permute.xlu2 %v2843_v30  ;;  %v2860_v30 = vmov 61  }
 0x180   :  { %1176 = vperm.xlu2 %2601, %v3717_v51  }
 0x187   :  { %2607 = vset.pattern.permute.xlu1 %v2844_v50 }
 0x188   :  { %1272 = vperm.xlu1 %2607, %v3717_v51   ;;  %2606 = vset.pattern.permute.xlu2 %v2848_v44 }
 0x189   :  { %1256 = vperm.xlu2 %2606, %v3717_v51  }
 0x190   :  { %2609 = vset.pattern.permute.xlu1 %v2845_v61  ;;  %v2862_v61 = vmov 59  }
 0x191   :  { %1304 = vperm.xlu1 %2609, %v3717_v51   ;;  %2608 = vset.pattern.permute.xlu2 %v2851_v41 }
 0x192   :  { %1288 = vperm.xlu2 %2608, %v3717_v51  }
 0x199   :  { %2613 = vset.pattern.permute.xlu1 %v2846_v4 }
 0x19a   :  { %1352 = vperm.xlu1 %2613, %v3717_v51   ;;  %2612 = vset.pattern.permute.xlu2 %v2853_v58 }
 0x19b   :  { %1336 = vperm.xlu2 %2612, %v3717_v51  }
 0x1a2   :  { %2615 = vset.pattern.permute.xlu1 %v2849_v47 }
 0x1a3   :  { %1384 = vperm.xlu1 %2615, %v3717_v51   ;;  %2614 = vset.pattern.permute.xlu2 %v2855_v55 }
 0x1a4   :  { %1368 = vperm.xlu2 %2614, %v3717_v51  }
 0x1ab   :  { %2618 = vset.pattern.permute.xlu1 %v2852_v57 }
 0x1ac   :  { %1432 = vperm.xlu1 %2618, %v3717_v51   ;;  %2617 = vset.pattern.permute.xlu2 %v2856_v46 }
 0x1ad   :  { %1416 = vperm.xlu2 %2617, %v3717_v51  }
 0x1b4   :  { %2620 = vset.pattern.permute.xlu1 %v2854_v9 }
 0x1b5   :  { %1464 = vperm.xlu1 %2620, %v3717_v51  }
 0x1c7   :  { %v1017_v40 = vpop.xlane.xlu1 %1016 }
 0x1c8   :  { %v1025_v60 = vmul.f32 %v3720_v2, %v1017_v40  ;;  %v3744_v40 = vpop.permute.xlu0 %1128 }
 0x1c9   :  { %v1034_v42 = vpop.xlane.xlu2 %1033 }
 0x1ca   :  { %v1036_v53 = vmul.f32 %v1025_v60, %v1025_v60  ;;  %v1035_v28 = vmul.f32 %v1034_v42, %v3720_v2  ;;  %v2857_v42 = vmov 57  }
 0x1cb   :  { %2619 = vset.pattern.permute.xlu2 %v2857_v42 }
 0x1cc   :  { %v1037_v49 = vsub.f32 %v1035_v28, %v1036_v53  ;;  %1448 = vperm.xlu2 %2619, %v3717_v51  }
 0x1ce   :  { %v1039_v48 = vadd.f32 1e-05, %v1037_v49  ;;  %v2858_v49 = vmov 49  }
 0x1d0   :  { %2675 = vrsqrt.f32 %v1039_v48  ;;  %vm1046_vm7 = vweird.f32 %v1039_v48 }
 0x1d4   :  { %2623 = vset.pattern.permute.xlu2 %v2860_v30 }
 0x1d6   :  { %v2676_v6 = vpop.eup %2675 }
 0x1d7   :  { %v1041_v62 = vmul.f32 %v2676_v6, %v1039_v48  ;;  %vm1047_vm6 = vweird.f32 %v2676_v6  ;;  %v3751_v48 = vpop.permute.xlu2 %1096 }
 0x1d8   :  { %vm1048_vm8 = vmor %vm1046_vm7, %vm1047_vm6  ;;  %vm5137_vm6 = vcmp.lt.s32.totalorder %v3082_v45, 15 }
 0x1d9   :  { %v1042_v18 = vmul.f32 %v2676_v6, %v1041_v62 }
 0x1db   :  { %v1043_v27 = vmul.f32 0.5, %v1042_v18 }
 0x1dd   :  { %v1044_v8 = vsub.f32 1.5, %v1043_v27 }
 0x1df   :  { %v1045_v43 = vmul.f32 %v2676_v6, %v1044_v8  ;;  %v3753_v59 = vpop.permute.xlu1 %1112 }
 0x1e1   :  { %v1049_v26 = vsel %vm1048_vm8, %v2676_v6, %v1045_v43  ;;  %v3755_v6 = vpop.permute.xlu2 %1144 }
 0x1e2   :  { %v1050_v21 = vmul.f32 %v1049_v26, %v1038_v14  ;;  %v2861_v26 = vmov 60  }
 0x1e3   :  { %2622 = vset.pattern.permute.xlu1 %v2861_v26 }
 0x1e4   :  { %1059 = vperm.xlu0 %2603, %v1050_v21   ;;  %v1051_v10 = vmul.f32 %v1050_v21, %v1025_v60 }
 0x1e8   :  { %v3757_v19 = vpop.permute.xlu1 %1160 }
 0x1e9   :  { %v3759_v62 = vpop.permute.xlu2 %1176 }
 0x1ec   :  { %1053 = vrot.lane.b32.xlu0 %v1051_v10, %s2806_s27 }
 0x1ed   :  { %2604 = vset.pattern.permute.xlu0 %v2847_v32 }
 0x1f1   :  { %v3761_v7 = vpop.permute.xlu1 %1192  ;;  %v3763_v18 = vpop.permute.xlu2 %1256 }
 0x1f4   :  { %1208 = vperm.xlu0 %2604, %v3717_v51  }
 0x1f9   :  { %v3767_v8 = vpop.permute.xlu2 %1288 }
 0x1fa   :  { %v3765_v27 = vpop.permute.xlu1 %1272 }
 0x1fc   :  { %2605 = vset.pattern.permute.xlu0 %v2850_v38 }
 0x1fd   :  { %1240 = vperm.xlu0 %2605, %v3717_v51  }
 0x201   :  { %v3771_v43 = vpop.permute.xlu2 %1336 }
 0x205   :  { %2610 = vset.pattern.permute.xlu0 %v5062_v25 }
 0x209   :  { %v3777_v50 = vpop.permute.xlu2 %1368 }
 0x211   :  { %v3783_v32 = vpop.permute.xlu2 %1416 }
 0x256   :  { %v1060_v60 = vpop.permute.xlu0 %1059 }
 0x257   :  { %v1062_v47 = vmul.f32 %v1060_v60, %v3697_v5  ;;  %v1063_v38 = vmul.f32 %v1060_v60, %v3699_v17  ;;  %v1064_v41 = vmul.f32 %v1060_v60, %v3701_v3  ;;  %v1065_v57 = vmul.f32 %v1060_v60, %v3703_v20  ;;  %v3799_v5 = vpop.permute.xlu2 %1448 }
 0x25e   :  { %v1054_v53 = vpop.permute.xlu0 %1053 }
 0x25f   :  { %v1056_v28 = vsub.f32 %v1038_v14, %v1054_v53  ;;  %v3769_v14 = vpop.permute.xlu1 %1304 }
 0x261   :  { %1068 = vperm.xlu0 %2610, %v1056_v28  }
 0x266   :  { %v3775_v21 = vpop.permute.xlu0 %1208 }
 0x267   :  { %v3773_v63 = vpop.permute.xlu1 %1352 }
 0x269   :  { %2611 = vset.pattern.permute.xlu0 %v2858_v49 }
 0x26a   :  { %1320 = vperm.xlu0 %2611, %v3717_v51  }
 0x26f   :  { %v3779_v10 = vpop.permute.xlu1 %1384  ;;  %v3781_v4 = vpop.permute.xlu0 %1240 }
 0x272   :  { %2616 = vset.pattern.permute.xlu0 %v2859_v54 }
 0x273   :  { %1400 = vperm.xlu0 %2616, %v3717_v51  }
 0x277   :  { %v3785_v44 = vpop.permute.xlu1 %1432 }
 0x27b   :  { %2621 = vset.pattern.permute.xlu0 %v2862_v61 }
 0x27f   :  { %v3807_v20 = vpop.permute.xlu1 %1464 }
 0x2d3   :  { %v1069_v25 = vpop.permute.xlu0 %1068 }
 0x2d4   :  { %v1071_v58 = vadd.f32 %v1069_v25, %v1062_v47  ;;  %v1072_v9 = vadd.f32 %v1069_v25, %v1063_v38  ;;  %v1073_v55 = vadd.f32 %v1069_v25, %v1064_v41  ;;  %v1074_v46 = vadd.f32 %v1069_v25, %v1065_v57 }
 0x2d6   :  { %v3791_v42 = vmax.f32 %v1071_v58, 0.0  ;;  %v3793_v53 = vmax.f32 %v1072_v9, 0.0  ;;  %v3795_v28 = vmax.f32 %v1073_v55, 0.0  ;;  %v3797_v49 = vmax.f32 %v1074_v46, 0.0 }
 0x2d8   :  { %5063 = vst [vmem:[#allocation33_spill] sm:$0xff] %v3797_v49  ;;  %1083 = vrot.lane.b32.xlu0 %v3795_v28, %s2802_s26  ;;  %1081 = vrot.lane.b32.xlu1 %v3793_v53, %s2802_s26  ;;  %v1452_v17 = vperm.slane %v3793_v53, 5  ;;  %v1454_v3 = vperm.slane %v3797_v49, 5  ;;  %v1468_v60 = vperm.slane %v3793_v53, 6  ;;  %v1470_v54 = vperm.slane %v3797_v49, 6 }
 0x2d9   :  { %1079 = vrot.lane.b32.xlu2 %v3791_v42, %s2802_s26  ;;  %v1372_v38 = vperm.slane %v3793_v53, 0  ;;  %v1388_v41 = vperm.slane %v3793_v53, 1  ;;  %v1420_v57 = vperm.slane %v3793_v53, 3  ;;  %v1436_v58 = vperm.slane %v3793_v53, 4 }
 0x2da   :  { %v3814_v30 = vmul.f32 %v1452_v17, %v3799_v5  ;;  %v3817_v26 = vmul.f32 %v1454_v3, %v3799_v5  ;;  %v3820_v61 = vmul.f32 %v1468_v60, %v3807_v20  ;;  %v3823_v47 = vmul.f32 %v1470_v54, %v3807_v20 }
 0x2db   :  { %v3829_v25 = vmul.f32 %v1372_v38, %v3777_v50  ;;  %v3836_v9 = vmul.f32 %v1388_v41, %v3779_v10  ;;  %v3839_v55 = vmul.f32 %v1420_v57, %v3783_v32  ;;  %v3843_v46 = vmul.f32 %v1436_v58, %v3785_v44 }
 0x2dc   :  { %5064 = vst [vmem:[#allocation34_spill] sm:$0xff] %v3814_v30  ;;  %v1374_v17 = vperm.slane %v3797_v49, 0  ;;  %v1390_v3 = vperm.slane %v3797_v49, 1  ;;  %v1422_v60 = vperm.slane %v3797_v49, 3  ;;  %v1438_v54 = vperm.slane %v3797_v49, 4  ;;  %v3903_v56 = vpop.permute.xlu0 %1320 }
 0x2dd   :  { %5065 = vst [vmem:[#allocation35_spill] sm:$0xff] %v3817_v26  ;;  %v1467_v37 = vperm.slane %v3791_v42, 6  ;;  %v1371_v52 = vperm.slane %v3791_v42, 0  ;;  %v1387_v31 = vperm.slane %v3791_v42, 1  ;;  %v1435_v33 = vperm.slane %v3791_v42, 4 }
 0x2de   :  { %5066 = vst [vmem:[#allocation36_spill] sm:$0xff] %v3820_v61  ;;  %v3850_v38 = vmul.f32 %v1374_v17, %v3777_v50  ;;  %v3853_v41 = vmul.f32 %v1390_v3, %v3779_v10  ;;  %v3856_v57 = vmul.f32 %v1422_v60, %v3783_v32  ;;  %v3859_v58 = vmul.f32 %v1438_v54, %v3785_v44 }
 0x2df   :  { %5067 = vst [vmem:[#allocation37_spill] sm:$0xff] %v3823_v47  ;;  %v2864_v17 = vmov 64   ;;  %v2865_v3 = vmov 63   ;;  %v2867_v60 = vmov 65   ;;  %v2868_v54 = vmov 66  }
 0x2e0   :  { %1085 = vrot.lane.b32.xlu0 %v3797_v49, %s2802_s26  ;;  %1512 = vperm.xlu1 %2622, %v3717_v51   ;;  %5068 = vst [vmem:[#allocation38_spill] sm:$0xff] %v3839_v55  ;;  %v3923_v0 = vmul.f32 %v1467_v37, %v3807_v20  ;;  %v1373_v11 = vperm.slane %v3795_v28, 0  ;;  %v1389_v22 = vperm.slane %v3795_v28, 1  ;;  %v1421_v16 = vperm.slane %v3795_v28, 3 }
 0x2e1   :  { %1528 = vperm.xlu2 %2623, %v3717_v51   ;;  %5069 = vst [vmem:[#allocation39_spill] sm:$0xff] %v3843_v46  ;;  %v1404_v13 = vperm.slane %v3793_v53, 2  ;;  %v1406_v37 = vperm.slane %v3797_v49, 2  ;;  %v1437_v2 = vperm.slane %v3795_v28, 4 }
 0x2e2   :  { %5070 = vst [vmem:[#allocation40_spill] sm:$0xff] %v3850_v38 }
 0x2e3   :  { %5071 = vst [vmem:[#allocation41_spill] sm:$0xff] %v3853_v41 }
 0x2e4   :  { %5072 = vst [vmem:[#allocation42_spill] sm:$0xff] %v3856_v57  ;;  %v3956_v57 = vmul.f32 %v1373_v11, %v3777_v50 }
 0x2e5   :  { %5073 = vst [vmem:[#allocation43_spill] sm:$0xff] %v3859_v58  ;;  %v1401_v34 = vpop.permute.xlu0 %1400 }
 0x2e6   :  { %5078 = vst [vmem:[#allocation47_spill] sm:$0xff] %v3923_v0 }
 0x2e7   :  { %5084 = vst [vmem:[#allocation53_spill] sm:$0xff] %v3956_v57 }
 0x2e8   :  { %1480 = vperm.xlu0 %2621, %v3717_v51   ;;  %1225 = vrot.lane.b32.xlu1 %v3793_v53, %s2806_s27 }
 0x2e9   :  { %1223 = vrot.lane.b32.xlu2 %v3791_v42, %s2806_s27  ;;  %2624 = vset.pattern.permute.xlu1 %v2863_v23  ;;  %v2866_v23 = vmov 70  }
 0x2ea   :  { %2626 = vset.pattern.permute.xlu2 %v2864_v17  ;;  %v2869_v17 = vmov 67  }
 0x2f0   :  { %2625 = vset.pattern.permute.xlu0 %v2865_v3  ;;  %1227 = vrot.lane.b32.xlu1 %v3795_v28, %s2806_s27  ;;  %v2870_v3 = vmov 68  }
 0x2f1   :  { %1229 = vrot.lane.b32.xlu2 %v3797_v49, %s2806_s27  ;;  %1560 = vperm.xlu0 %2625, %v3717_v51  }
 0x2f8   :  { %1544 = vperm.xlu1 %2624, %v3717_v51  }
 0x2f9   :  { %1576 = vperm.xlu2 %2626, %v3717_v51   ;;  %1495 = vrot.lane.b32.xlu0 %v3791_v42, %s2811_s28 }
 0x2fa   :  { %2632 = vset.pattern.permute.xlu0 %v2866_v23  ;;  %v2871_v23 = vmov 69  }
 0x300   :  { %2627 = vset.pattern.permute.xlu1 %v2867_v60  ;;  %v2872_v60 = vmov 75  }
 0x301   :  { %2628 = vset.pattern.permute.xlu2 %v2868_v54  ;;  %1592 = vperm.xlu1 %2627, %v3717_v51   ;;  %v2873_v54 = vmov 71  }
 0x302   :  { %1641 = vrot.lane.b32.xlu0 %v3793_v53, %s2815_s29  ;;  %1608 = vperm.xlu2 %2628, %v3717_v51  }
 0x309   :  { %2629 = vset.pattern.permute.xlu1 %v2869_v17  ;;  %v2874_v17 = vmov 72  }
 0x30a   :  { %1645 = vrot.lane.b32.xlu0 %v3797_v49, %s2815_s29  ;;  %1497 = vrot.lane.b32.xlu2 %v3793_v53, %s2811_s28 }
 0x30b   :  { %1624 = vperm.xlu1 %2629, %v3717_v51   ;;  %2630 = vset.pattern.permute.xlu2 %v2870_v3  ;;  %v5074_v3 = vmov 2  }
 0x312   :  { %1688 = vperm.xlu0 %2632, %v3717_v51   ;;  %1501 = vrot.lane.b32.xlu2 %v3797_v49, %s2811_s28 }
 0x313   :  { %1499 = vrot.lane.b32.xlu1 %v3795_v28, %s2811_s28 }
 0x314   :  { %2631 = vset.pattern.permute.xlu1 %v2871_v23  ;;  %v2875_v23 = vmov 73  }
 0x31a   :  { %2637 = vset.pattern.permute.xlu0 %v2872_v60  ;;  %1656 = vperm.xlu2 %2630, %v3717_v51   ;;  %v2876_v60 = vmov 74  }
 0x31b   :  { %1672 = vperm.xlu1 %2631, %v3717_v51   ;;  %1768 = vperm.xlu0 %2637, %v3717_v51  }
 0x322   :  { %1643 = vrot.lane.b32.xlu2 %v3795_v28, %s2815_s29 }
 0x323   :  { %1639 = vrot.lane.b32.xlu1 %v3791_v42, %s2815_s29  ;;  %2633 = vset.pattern.permute.xlu2 %v2873_v54 }
 0x324   :  { %2634 = vset.pattern.permute.xlu1 %v2874_v17  ;;  %2638 = vset.pattern.permute.xlu0 %v5074_v3  ;;  %v1451_v17 = vperm.slane %v3791_v42, 5  ;;  %v1453_v3 = vperm.slane %v3795_v28, 5 }
 0x326   :  { %v3917_v24 = vmul.f32 %v1451_v17, %v3799_v5  ;;  %v3920_v12 = vmul.f32 %v1453_v3, %v3799_v5  ;;  %v1403_v17 = vperm.slane %v3791_v42, 2  ;;  %v1405_v5 = vperm.slane %v3795_v28, 2 }
 0x327   :  { %v3937_v3 = vmul.f32 %v1371_v52, %v3777_v50 }
 0x328   :  { %5076 = vst [vmem:[#allocation45_spill] sm:$0xff] %v3917_v24  ;;  %v3964_v0 = vmul.f32 %v1403_v17, %v1401_v34  ;;  %v3976_v50 = vmul.f32 %v1405_v5, %v1401_v34 }
 0x329   :  { %5077 = vst [vmem:[#allocation46_spill] sm:$0xff] %v3920_v12  ;;  %v3966_v12 = vmul.f32 %v1404_v13, %v1401_v34  ;;  %v3983_v13 = vmul.f32 %v1437_v2, %v3785_v44 }
 0x32a   :  { %1704 = vperm.xlu2 %2633, %v3717_v51   ;;  %5080 = vst [vmem:[#allocation49_spill] sm:$0xff] %v3937_v3 }
 0x32b   :  { %1720 = vperm.xlu1 %2634, %v3717_v51   ;;  %5087 = vst [vmem:[#allocation56_spill] sm:$0xff] %v3964_v0 }
 0x32c   :  { %5088 = vst [vmem:[#allocation57_spill] sm:$0xff] %v3966_v12 }
 0x32d   :  { %5089 = vst [vmem:[#allocation58_spill] sm:$0xff] %v3976_v50 }
 0x32e   :  { %5091 = vst [vmem:[#allocation60_spill] sm:$0xff] %v3983_v13 }
 0x332   :  { %2635 = vset.pattern.permute.xlu2 %v2875_v23  ;;  %v1469_v23 = vperm.slane %v3795_v28, 6 }
 0x333   :  { %2636 = vset.pattern.permute.xlu1 %v2876_v60  ;;  %1736 = vperm.xlu2 %2635, %v3717_v51   ;;  %v3900_v1 = vpop.permute.xlu2 %1079 }
 0x334   :  { %1752 = vperm.xlu1 %2636, %v3717_v51   ;;  %v1419_v51 = vperm.slane %v3791_v42, 3  ;;  %v3927_v15 = vmul.f32 %v1469_v23, %v3807_v20  ;;  %v3940_v20 = vmul.f32 %v1387_v31, %v3779_v10 }
 0x336   :  { %5079 = vst [vmem:[#allocation48_spill] sm:$0xff] %v3927_v15  ;;  %v3943_v23 = vmul.f32 %v1419_v51, %v3783_v32  ;;  %v3947_v15 = vmul.f32 %v1435_v33, %v3785_v44  ;;  %v3959_v51 = vmul.f32 %v1389_v22, %v3779_v10  ;;  %v3962_v33 = vmul.f32 %v1421_v16, %v3783_v32 }
 0x337   :  { %5081 = vst [vmem:[#allocation50_spill] sm:$0xff] %v3940_v20  ;;  %v3978_v22 = vmul.f32 %v1406_v37, %v1401_v34 }
 0x338   :  { %5082 = vst [vmem:[#allocation51_spill] sm:$0xff] %v3943_v23 }
 0x339   :  { %5083 = vst [vmem:[#allocation52_spill] sm:$0xff] %v3947_v15 }
 0x33a   :  { %5085 = vst [vmem:[#allocation54_spill] sm:$0xff] %v3959_v51 }
 0x33b   :  { %v3905_v54 = vpop.permute.xlu2 %1528  ;;  %5086 = vst [vmem:[#allocation55_spill] sm:$0xff] %v3962_v33 }
 0x33c   :  { %5075 = vst [vmem:[#allocation44_spill] sm:$0xff] %v3905_v54 }
 0x33d   :  { %5090 = vst [vmem:[#allocation59_spill] sm:$0xff] %v3978_v22 }
 0x343   :  { %v3911_v60 = vpop.permute.xlu2 %1223 }
 0x34a   :  { %v1082_v58 = vpop.permute.xlu1 %1081  ;;  %v3952_v52 = vpop.permute.xlu0 %1083 }
 0x34b   :  { %v1089_v26 = vsel %vm324_vm11, %v3900_v1, %v1082_v58  ;;  %v3971_v47 = vpop.permute.xlu2 %1229  ;;  %v1088_v11 = vsel %vm324_vm11, %v1082_v58, %v3952_v52 }
 0x34c   :  { %v1092_v16 = vsel %vm74_vm13, %v1089_v26, 0.0  ;;  %v1234_v58 = vsel %vm426_vm15, %v3971_v47, %v3911_v60  ;;  %v3991_v34 = vsel %vm75_vm14, %v1088_v11, 0.0  ;;  %vm5127_vm13 = vcmp.lt.s32.totalorder %v3071_v39, 14 }
 0x34d   :  { %v1100_v10 = vperm.slane %v1092_v16, 0  ;;  %v1116_v32 = vperm.slane %v1092_v16, 1  ;;  %v1132_v17 = vperm.slane %v1092_v16, 2  ;;  %v1148_v31 = vperm.slane %v1092_v16, 3 }
 0x34e   :  { %v1164_v33 = vperm.slane %v1092_v16, 4  ;;  %v1180_v24 = vperm.slane %v1092_v16, 5  ;;  %v1196_v44 = vperm.slane %v1092_v16, 6  ;;  %v1212_v5 = vperm.slane %v1092_v16, 7 }
 0x34f   :  { %v1104_v26 = vmul.f32 %v1100_v10, %v3751_v48  ;;  %v1120_v2 = vmul.f32 %v1116_v32, %v3753_v59  ;;  %v1136_v37 = vmul.f32 %v1132_v17, %v3744_v40  ;;  %v1152_v13 = vmul.f32 %v1148_v31, %v3755_v6 }
 0x350   :  { %v1168_v50 = vmul.f32 %v1164_v33, %v3757_v19  ;;  %v1184_v22 = vmul.f32 %v1180_v24, %v3759_v62  ;;  %v1235_v41 = vsel %vm77_vm0, %v1234_v58, 0.0  ;;  %v1101_v11 = vperm.slane %v3991_v34, 0 }
 0x351   :  { %v1124_v51 = vadd.f32 %v1120_v2, %v1104_v26  ;;  %v1117_v10 = vperm.slane %v3991_v34, 1  ;;  %v1243_v61 = vperm.slane %v1235_v41, 0  ;;  %v1259_v32 = vperm.slane %v1235_v41, 1 }
 0x352   :  { %v1275_v15 = vperm.slane %v1235_v41, 2  ;;  %v1291_v16 = vperm.slane %v1235_v41, 3  ;;  %v4003_v54 = vpop.permute.xlu1 %1512  ;;  %v1086_v17 = vpop.permute.xlu0 %1085  ;;  %v1200_v33 = vmul.f32 %v1196_v44, %v3761_v7  ;;  %v4007_v24 = vmul.f32 %v1212_v5, %v3775_v21 }
 0x353   :  { %5092 = vst [vmem:[#allocation61_spill] sm:$0xff] %v4003_v54  ;;  %v1140_v31 = vadd.f32 %v1136_v37, %v1124_v51  ;;  %v1307_v26 = vperm.slane %v1235_v41, 4  ;;  %v4009_v2 = vpop.permute.xlu2 %1576  ;;  %v4012_v58 = vmul.f32 %v1243_v61, %v3781_v4  ;;  %v4015_v57 = vmul.f32 %v1259_v32, %v3763_v18 }
 0x354   :  { %5093 = vst [vmem:[#allocation62_spill] sm:$0xff] %v4009_v2  ;;  %v1323_v38 = vperm.slane %v1235_v41, 5  ;;  %v1339_v30 = vperm.slane %v1235_v41, 6  ;;  %v4018_v54 = vmul.f32 %v1275_v15, %v3765_v27  ;;  %v4021_v51 = vmul.f32 %v1291_v16, %v3767_v8 }
 0x355   :  { %v1156_v23 = vadd.f32 %v1152_v13, %v1140_v31  ;;  %v4024_v44 = vmul.f32 %v1307_v26, %v3769_v14  ;;  %v1355_v5 = vperm.slane %v1235_v41, 7  ;;  %v1105_v37 = vmul.f32 %v1101_v11, %v3751_v48 }
 0x356   :  { %v1121_v61 = vmul.f32 %v1117_v10, %v3753_v59  ;;  %v1133_v32 = vperm.slane %v3991_v34, 2  ;;  %v1149_v46 = vperm.slane %v3991_v34, 3  ;;  %v1165_v13 = vperm.slane %v3991_v34, 4 }
 0x357   :  { %v1172_v2 = vadd.f32 %v1168_v50, %v1156_v23  ;;  %v1181_v15 = vperm.slane %v3991_v34, 5  ;;  %v4033_v16 = vmul.f32 %v1323_v38, %v3903_v56  ;;  %v1197_v41 = vperm.slane %v3991_v34, 6 }
 0x358   :  { %v1125_v31 = vadd.f32 %v1121_v61, %v1105_v37  ;;  %v1137_v26 = vmul.f32 %v1133_v32, %v3744_v40  ;;  %v4038_v10 = vmul.f32 %v1339_v30, %v3771_v43  ;;  %v4041_v23 = vmul.f32 %v1355_v5, %v3773_v63 }
 0x359   :  { %v1188_v11 = vadd.f32 %v1184_v22, %v1172_v2  ;;  %v1153_v50 = vmul.f32 %v1149_v46, %v3755_v6  ;;  %v1169_v49 = vmul.f32 %v1165_v13, %v3757_v19  ;;  %v1185_v38 = vmul.f32 %v1181_v15, %v3759_v62 }
 0x35a   :  { %v1141_v0 = vadd.f32 %v1137_v26, %v1125_v31  ;;  %v1087_v37 = vsel %vm324_vm11, %v3952_v52, %v1086_v17  ;;  %v4049_v61 = vpop.permute.xlu1 %1225  ;;  %v4051_v22 = vpop.permute.xlu0 %1480  ;;  %v1201_v30 = vmul.f32 %v1197_v41, %v3761_v7  ;;  %v1213_v2 = vperm.slane %v3991_v34, 7 }
 0x35b   :  { %v1090_v46 = vsel %vm324_vm11, %v1086_v17, %v3900_v1  ;;  %v4060_v5 = vsel %vm76_vm12, %v1087_v37, 0.0  ;;  %v1204_v32 = vadd.f32 %v1200_v33, %v1188_v11  ;;  %v1233_v1 = vsel %vm426_vm15, %v3911_v60, %v4049_v61 }
 0x35c   :  { %v1157_v13 = vadd.f32 %v1153_v50, %v1141_v0  ;;  %v1091_v52 = vsel %vm73_vm10, %v1090_v46, 0.0  ;;  %v1102_v15 = vperm.slane %v4060_v5, 0  ;;  %v4065_v31 = vpop.permute.xlu2 %1608  ;;  %v1118_v34 = vperm.slane %v4060_v5, 1 }
 0x35d   :  { %5094 = vst [vmem:[#allocation63_spill] sm:$0xff] %v4065_v31  ;;  %v1099_v26 = vperm.slane %v1091_v52, 0  ;;  %v1115_v41 = vperm.slane %v1091_v52, 1  ;;  %v1131_v0 = vperm.slane %v1091_v52, 2  ;;  %v1134_v11 = vperm.slane %v4060_v5, 2 }
 0x35e   :  { %v1173_v17 = vadd.f32 %v1169_v49, %v1157_v13  ;;  %v1106_v33 = vmul.f32 %v1102_v15, %v3751_v48  ;;  %v1122_v46 = vmul.f32 %v1118_v34, %v3753_v59  ;;  %v1147_v31 = vperm.slane %v1091_v52, 3 }
 0x35f   :  { %v1103_v50 = vmul.f32 %v1099_v26, %v3751_v48  ;;  %v1119_v37 = vmul.f32 %v1115_v41, %v3753_v59  ;;  %v1217_v20 = vmul.f32 %v1213_v2, %v3775_v21  ;;  %v1135_v12 = vmul.f32 %v1131_v0, %v3744_v40 }
 0x360   :  { %v1189_v55 = vadd.f32 %v1185_v38, %v1173_v17  ;;  %v1150_v60 = vperm.slane %v4060_v5, 3  ;;  %v1126_v13 = vadd.f32 %v1122_v46, %v1106_v33  ;;  %v1138_v15 = vmul.f32 %v1134_v11, %v3744_v40 }
 0x361   :  { %v1123_v49 = vadd.f32 %v1119_v37, %v1103_v50  ;;  %v1163_v3 = vperm.slane %v1091_v52, 4  ;;  %v1151_v48 = vmul.f32 %v1147_v31, %v3755_v6  ;;  %v1166_v26 = vperm.slane %v4060_v5, 4 }
 0x362   :  { %v1205_v35 = vadd.f32 %v1201_v30, %v1189_v55  ;;  %v1179_v41 = vperm.slane %v1091_v52, 5  ;;  %v1142_v34 = vadd.f32 %v1138_v15, %v1126_v13  ;;  %v1154_v38 = vmul.f32 %v1150_v60, %v3755_v6  ;;  %v1228_v30 = vpop.permute.xlu1 %1227 }
 0x363   :  { %v1139_v59 = vadd.f32 %v1135_v12, %v1123_v49  ;;  %v1182_v2 = vperm.slane %v4060_v5, 5  ;;  %v4085_v17 = vpop.permute.xlu0 %1560  ;;  %v1220_v0 = vadd.f32 %v4007_v24, %v1204_v32  ;;  %v1167_v40 = vmul.f32 %v1163_v3, %v3757_v19 }
 0x364   :  { %v4088_v33 = vadd.f32 %v1217_v20, %v1205_v35  ;;  %v1195_v55 = vperm.slane %v1091_v52, 6  ;;  %v1158_v11 = vadd.f32 %v1154_v38, %v1142_v34  ;;  %v1170_v50 = vmul.f32 %v1166_v26, %v3757_v19  ;;  %v4093_v37 = vpop.permute.xlu2 %1497 }
 0x365   :  { %v1155_v31 = vadd.f32 %v1151_v48, %v1139_v59  ;;  %v1198_v12 = vperm.slane %v4060_v5, 6  ;;  %v1183_v6 = vmul.f32 %v1179_v41, %v3759_v62  ;;  %v1211_v46 = vperm.slane %v1091_v52, 7 }
 0x366   :  { %v1214_v60 = vperm.slane %v4060_v5, 7  ;;  %v1236_v35 = vsel %vm78_vm1, %v1233_v1, 0.0  ;;  %v1174_v3 = vadd.f32 %v1170_v50, %v1158_v11  ;;  %v1186_v24 = vmul.f32 %v1182_v2, %v3759_v62 }
 0x367   :  { %v1171_v20 = vadd.f32 %v1167_v40, %v1155_v31  ;;  %v1244_v32 = vperm.slane %v1236_v35, 0  ;;  %v1199_v49 = vmul.f32 %v1195_v55, %v3761_v7  ;;  %v1202_v19 = vmul.f32 %v1198_v12, %v3761_v7 }
 0x368   :  { %v1260_v13 = vperm.slane %v1236_v35, 1  ;;  %v1276_v15 = vperm.slane %v1236_v35, 2  ;;  %v1190_v26 = vadd.f32 %v1186_v24, %v1174_v3  ;;  %v1292_v41 = vperm.slane %v1236_v35, 3 }
 0x369   :  { %v1187_v48 = vadd.f32 %v1183_v6, %v1171_v20  ;;  %v1248_v52 = vmul.f32 %v1244_v32, %v3781_v4  ;;  %v1215_v5 = vmul.f32 %v1211_v46, %v3775_v21  ;;  %v1218_v1 = vmul.f32 %v1214_v60, %v3775_v21 }
 0x36a   :  { %v1308_v59 = vperm.slane %v1236_v35, 4  ;;  %v1324_v34 = vperm.slane %v1236_v35, 5  ;;  %v1206_v62 = vadd.f32 %v1202_v19, %v1190_v26  ;;  %v1264_v40 = vmul.f32 %v1260_v13, %v3763_v18  ;;  %v4117_v32 = vpop.permute.xlu1 %1544 }
 0x36b   :  { %v1203_v38 = vadd.f32 %v1199_v49, %v1187_v48  ;;  %v1252_v2 = vadd.f32 %v1248_v52, %v1220_v0  ;;  %v1280_v7 = vmul.f32 %v1276_v15, %v3765_v27  ;;  %v1296_v55 = vmul.f32 %v1292_v41, %v3767_v8  ;;  %v1496_v21 = vpop.permute.xlu0 %1495 }
 0x36c   :  { %v1340_v31 = vperm.slane %v1236_v35, 6  ;;  %v1356_v11 = vperm.slane %v1236_v35, 7  ;;  %v1312_v6 = vmul.f32 %v1308_v59, %v3769_v14  ;;  %v1328_v46 = vmul.f32 %v1324_v34, %v3903_v56  ;;  %v4128_v48 = vpop.permute.xlu2 %1501 }
 0x36d   :  { %v1219_v50 = vadd.f32 %v1215_v5, %v1203_v38  ;;  %v1268_v12 = vadd.f32 %v1264_v40, %v1252_v2  ;;  %v1222_v60 = vadd.f32 %v1218_v1, %v1206_v62  ;;  %v5095_v3 = vperm.slane %v3791_v42, 7 }
 0x36e   :  { %v1344_v20 = vmul.f32 %v1340_v31, %v3771_v43  ;;  %v1360_v0 = vmul.f32 %v1356_v11, %v3773_v63  ;;  %v5096_v19 = vperm.slane %v3793_v53, 7  ;;  %v1231_v15 = vsel %vm426_vm15, %v1228_v30, %v3971_v47 }
 0x36f   :  { %v4115_v24 = vmul.f32 %v5095_v3, %v4051_v22  ;;  %v1251_v35 = vadd.f32 %v4012_v58, %v1219_v50  ;;  %v1284_v49 = vadd.f32 %v1280_v7, %v1268_v12  ;;  %v5097_v42 = vperm.slane %v3795_v28, 7 }
 0x370   :  { %v4123_v13 = vmul.f32 %v5096_v19, %v4051_v22  ;;  %v1232_v58 = vsel %vm426_vm15, %v4049_v61, %v1228_v30  ;;  %v4140_v53 = vsel %vm80_vm2, %v1231_v15, 0.0  ;;  %v1505_v52 = vsel %vm624_vm4, %v1496_v21, %v4093_v37 }
 0x371   :  { %v4133_v26 = vmul.f32 %v5097_v42, %v4051_v22  ;;  %v1267_v47 = vadd.f32 %v4015_v57, %v1251_v35  ;;  %v1300_v41 = vadd.f32 %v1296_v55, %v1284_v49  ;;  %v4148_v28 = vsel %vm79_vm3, %v1232_v58, 0.0 }
 0x372   :  { %v1246_v5 = vperm.slane %v4140_v53, 0  ;;  %v1245_v1 = vperm.slane %v4148_v28, 0  ;;  %v1261_v61 = vperm.slane %v4148_v28, 1  ;;  %v1262_v30 = vperm.slane %v4140_v53, 1 }
 0x373   :  { %v1506_v59 = vsel %vm624_vm4, %v4128_v48, %v1496_v21  ;;  %v1283_v34 = vadd.f32 %v4018_v54, %v1267_v47  ;;  %v1316_v57 = vadd.f32 %v1312_v6, %v1300_v41  ;;  %v1278_v62 = vperm.slane %v4140_v53, 2 }
 0x374   :  { %v1250_v38 = vmul.f32 %v1246_v5, %v3781_v4  ;;  %v1249_v2 = vmul.f32 %v1245_v1, %v3781_v4  ;;  %v1265_v40 = vmul.f32 %v1261_v61, %v3763_v18  ;;  %v1266_v7 = vmul.f32 %v1262_v30, %v3763_v18 }
 0x375   :  { %v1277_v55 = vperm.slane %v4148_v28, 2  ;;  %v1299_v31 = vadd.f32 %v4021_v51, %v1283_v34  ;;  %v1332_v11 = vadd.f32 %v1328_v46, %v1316_v57  ;;  %v1282_v12 = vmul.f32 %v1278_v62, %v3765_v27 }
 0x376   :  { %v1254_v50 = vadd.f32 %v1250_v38, %v1222_v60  ;;  %v1253_v54 = vadd.f32 %v1249_v2, %v4088_v33  ;;  %v1293_v6 = vperm.slane %v4148_v28, 3  ;;  %v1294_v21 = vperm.slane %v4140_v53, 3  ;;  %v4175_v33 = vpop.permute.xlu1 %1592 }
 0x377   :  { %v1309_v4 = vperm.slane %v4148_v28, 4  ;;  %v1348_v3 = vadd.f32 %v1344_v20, %v1332_v11  ;;  %v1315_v35 = vadd.f32 %v4024_v44, %v1299_v31  ;;  %v1310_v49 = vperm.slane %v4140_v53, 4  ;;  %v5100_v31 = vld [vmem:[#allocation49_spill] sm:$0xff] }
 0x378   :  { %v1270_v18 = vadd.f32 %v1266_v7, %v1254_v50  ;;  %v1269_v19 = vadd.f32 %v1265_v40, %v1253_v54  ;;  %v1281_v51 = vmul.f32 %v1277_v55, %v3765_v27  ;;  %v1297_v46 = vmul.f32 %v1293_v6, %v3767_v8  ;;  %v5098_v7 = vld [vmem:[#allocation12_spill] sm:$0xff]  ;;  %v5101_v11 = vld [vmem:[#allocation57_spill] sm:$0xff] }
 0x379   :  { %v1298_v60 = vmul.f32 %v1294_v21, %v3767_v8  ;;  %v1364_v15 = vadd.f32 %v1360_v0, %v1348_v3  ;;  %v1331_v42 = vadd.f32 %v4033_v16, %v1315_v35  ;;  %v1313_v20 = vmul.f32 %v1309_v4, %v3769_v14  ;;  %v4185_v0 = vpop.permute.xlu2 %1656  ;;  %v5104_v4 = vld [vmem:[#allocation38_spill] sm:$0xff] }
 0x37a   :  { %v1286_v58 = vadd.f32 %v1282_v12, %v1270_v18  ;;  %v1285_v47 = vadd.f32 %v1281_v51, %v1269_v19  ;;  %v1314_v44 = vmul.f32 %v1310_v49, %v3769_v14  ;;  %v1325_v41 = vperm.slane %v4148_v28, 5  ;;  %v5105_v49 = vld [vmem:[#allocation33_spill] sm:$0xff] }
 0x37b   :  { %v1326_v5 = vperm.slane %v4140_v53, 5  ;;  %v1347_v27 = vadd.f32 %v4038_v10, %v1331_v42  ;;  %v1380_v1 = vadd.f32 %v3829_v25, %v1364_v15  ;;  %v1342_v61 = vperm.slane %v4140_v53, 6  ;;  %v5107_v15 = vld [vmem:[#allocation56_spill] sm:$0xff] }
 0x37c   :  { %v1302_v8 = vadd.f32 %v1298_v60, %v1286_v58  ;;  %v1301_v16 = vadd.f32 %v1297_v46, %v1285_v47  ;;  %v1329_v30 = vmul.f32 %v1325_v41, %v3903_v56  ;;  %v1341_v14 = vperm.slane %v4148_v28, 6  ;;  %v5108_v58 = vld [vmem:[#allocation39_spill] sm:$0xff] }
 0x37d   :  { %v1330_v34 = vmul.f32 %v1326_v5, %v3903_v56  ;;  %v1363_v57 = vadd.f32 %v4041_v23, %v1347_v27  ;;  %v1396_v38 = vadd.f32 %v3836_v9, %v1380_v1  ;;  %v1346_v10 = vmul.f32 %v1342_v61, %v3771_v43  ;;  %v4205_v23 = vpop.permute.xlu0 %1641  ;;  %v5109_v5 = vld [vmem:[#allocation61_spill] sm:$0xff]  ;;  %v5111_v61 = vld [vmem:[#allocation34_spill] sm:$0xff] }
 0x37e   :  { %v1318_v62 = vadd.f32 %v1314_v44, %v1302_v8  ;;  %v1317_v25 = vadd.f32 %v1313_v20, %v1301_v16  ;;  %v1357_v2 = vperm.slane %v4148_v28, 7  ;;  %v1358_v40 = vperm.slane %v4140_v53, 7  ;;  %v4220_v60 = vpop.permute.xlu1 %1624 }
 0x37f   :  { %vm5099_vm10 = vcmp.lt.s32.totalorder %v5098_v7, 15  ;;  %v1379_v56 = vadd.f32 %v5100_v31, %v1363_v57  ;;  %v1412_v50 = vadd.f32 %v5101_v11, %v1396_v38  ;;  %vm5102_vm11 = vcmp.lt.s32.totalorder %v3064_v36, 15  ;;  %v5113_v38 = vld [vmem:[#allocation53_spill] sm:$0xff]  ;;  %v5115_v31 = vld [vmem:[#allocation52_spill] sm:$0xff] }
 0x380   :  { %v4197_v55 = vsel %vm5099_vm10, %v1505_v52, 0.0  ;;  %v1334_v12 = vadd.f32 %v1330_v34, %v1318_v62  ;;  %v4203_v9 = vsel %vm5102_vm11, %v1506_v59, 0.0  ;;  %v1333_v54 = vadd.f32 %v1329_v30, %v1317_v25  ;;  %v5103_v52 = vld [vmem:[#allocation50_spill] sm:$0xff]  ;;  %v5112_v30 = vld [vmem:[#allocation40_spill] sm:$0xff] }
 0x381   :  { %v1345_v28 = vmul.f32 %v1341_v14, %v3771_v43  ;;  %v1362_v53 = vmul.f32 %v1358_v40, %v3773_v63  ;;  %v1515_v6 = vperm.slane %v4197_v55, 0  ;;  %v1395_v21 = vadd.f32 %v5103_v52, %v1379_v56  ;;  %v1644_v57 = vpop.permute.xlu2 %1643  ;;  %v5116_v11 = vld [vmem:[#allocation36_spill] sm:$0xff] }
 0x382   :  { %v1428_v3 = vadd.f32 %v5104_v4, %v1412_v50  ;;  %v1350_v35 = vadd.f32 %v1346_v10, %v1334_v12  ;;  %v1518_v18 = vperm.slane %v4203_v9, 0  ;;  %v5106_v59 = vperm.slane %v5105_v49, 7  ;;  %v5114_v10 = vld [vmem:[#allocation44_spill] sm:$0xff]  ;;  %v5117_v12 = vld [vmem:[#allocation41_spill] sm:$0xff]  ;;  %v5120_v49 = vld [vmem:[#allocation59_spill] sm:$0xff] }
 0x383   :  { %v1349_v51 = vadd.f32 %v1345_v28, %v1333_v54  ;;  %v1361_v46 = vmul.f32 %v1357_v2, %v3773_v63  ;;  %v1531_v43 = vperm.slane %v4197_v55, 1  ;;  %v1411_v42 = vadd.f32 %v5107_v15, %v1395_v21  ;;  %v5110_v63 = vld [vmem:[#allocation51_spill] sm:$0xff] }
 0x384   :  { %v4216_v19 = vmul.f32 %v5106_v59, %v4051_v22  ;;  %v1444_v20 = vadd.f32 %v5108_v58, %v1428_v3  ;;  %v1366_v47 = vadd.f32 %v1362_v53, %v1350_v35  ;;  %v1534_v44 = vperm.slane %v4203_v9, 1  ;;  %v5118_v53 = vld [vmem:[#allocation54_spill] sm:$0xff]  ;;  %v5119_v3 = vld [vmem:[#allocation45_spill] sm:$0xff] }
 0x385   :  { %v1365_v41 = vadd.f32 %v1361_v46, %v1349_v51  ;;  %v1519_v27 = vmul.f32 %v1515_v6, %v5109_v5  ;;  %v4227_v22 = vmul.f32 %v1518_v18, %v5109_v5  ;;  %v1547_v1 = vperm.slane %v4197_v55, 2  ;;  %v4256_v46 = vpop.permute.xlu0 %1645 }
 0x386   :  { %v1427_v8 = vadd.f32 %v5110_v63, %v1411_v42  ;;  %v1460_v16 = vadd.f32 %v5111_v61, %v1444_v20  ;;  %v1382_v34 = vadd.f32 %v5112_v30, %v1366_v47  ;;  %v1550_v14 = vperm.slane %v4203_v9, 2  ;;  %v5122_v20 = vld [vmem:[#allocation62_spill] sm:$0xff]  ;;  %v5126_v61 = vld [vmem:[#allocation55_spill] sm:$0xff] }
 0x387   :  { %v1381_v62 = vadd.f32 %v5113_v38, %v1365_v41  ;;  %v1535_v25 = vmul.f32 %v1531_v43, %v5114_v10  ;;  %v1563_v2 = vperm.slane %v4197_v55, 3  ;;  %v1566_v40 = vperm.slane %v4203_v9, 3  ;;  %v5121_v43 = vld [vmem:[#allocation58_spill] sm:$0xff]  ;;  %v1500_v38 = vpop.permute.xlu1 %1499 }
 0x388   :  { %v1443_v56 = vadd.f32 %v5115_v31, %v1427_v8  ;;  %v1476_v50 = vadd.f32 %v5116_v11, %v1460_v16  ;;  %v1398_v54 = vadd.f32 %v5117_v12, %v1382_v34  ;;  %v4242_v28 = vmul.f32 %v1534_v44, %v5114_v10  ;;  %v5123_v44 = vld [vmem:[#allocation47_spill] sm:$0xff] }
 0x389   :  { %v1397_v6 = vadd.f32 %v5118_v53, %v1381_v62  ;;  %v1551_v52 = vmul.f32 %v1547_v1, %v4117_v32  ;;  %v4247_v21 = vmul.f32 %v1550_v14, %v4117_v32  ;;  %v1579_v4 = vperm.slane %v4197_v55, 4  ;;  %v5124_v1 = vld [vmem:[#allocation42_spill] sm:$0xff]  ;;  %v5131_v53 = vld [vmem:[#allocation35_spill] sm:$0xff] }
 0x38a   :  { %v1459_v35 = vadd.f32 %v5119_v3, %v1443_v56  ;;  %v4252_v18 = vadd.f32 %v4123_v13, %v1476_v50  ;;  %v1414_v59 = vadd.f32 %v5120_v49, %v1398_v54  ;;  %v1582_v51 = vperm.slane %v4203_v9, 4  ;;  %v4297_v3 = vpop.permute.xlu2 %1704 }
 0x38b   :  { %v1413_v15 = vadd.f32 %v5121_v43, %v1397_v6  ;;  %v1567_v42 = vmul.f32 %v1563_v2, %v4085_v17  ;;  %v4261_v58 = vmul.f32 %v1566_v40, %v4085_v17  ;;  %v1583_v47 = vmul.f32 %v1579_v4, %v5122_v20  ;;  %v5128_v2 = vld [vmem:[#allocation43_spill] sm:$0xff] }
 0x38c   :  { %v1475_v41 = vadd.f32 %v5123_v44, %v1459_v35  ;;  %v1430_v13 = vadd.f32 %v5124_v1, %v1414_v59  ;;  %v1595_v63 = vperm.slane %v4197_v55, 5  ;;  %vm5125_vm12 = vcmp.lt.s32.totalorder %v3049_v29, 126  ;;  %v5132_v35 = vld [vmem:[#allocation63_spill] sm:$0xff] }
 0x38d   :  { %v1648_v8 = vsel %vm5125_vm12, %v4205_v23, %v1644_v57  ;;  %v1429_v16 = vadd.f32 %v5126_v61, %v1413_v15  ;;  %v4272_v30 = vmul.f32 %v1582_v51, %v5122_v20  ;;  %v1598_v34 = vperm.slane %v4203_v9, 5  ;;  %vm5129_vm14 = vmmov %vm5125_vm12 }
 0x38e   :  { %v4277_v14 = vsel %vm5127_vm13, %v1648_v8, 0.0  ;;  %v1491_v62 = vadd.f32 %v4115_v24, %v1475_v41  ;;  %v1446_v40 = vadd.f32 %v5128_v2, %v1430_v13  ;;  %v1647_v31 = vsel %vm5129_vm14, %v1644_v57, %v4256_v46  ;;  %v5134_v13 = vld [vmem:[#allocation60_spill] sm:$0xff]  ;;  %vm5139_vm7 = vmmov %vm5125_vm12 }
 0x38f   :  { %v1611_v56 = vperm.slane %v4197_v55, 6  ;;  %v1599_v11 = vmul.f32 %v1595_v63, %v4175_v33  ;;  %v4288_v50 = vsel %vm5130_vm9, %v1647_v31, 0.0  ;;  %v1614_v12 = vperm.slane %v4203_v9, 6  ;;  %v5135_v31 = vld [vmem:[#allocation46_spill] sm:$0xff]  ;;  %vm5140_vm8 = vmmov %vm5139_vm7 }
 0x390   :  { %v1627_v54 = vperm.slane %v4197_v55, 7  ;;  %v1462_v24 = vadd.f32 %v5131_v53, %v1446_v40  ;;  %v1523_v6 = vadd.f32 %v1519_v27, %v1491_v62  ;;  %v4294_v4 = vmul.f32 %v1598_v34, %v4175_v33  ;;  %v5133_v55 = vld [vmem:[#allocation37_spill] sm:$0xff]  ;;  %v4322_v62 = vpop.permute.xlu0 %1688 }
 0x391   :  { %v1630_v57 = vperm.slane %v4203_v9, 7  ;;  %v1615_v49 = vmul.f32 %v1611_v56, %v5132_v35  ;;  %v4301_v59 = vmul.f32 %v1614_v12, %v5132_v35  ;;  %v1708_v43 = vperm.slane %v4277_v14, 3 }
 0x392   :  { %v1631_v51 = vmul.f32 %v1627_v54, %v4220_v60  ;;  %v1478_v15 = vadd.f32 %v5133_v55, %v1462_v24  ;;  %v1539_v44 = vadd.f32 %v1535_v25, %v1523_v6  ;;  %v1709_v41 = vperm.slane %v4288_v50, 3 }
 0x393   :  { %v4307_v27 = vmul.f32 %v1630_v57, %v4220_v60  ;;  %v4311_v9 = vmul.f32 %v1708_v43, %v4297_v3  ;;  %v1692_v1 = vperm.slane %v4277_v14, 2  ;;  %v1445_v63 = vadd.f32 %v5134_v13, %v1429_v16  ;;  %v4346_v57 = vpop.permute.xlu1 %1672 }
 0x394   :  { %v1503_v8 = vsel %vm624_vm4, %v1500_v38, %v4128_v48  ;;  %v1494_v61 = vadd.f32 %v4216_v19, %v1478_v15  ;;  %v1555_v34 = vadd.f32 %v1551_v52, %v1539_v44  ;;  %v4320_v25 = vmul.f32 %v1709_v41, %v4297_v3 }
 0x395   :  { %v1504_v2 = vsel %vm624_vm4, %v4093_v37, %v1500_v38  ;;  %v1693_v40 = vperm.slane %v4288_v50, 2  ;;  %v1461_v16 = vadd.f32 %v5135_v31, %v1445_v63  ;;  %v4335_v48 = vsel %vm5137_vm6, %v1503_v8, 0.0  ;;  %v5138_v38 = vld [vmem:[#allocation48_spill] sm:$0xff] }
 0x396   :  { %v4331_v56 = vsel %vm5136_vm5, %v1504_v2, 0.0  ;;  %v1526_v19 = vadd.f32 %v4227_v22, %v1494_v61  ;;  %v1571_v52 = vadd.f32 %v1567_v42, %v1555_v34  ;;  %v1517_v54 = vperm.slane %v4335_v48, 0 }
 0x397   :  { %v1516_v12 = vperm.slane %v4331_v56, 0  ;;  %v4341_v37 = vmul.f32 %v1692_v1, %v4322_v62  ;;  %v1477_v53 = vadd.f32 %v5138_v38, %v1461_v16  ;;  %v1532_v24 = vperm.slane %v4331_v56, 1 }
 0x398   :  { %v1533_v6 = vperm.slane %v4335_v48, 1  ;;  %v1542_v43 = vadd.f32 %v4242_v28, %v1526_v19  ;;  %v1587_v55 = vadd.f32 %v1583_v47, %v1571_v52  ;;  %v1521_v42 = vmul.f32 %v1517_v54, %v5109_v5 }
 0x399   :  { %v1520_v22 = vmul.f32 %v1516_v12, %v5109_v5  ;;  %v4352_v15 = vmul.f32 %v1693_v40, %v4322_v62  ;;  %v1493_v44 = vadd.f32 %v4133_v26, %v1477_v53  ;;  %v1548_v41 = vperm.slane %v4331_v56, 2 }
 0x39a   :  { %v1549_v1 = vperm.slane %v4335_v48, 2  ;;  %v1558_v13 = vadd.f32 %v4247_v21, %v1542_v43  ;;  %v1603_v63 = vadd.f32 %v1599_v11, %v1587_v55  ;;  %v1536_v28 = vmul.f32 %v1532_v24, %v5114_v10 }
 0x39b   :  { %v1524_v8 = vadd.f32 %v1520_v22, %v4252_v18  ;;  %v1525_v47 = vadd.f32 %v1521_v42, %v1493_v44  ;;  %v1537_v61 = vmul.f32 %v1533_v6, %v5114_v10  ;;  %v1564_v5 = vperm.slane %v4331_v56, 3 }
 0x39c   :  { %v1565_v34 = vperm.slane %v4335_v48, 3  ;;  %v1574_v26 = vadd.f32 %v4261_v58, %v1558_v13  ;;  %v1619_v2 = vadd.f32 %v1615_v49, %v1603_v63  ;;  %v1580_v31 = vperm.slane %v4331_v56, 4 }
 0x39d   :  { %v1540_v40 = vadd.f32 %v1536_v28, %v1524_v8  ;;  %v1541_v16 = vadd.f32 %v1537_v61, %v1525_v47  ;;  %v1552_v21 = vmul.f32 %v1548_v41, %v4117_v32  ;;  %v1553_v18 = vmul.f32 %v1549_v1, %v4117_v32 }
 0x39e   :  { %v1581_v11 = vperm.slane %v4335_v48, 4  ;;  %v1590_v19 = vadd.f32 %v4272_v30, %v1574_v26  ;;  %v1568_v10 = vmul.f32 %v1564_v5, %v4085_v17  ;;  %v1569_v52 = vmul.f32 %v1565_v34, %v4085_v17  ;;  %v4393_v5 = vpop.permute.xlu2 %1736 }
 0x39f   :  { %v1596_v12 = vperm.slane %v4331_v56, 5  ;;  %v4372_v58 = vadd.f32 %v1631_v51, %v1619_v2  ;;  %v1597_v49 = vperm.slane %v4335_v48, 5  ;;  %v1556_v54 = vadd.f32 %v1552_v21, %v1540_v40  ;;  %v1640_v51 = vpop.permute.xlu1 %1639 }
 0x3a0   :  { %v1557_v38 = vadd.f32 %v1553_v18, %v1541_v16  ;;  %v1606_v53 = vadd.f32 %v4294_v4, %v1590_v19  ;;  %v1584_v32 = vmul.f32 %v1580_v31, %v5122_v20  ;;  %v1585_v24 = vmul.f32 %v1581_v11, %v5122_v20 }
 0x3a1   :  { %v1612_v30 = vperm.slane %v4331_v56, 6  ;;  %v1572_v6 = vadd.f32 %v1568_v10, %v1556_v54  ;;  %v1613_v17 = vperm.slane %v4335_v48, 6  ;;  %v1628_v55 = vperm.slane %v4331_v56, 7 }
 0x3a2   :  { %v1573_v43 = vadd.f32 %v1569_v52, %v1557_v38  ;;  %v1622_v22 = vadd.f32 %v4301_v59, %v1606_v53  ;;  %v1600_v42 = vmul.f32 %v1596_v12, %v4175_v33  ;;  %v1629_v44 = vperm.slane %v4335_v48, 7 }
 0x3a3   :  { %v1660_v4 = vperm.slane %v4277_v14, 0  ;;  %v1588_v41 = vadd.f32 %v1584_v32, %v1572_v6  ;;  %v1601_v20 = vmul.f32 %v1597_v49, %v4175_v33  ;;  %v1616_v13 = vmul.f32 %v1612_v30, %v5132_v35 }
 0x3a4   :  { %v1589_v1 = vadd.f32 %v1585_v24, %v1573_v43  ;;  %v1638_v63 = vadd.f32 %v4307_v27, %v1622_v22  ;;  %v1617_v8 = vmul.f32 %v1613_v17, %v5132_v35  ;;  %v1632_v56 = vmul.f32 %v1628_v55, %v4220_v60 }
 0x3a5   :  { %v1661_v59 = vperm.slane %v4288_v50, 0  ;;  %v1604_v28 = vadd.f32 %v1600_v42, %v1588_v41  ;;  %v1633_v48 = vmul.f32 %v1629_v44, %v4220_v60  ;;  %v1664_v61 = vmul.f32 %v1660_v4, %v4185_v0 }
 0x3a6   :  { %v1605_v47 = vadd.f32 %v1601_v20, %v1589_v1  ;;  %v1676_v33 = vperm.slane %v4277_v14, 1  ;;  %v1677_v34 = vperm.slane %v4288_v50, 1  ;;  %v1740_v27 = vperm.slane %v4277_v14, 5 }
 0x3a7   :  { %v1741_v35 = vperm.slane %v4288_v50, 5  ;;  %v1620_v26 = vadd.f32 %v1616_v13, %v1604_v28  ;;  %v1665_v40 = vmul.f32 %v1661_v59, %v4185_v0  ;;  %v1772_v31 = vperm.slane %v4277_v14, 7  ;;  %v1721_v30 = vpop.permute.xlu1 %1720 }
 0x3a8   :  { %v1621_v2 = vadd.f32 %v1617_v8, %v1605_v47  ;;  %v1680_v60 = vmul.f32 %v1676_v33, %v4346_v57  ;;  %v1681_v16 = vmul.f32 %v1677_v34, %v4346_v57  ;;  %v4404_v21 = vmul.f32 %v1740_v27, %v4393_v5 }
 0x3a9   :  { %v4407_v18 = vmul.f32 %v1741_v35, %v4393_v5  ;;  %v1636_v11 = vadd.f32 %v1632_v56, %v1620_v26  ;;  %v1649_v10 = vsel %vm5139_vm7, %v1640_v51, %v4205_v23  ;;  %v1650_v52 = vsel %vm5140_vm8, %v4256_v46, %v1640_v51 }
 0x3aa   :  { %v1637_v19 = vadd.f32 %v1633_v48, %v1621_v2  ;;  %v1773_v12 = vperm.slane %v4288_v50, 7  ;;  %vm5141_vm10 = vcmp.lt.s32.totalorder %v5098_v7, 14  ;;  %vm5142_vm11 = vcmp.lt.s32.totalorder %v3064_v36, 14 }
 0x3ab   :  { %v4418_v49 = vsel %vm5141_vm10, %v1649_v10, 0.0  ;;  %v4422_v54 = vsel %vm5142_vm11, %v1650_v52, 0.0  ;;  %v1724_v38 = vperm.slane %v4277_v14, 4  ;;  %v1668_v53 = vadd.f32 %v1664_v61, %v1636_v11 }
 0x3ac   :  { %v1669_v32 = vadd.f32 %v1665_v40, %v1637_v19  ;;  %v1659_v23 = vperm.slane %v4418_v49, 0  ;;  %v1662_v24 = vperm.slane %v4422_v54, 0  ;;  %v1675_v46 = vperm.slane %v4418_v49, 1 }
 0x3ad   :  { %v1678_v6 = vperm.slane %v4422_v54, 1  ;;  %v1691_v43 = vperm.slane %v4418_v49, 2  ;;  %v1694_v17 = vperm.slane %v4422_v54, 2  ;;  %v1684_v55 = vadd.f32 %v1680_v60, %v1668_v53  ;;  %v1769_v53 = vpop.permute.xlu0 %1768 }
 0x3ae   :  { %v1685_v51 = vadd.f32 %v1681_v16, %v1669_v32  ;;  %v1663_v22 = vmul.f32 %v1659_v23, %v4185_v0  ;;  %v1666_v42 = vmul.f32 %v1662_v24, %v4185_v0  ;;  %v1679_v44 = vmul.f32 %v1675_v46, %v4346_v57 }
 0x3af   :  { %v1682_v4 = vmul.f32 %v1678_v6, %v4346_v57  ;;  %v1695_v41 = vmul.f32 %v1691_v43, %v4322_v62  ;;  %v1698_v1 = vmul.f32 %v1694_v17, %v4322_v62  ;;  %v1700_v20 = vadd.f32 %v4341_v37, %v1684_v55  ;;  %v1753_v19 = vpop.permute.xlu1 %1752 }
 0x3b0   :  { %v1701_v13 = vadd.f32 %v4352_v15, %v1685_v51  ;;  %v1667_v8 = vadd.f32 %v1663_v22, %v4372_v58  ;;  %v1670_v56 = vadd.f32 %v1666_v42, %v1638_v63  ;;  %v1707_v59 = vperm.slane %v4418_v49, 3 }
 0x3b1   :  { %v1710_v28 = vperm.slane %v4422_v54, 3  ;;  %v1723_v0 = vperm.slane %v4418_v49, 4  ;;  %v1725_v47 = vperm.slane %v4288_v50, 4  ;;  %v1716_v61 = vadd.f32 %v4311_v9, %v1700_v20 }
 0x3b2   :  { %v1683_v57 = vadd.f32 %v1679_v44, %v1667_v8  ;;  %v1686_v48 = vadd.f32 %v1682_v4, %v1670_v56  ;;  %v1717_v62 = vadd.f32 %v4320_v25, %v1701_v13  ;;  %v1711_v37 = vmul.f32 %v1707_v59, %v4297_v3 }
 0x3b3   :  { %v1714_v15 = vmul.f32 %v1710_v28, %v4297_v3  ;;  %v1726_v58 = vperm.slane %v4422_v54, 4  ;;  %v1727_v63 = vmul.f32 %v1723_v0, %v1721_v30  ;;  %v1728_v27 = vmul.f32 %v1724_v38, %v1721_v30 }
 0x3b4   :  { %v1699_v33 = vadd.f32 %v1695_v41, %v1683_v57  ;;  %v1702_v34 = vadd.f32 %v1698_v1, %v1686_v48  ;;  %v1729_v35 = vmul.f32 %v1725_v47, %v1721_v30  ;;  %v1739_v2 = vperm.slane %v4418_v49, 5 }
 0x3b5   :  { %v1730_v26 = vmul.f32 %v1726_v58, %v1721_v30  ;;  %v1742_v40 = vperm.slane %v4422_v54, 5  ;;  %v1755_v9 = vperm.slane %v4418_v49, 6  ;;  %v1732_v16 = vadd.f32 %v1728_v27, %v1716_v61 }
 0x3b6   :  { %v1715_v60 = vadd.f32 %v1711_v37, %v1699_v33  ;;  %v1718_v25 = vadd.f32 %v1714_v15, %v1702_v34  ;;  %v1733_v11 = vadd.f32 %v1729_v35, %v1717_v62  ;;  %v1743_v3 = vmul.f32 %v1739_v2, %v4393_v5  ;;  %v5143_v62 = vld [vmem:[#allocation32_spill] sm:$0xff] }
 0x3b7   :  { %v1746_v10 = vmul.f32 %v1742_v40, %v4393_v5  ;;  %v1756_v52 = vperm.slane %v4277_v14, 6  ;;  %v1757_v38 = vperm.slane %v4288_v50, 6  ;;  %v1748_v24 = vadd.f32 %v4404_v21, %v1732_v16 }
 0x3b8   :  { %v1731_v32 = vadd.f32 %v1727_v63, %v1715_v60  ;;  %v1734_v23 = vadd.f32 %v1730_v26, %v1718_v25  ;;  %v1749_v30 = vadd.f32 %v4407_v18, %v1733_v11  ;;  %v1758_v46 = vperm.slane %v4422_v54, 6  ;;  %v4487_v26 = vld [vmem:[#allocation5] sm:$0xff] }
 0x3b9   :  { %v1759_v6 = vmul.f32 %v1755_v9, %v1753_v19  ;;  %v1760_v43 = vmul.f32 %v1756_v52, %v1753_v19  ;;  %v1761_v17 = vmul.f32 %v1757_v38, %v1753_v19  ;;  %v1771_v5 = vperm.slane %v4418_v49, 7  ;;  %v2685_v38 = vld [vmem:[#allocation7] sm:$0xff] }
 0x3ba   :  { %v1747_v55 = vadd.f32 %v1743_v3, %v1731_v32  ;;  %v1750_v51 = vadd.f32 %v1746_v10, %v1734_v23  ;;  %v1774_v22 = vperm.slane %v4422_v54, 7  ;;  %v1776_v42 = vmul.f32 %v1772_v31, %v1769_v53 }
 0x3bb   :  { %v1762_v44 = vmul.f32 %v1758_v46, %v1753_v19  ;;  %v1764_v4 = vadd.f32 %v1760_v43, %v1748_v24  ;;  %v1765_v41 = vadd.f32 %v1761_v17, %v1749_v30  ;;  %v1777_v21 = vmul.f32 %v1773_v12, %v1769_v53 }
 0x3bc   :  { %v1763_v18 = vadd.f32 %v1759_v6, %v1747_v55  ;;  %v1775_v1 = vmul.f32 %v1771_v5, %v1769_v53  ;;  %v1778_v56 = vmul.f32 %v1774_v22, %v1769_v53  ;;  %v2877_v27 = vmov 101   ;;  %v5145_v5 = vld [vmem:[#allocation16_spill] sm:$0xff] }
 0x3bd   :  { %v1766_v20 = vadd.f32 %v1762_v44, %v1750_v51  ;;  %v4465_v13 = vadd.f32 %v1776_v42, %v1764_v4  ;;  %v4469_v49 = vadd.f32 %v1777_v21, %v1765_v41  ;;  %2640 = vset.pattern.permute.xlu1 %v2877_v27  ;;  %v2878_v35 = vmov 100   ;;  %v5146_v42 = vld [vmem:[#allocation17_spill] sm:$0xff]  ;;  %v5147_v4 = vld [vmem:[#allocation18_spill] sm:$0xff]  ;;  %v5148_v21 = vld [vmem:[#allocation19_spill] sm:$0xff] }
 0x3be   :  { %v4467_v8 = vadd.f32 %v1775_v1, %v1763_v18  ;;  %2639 = vset.pattern.permute.xlu2 %v2878_v35  ;;  %v2879_v9 = vmov 78   ;;  %v2880_v60 = vmov 77   ;;  %v2881_v10 = vmov 80  }
 0x3bf   :  { %v1790_v14 = vmul.f32 %v4465_v13, %v4465_v13  ;;  %v4473_v31 = vadd.f32 %v1778_v56, %v1766_v20  ;;  %v1791_v59 = vmul.f32 %v4469_v49, %v4469_v49  ;;  %v2882_v52 = vmov 79   ;;  %v5149_v20 = vld [vmem:[#allocation24_spill] sm:$0xff] }
 0x3c0   :  { %v1783_v54 = vadd.f32 %v4465_v13, %v4467_v8  ;;  %v1789_v50 = vmul.f32 %v4467_v8, %v4467_v8  ;;  %v2883_v23 = vmov 83   ;;  %v2884_v24 = vmov 85  }
 0x3c1   :  { %v1792_v47 = vmul.f32 %v4473_v31, %v4473_v31  ;;  %v2885_v30 = vmov 76   ;;  %v5144_v46 = vmov 3   ;;  %v2886_v6 = vmov 82  }
 0x3c2   :  { %v1784_v12 = vadd.f32 %v1783_v54, %v4469_v49  ;;  %v1793_v28 = vadd.f32 %v1790_v14, %v1789_v50  ;;  %v2887_v43 = vmov 88   ;;  %v2888_v17 = vmov 84   ;;  %v5150_v14 = vld [vmem:[#allocation25_spill] sm:$0xff]  ;;  %v5151_v50 = vld [vmem:[#allocation26_spill] sm:$0xff] }
 0x3c3   :  { %v2889_v51 = vmov 87   ;;  %v2895_v35 = vmov 91  }
 0x3c4   :  { %v1785_v0 = vadd.f32 %v1784_v12, %v4473_v31  ;;  %v1794_v57 = vadd.f32 %v1793_v28, %v1791_v59  ;;  %v5152_v59 = vld [vmem:[#allocation27_spill] sm:$0xff] }
 0x3c6   :  { %1786 = vadd.xlane.f32.xlu2 %v1785_v0  ;;  %v1795_v48 = vadd.f32 %v1794_v57, %v1792_v47 }
 0x3c8   :  { %1796 = vadd.xlane.f32.xlu1 %v1795_v48 }
 0x3de   :  { %1842 = vperm.xlu2 %2639, %v4487_v26  }
 0x3e1   :  { %1854 = vperm.xlu1 %2640, %v4487_v26  }
 0x3e6   :  { %2642 = vset.pattern.permute.xlu2 %v2880_v60 }
 0x3e7   :  { %1976 = vperm.xlu2 %2642, %v4487_v26  }
 0x3e9   :  { %2643 = vset.pattern.permute.xlu1 %v2879_v9 }
 0x3ea   :  { %1992 = vperm.xlu1 %2643, %v4487_v26  }
 0x3ef   :  { %2644 = vset.pattern.permute.xlu2 %v2882_v52 }
 0x3f0   :  { %2008 = vperm.xlu2 %2644, %v4487_v26  }
 0x3f2   :  { %2645 = vset.pattern.permute.xlu1 %v2881_v10 }
 0x3f3   :  { %2024 = vperm.xlu1 %2645, %v4487_v26  }
 0x3f8   :  { %2648 = vset.pattern.permute.xlu2 %v2886_v6 }
 0x3f9   :  { %2056 = vperm.xlu2 %2648, %v4487_v26  }
 0x3fb   :  { %2649 = vset.pattern.permute.xlu1 %v2883_v23  ;;  %v2900_v23 = vmov 102  }
 0x3fc   :  { %2072 = vperm.xlu1 %2649, %v4487_v26  }
 0x401   :  { %2650 = vset.pattern.permute.xlu2 %v2888_v17  ;;  %v5154_v17 = vmov 6  }
 0x402   :  { %2088 = vperm.xlu2 %2650, %v4487_v26  }
 0x404   :  { %2651 = vset.pattern.permute.xlu1 %v2884_v24 }
 0x405   :  { %2104 = vperm.xlu1 %2651, %v4487_v26  }
 0x40a   :  { %2653 = vset.pattern.permute.xlu2 %v2889_v51 }
 0x40b   :  { %2136 = vperm.xlu2 %2653, %v4487_v26  }
 0x40d   :  { %2654 = vset.pattern.permute.xlu1 %v2887_v43  ;;  %v2903_v43 = vmov 99  }
 0x40e   :  { %2152 = vperm.xlu1 %2654, %v4487_v26  }
 0x439   :  { %v1787_v61 = vpop.xlane.xlu2 %1786 }
 0x43a   :  { %v1788_v37 = vmul.f32 %v1787_v61, %v5143_v62  ;;  %v2890_v61 = vmov 89  }
 0x43b   :  { %v1797_v15 = vpop.xlane.xlu1 %1796  ;;  %2655 = vset.pattern.permute.xlu2 %v2890_v61 }
 0x43c   :  { %v1799_v58 = vmul.f32 %v1788_v37, %v1788_v37  ;;  %v1798_v63 = vmul.f32 %v1797_v15, %v5143_v62  ;;  %2168 = vperm.xlu2 %2655, %v4487_v26  }
 0x43e   :  { %v1800_v33 = vsub.f32 %v1798_v63, %v1799_v58  ;;  %v2891_v58 = vmov 81   ;;  %v2892_v63 = vmov 86  }
 0x440   :  { %v1801_v34 = vadd.f32 1e-05, %v1800_v33  ;;  %v2893_v33 = vmov 90  }
 0x441   :  { %v1843_v55 = vpop.permute.xlu2 %1842  ;;  %2656 = vset.pattern.permute.xlu1 %v2893_v33 }
 0x442   :  { %2677 = vrsqrt.f32 %v1801_v34  ;;  %vm1808_vm13 = vweird.f32 %v1801_v34  ;;  %v1845_v22 = vmul.f32 %v1843_v55, %v5145_v5  ;;  %v1846_v44 = vmul.f32 %v1843_v55, %v5146_v42 }
 0x443   :  { %v1847_v41 = vmul.f32 %v1843_v55, %v5147_v4  ;;  %v1848_v18 = vmul.f32 %v1843_v55, %v5148_v21  ;;  %v2904_v55 = vmov 98   ;;  %v5155_v5 = vmov 4  }
 0x448   :  { %v2678_v2 = vpop.eup %2677 }
 0x449   :  { %v1803_v40 = vmul.f32 %v2678_v2, %v1801_v34  ;;  %vm1809_vm12 = vweird.f32 %v2678_v2  ;;  %v2894_v34 = vmov 93   ;;  %v4558_v24 = vpop.permute.xlu2 %1976 }
 0x44a   :  { %vm1810_vm14 = vmor %vm1808_vm13, %vm1809_vm12  ;;  %2659 = vset.pattern.permute.xlu2 %v2894_v34 }
 0x44b   :  { %v1804_v25 = vmul.f32 %v2678_v2, %v1803_v40 }
 0x44d   :  { %v1805_v16 = vmul.f32 0.5, %v1804_v25 }
 0x44f   :  { %v1806_v11 = vsub.f32 1.5, %v1805_v16 }
 0x451   :  { %v1807_v19 = vmul.f32 %v2678_v2, %v1806_v11  ;;  %v4565_v6 = vpop.permute.xlu2 %2008 }
 0x453   :  { %v1811_v3 = vsel %vm1810_vm14, %v2678_v2, %v1807_v19  ;;  %v1855_v1 = vpop.permute.xlu1 %1854 }
 0x454   :  { %v1812_v53 = vmul.f32 %v2685_v38, %v1811_v3  ;;  %v1857_v56 = vmul.f32 %v1855_v1, %v5149_v20  ;;  %v1858_v54 = vmul.f32 %v1855_v1, %v5150_v14  ;;  %v1859_v12 = vmul.f32 %v1855_v1, %v5151_v50 }
 0x455   :  { %v1860_v28 = vmul.f32 %v1855_v1, %v5152_v59 }
 0x456   :  { %v1813_v32 = vmul.f32 %v1812_v53, %v1788_v37  ;;  %v4512_v0 = vadd.f32 %v1857_v56, %v1845_v22  ;;  %v4514_v47 = vadd.f32 %v1858_v54, %v1846_v44  ;;  %v4516_v57 = vadd.f32 %v1859_v12, %v1847_v41 }
 0x457   :  { %v4518_v48 = vadd.f32 %v1860_v28, %v1848_v18  ;;  %v5156_v22 = vmov 7  }
 0x458   :  { %1815 = vrot.lane.b32.xlu0 %v1813_v32, %s2806_s27  ;;  %v2899_v32 = vmov 95  }
 0x459   :  { %5153 = vst [vmem:[#allocation49_spill] sm:$0xff] %v4518_v48  ;;  %v4570_v51 = vpop.permute.xlu2 %2056 }
 0x45c   :  { %v4574_v42 = vpop.permute.xlu1 %1992 }
 0x460   :  { %1821 = vperm.xlu0 %2638, %v1812_v53   ;;  %v2897_v53 = vmov 92  }
 0x461   :  { %v4576_v44 = vpop.permute.xlu2 %2088 }
 0x465   :  { %v4578_v4 = vpop.permute.xlu1 %2024 }
 0x468   :  { %2641 = vset.pattern.permute.xlu0 %v2885_v30  ;;  %v2901_v30 = vmov 97  }
 0x469   :  { %1960 = vperm.xlu0 %2641, %v4487_v26   ;;  %v4580_v41 = vpop.permute.xlu2 %2136 }
 0x46e   :  { %v4582_v21 = vpop.permute.xlu1 %2072 }
 0x471   :  { %2646 = vset.pattern.permute.xlu0 %v5144_v46  ;;  %v2902_v46 = vmov 103  }
 0x477   :  { %v2105_v1 = vpop.permute.xlu1 %2104 }
 0x480   :  { %v2153_v50 = vpop.permute.xlu1 %2152 }
 0x496   :  { %v2169_v18 = vpop.permute.xlu2 %2168 }
 0x4ca   :  { %v1816_v37 = vpop.permute.xlu0 %1815 }
 0x4cb   :  { %v1818_v15 = vsub.f32 %v2685_v38, %v1816_v37  ;;  %v2896_v38 = vmov 96  }
 0x4cd   :  { %1830 = vperm.xlu0 %2646, %v1818_v15  }
 0x4d2   :  { %v1822_v27 = vpop.permute.xlu0 %1821 }
 0x4d3   :  { %v1824_v40 = vmul.f32 %v1822_v27, %v4467_v8  ;;  %v1826_v9 = vmul.f32 %v1822_v27, %v4469_v49  ;;  %v1827_v60 = vmul.f32 %v1822_v27, %v4473_v31  ;;  %v1825_v8 = vmul.f32 %v1822_v27, %v4465_v13 }
 0x4d4   :  { %v2898_v13 = vmov 94  }
 0x4d5   :  { %2647 = vset.pattern.permute.xlu0 %v2891_v58 }
 0x4d6   :  { %2040 = vperm.xlu0 %2647, %v4487_v26  }
 0x4db   :  { %v4523_v2 = vpop.permute.xlu0 %1960 }
 0x4de   :  { %2652 = vset.pattern.permute.xlu0 %v2892_v63 }
 0x4df   :  { %2120 = vperm.xlu0 %2652, %v4487_v26  }
 0x4e7   :  { %2657 = vset.pattern.permute.xlu0 %v2895_v35 }
 0x53f   :  { %v1831_v25 = vpop.permute.xlu0 %1830 }
 0x540   :  { %v1833_v16 = vadd.f32 %v1831_v25, %v1824_v40  ;;  %v1835_v11 = vadd.f32 %v1831_v25, %v1826_v9  ;;  %v1836_v19 = vadd.f32 %v1831_v25, %v1827_v60  ;;  %v1834_v49 = vadd.f32 %v1831_v25, %v1825_v8 }
 0x542   :  { %v4528_v3 = vmax.f32 %v1833_v16, 0.0  ;;  %v4530_v10 = vmax.f32 %v1835_v11, 0.0  ;;  %v4532_v52 = vmax.f32 %v1836_v19, 0.0  ;;  %v4541_v31 = vmax.f32 %v1834_v49, 0.0 }
 0x544   :  { %1949 = vrot.lane.b32.xlu2 %v4532_v52, %s2806_s27  ;;  %1947 = vrot.lane.b32.xlu1 %v4530_v10, %s2806_s27  ;;  %v2155_v56 = vperm.slane %v4528_v3, 4  ;;  %v2156_v14 = vperm.slane %v4541_v31, 4  ;;  %v2157_v54 = vperm.slane %v4530_v10, 4  ;;  %v2158_v12 = vperm.slane %v4532_v52, 4 }
 0x545   :  { %1943 = vrot.lane.b32.xlu0 %v4528_v3, %s2806_s27  ;;  %v2171_v59 = vperm.slane %v4528_v3, 5  ;;  %v2172_v28 = vperm.slane %v4541_v31, 5  ;;  %v2173_v37 = vperm.slane %v4530_v10, 5  ;;  %v2174_v15 = vperm.slane %v4532_v52, 5 }
 0x546   :  { %v4598_v58 = vmul.f32 %v2155_v56, %v2153_v50  ;;  %v4600_v63 = vmul.f32 %v2156_v14, %v2153_v50  ;;  %v4602_v33 = vmul.f32 %v2157_v54, %v2153_v50  ;;  %v2110_v34 = vperm.slane %v4532_v52, 1 }
 0x547   :  { %v4605_v27 = vmul.f32 %v2158_v12, %v2153_v50  ;;  %v4607_v35 = vmul.f32 %v2171_v59, %v2169_v18  ;;  %v4609_v40 = vmul.f32 %v2172_v28, %v2169_v18  ;;  %v2094_v9 = vperm.slane %v4532_v52, 0 }
 0x548   :  { %5158 = vst [vmem:[#allocation50_spill] sm:$0xff] %v4600_v63  ;;  %v4612_v60 = vmul.f32 %v2173_v37, %v2169_v18  ;;  %v4614_v25 = vmul.f32 %v2174_v15, %v2169_v18  ;;  %v2123_v16 = vperm.slane %v4528_v3, 2  ;;  %v2091_v19 = vperm.slane %v4528_v3, 0 }
 0x549   :  { %5159 = vst [vmem:[#allocation38_spill] sm:$0xff] %v4602_v33  ;;  %v2124_v8 = vperm.slane %v4541_v31, 2  ;;  %v2125_v49 = vperm.slane %v4530_v10, 2  ;;  %v2093_v18 = vperm.slane %v4530_v10, 0  ;;  %v2140_v56 = vperm.slane %v4541_v31, 3 }
 0x54a   :  { %5160 = vst [vmem:[#allocation33_spill] sm:$0xff] %v4609_v40  ;;  %v2141_v59 = vperm.slane %v4530_v10, 3  ;;  %v2189_v37 = vperm.slane %v4530_v10, 6 }
 0x54b   :  { %5161 = vst [vmem:[#allocation56_spill] sm:$0xff] %v4612_v60  ;;  %v4667_v15 = vmul.f32 %v2093_v18, %v4576_v44 }
 0x54c   :  { %2248 = vperm.xlu2 %2659, %v4487_v26   ;;  %2184 = vperm.xlu1 %2656, %v4487_v26  }
 0x54d   :  { %1945 = vrot.lane.b32.xlu0 %v4541_v31, %s2806_s27 }
 0x554   :  { %2662 = vset.pattern.permute.xlu2 %v2896_v38  ;;  %2658 = vset.pattern.permute.xlu1 %v2897_v53  ;;  %v2142_v38 = vperm.slane %v4532_v52, 3  ;;  %v2107_v53 = vperm.slane %v4528_v3, 1 }
 0x555   :  { %2200 = vperm.xlu0 %2657, %v4487_v26   ;;  %2296 = vperm.xlu2 %2662, %v4487_v26  }
 0x556   :  { %2232 = vperm.xlu1 %2658, %v4487_v26   ;;  %v4641_v54 = vmul.f32 %v2107_v53, %v2105_v1  ;;  %v4644_v50 = vmul.f32 %v2142_v38, %v4580_v41  ;;  %v4679_v38 = vmul.f32 %v2141_v59, %v4580_v41 }
 0x558   :  { %5167 = vst [vmem:[#allocation53_spill] sm:$0xff] %v4679_v38 }
 0x55d   :  { %2215 = vrot.lane.b32.xlu0 %v4528_v3, %s2811_s28  ;;  %2217 = vrot.lane.b32.xlu2 %v4541_v31, %s2811_s28 }
 0x55e   :  { %2660 = vset.pattern.permute.xlu1 %v2898_v13  ;;  %2661 = vset.pattern.permute.xlu0 %v2899_v32  ;;  %v2126_v13 = vperm.slane %v4532_v52, 2  ;;  %v4623_v32 = vmul.f32 %v2110_v34, %v2105_v1 }
 0x55f   :  { %2264 = vperm.xlu1 %2660, %v4487_v26   ;;  %2664 = vset.pattern.permute.xlu2 %v2900_v23 }
 0x565   :  { %2280 = vperm.xlu0 %2661, %v4487_v26   ;;  %2221 = vrot.lane.b32.xlu2 %v4532_v52, %s2811_s28 }
 0x567   :  { %2219 = vrot.lane.b32.xlu1 %v4530_v10, %s2811_s28 }
 0x568   :  { %2663 = vset.pattern.permute.xlu1 %v2901_v30  ;;  %v2139_v30 = vperm.slane %v4528_v3, 3 }
 0x56a   :  { %v4649_v28 = vmul.f32 %v2139_v30, %v4580_v41 }
 0x56d   :  { %2666 = vset.pattern.permute.xlu0 %v2902_v46  ;;  %1866 = vperm.xlu2 %2664, %v4487_v26   ;;  %v4628_v46 = vmul.f32 %v2094_v9, %v4576_v44 }
 0x56e   :  { %1878 = vperm.xlu0 %2666, %v4487_v26  }
 0x56f   :  { %2312 = vperm.xlu1 %2663, %v4487_v26  }
 0x575   :  { %2667 = vset.pattern.permute.xlu2 %v2903_v43 }
 0x576   :  { %2344 = vperm.xlu2 %2667, %v4487_v26   ;;  %2668 = vset.pattern.permute.xlu0 %v5154_v17  ;;  %v2108_v17 = vperm.slane %v4541_v31, 1 }
 0x577   :  { %2665 = vset.pattern.permute.xlu1 %v2904_v55  ;;  %v2109_v55 = vperm.slane %v4530_v10, 1 }
 0x578   :  { %2328 = vperm.xlu1 %2665, %v4487_v26   ;;  %v4586_v26 = vpop.permute.xlu0 %2040 }
 0x579   :  { %v4656_v53 = vmul.f32 %v2109_v55, %v2105_v1 }
 0x57b   :  { %5164 = vst [vmem:[#allocation51_spill] sm:$0xff] %v4656_v53 }
 0x57e   :  { %2669 = vset.pattern.permute.xlu2 %v5155_v5  ;;  %v4634_v5 = vmul.f32 %v2091_v19, %v4576_v44  ;;  %v4654_v19 = vmul.f32 %v2108_v17, %v2105_v1  ;;  %v4670_v17 = vmul.f32 %v2140_v56, %v4580_v41 }
 0x580   :  { %2670 = vset.pattern.permute.xlu1 %v5156_v22  ;;  %v2121_v11 = vpop.permute.xlu0 %2120  ;;  %v2092_v22 = vperm.slane %v4541_v31, 0  ;;  %5163 = vst [vmem:[#allocation61_spill] sm:$0xff] %v4654_v19 }
 0x581   :  { %5165 = vst [vmem:[#allocation34_spill] sm:$0xff] %v4670_v17  ;;  %v4672_v1 = vmul.f32 %v2123_v16, %v2121_v11  ;;  %v4674_v55 = vmul.f32 %v2124_v8, %v2121_v11  ;;  %v4684_v56 = vmul.f32 %v2125_v49, %v2121_v11  ;;  %v4686_v8 = vmul.f32 %v2126_v13, %v2121_v11 }
 0x582   :  { %v4664_v43 = vmul.f32 %v2092_v22, %v4576_v44 }
 0x583   :  { %5166 = vst [vmem:[#allocation40_spill] sm:$0xff] %v4674_v55 }
 0x584   :  { %5168 = vst [vmem:[#allocation44_spill] sm:$0xff] %v4684_v56 }
 0x59e   :  { %v4584_v20 = vpop.permute.xlu2 %1949 }
 0x5a6   :  { %v4594_v61 = vpop.permute.xlu2 %2248 }
 0x5a7   :  { %5157 = vst [vmem:[#allocation57_spill] sm:$0xff] %v4594_v61 }
 0x5af   :  { %v4639_v14 = vpop.permute.xlu2 %2296 }
 0x5b0   :  { %5162 = vst [vmem:[#allocation39_spill] sm:$0xff] %v4639_v14 }
 0x5b6   :  { %v1948_v9 = vpop.permute.xlu1 %1947 }
 0x5b7   :  { %v1951_v30 = vsel %vm426_vm15, %v1948_v9, %v4584_v20  ;;  %v1944_v12 = vpop.permute.xlu0 %1943 }
 0x5b8   :  { %v1958_v23 = vsel %vm80_vm2, %v1951_v30, 0.0  ;;  %v1954_v16 = vsel %vm426_vm15, %v4584_v20, %v1944_v12  ;;  %vm5203_vm2 = vmmov %vm5136_vm5 }
 0x5b9   :  { %v1966_v34 = vperm.slane %v1958_v23, 0  ;;  %v1982_v62 = vperm.slane %v1958_v23, 1  ;;  %v1998_v22 = vperm.slane %v1958_v23, 2  ;;  %v2014_v14 = vperm.slane %v1958_v23, 3 }
 0x5ba   :  { %v2030_v60 = vperm.slane %v1958_v23, 4  ;;  %v2046_v44 = vperm.slane %v1958_v23, 5  ;;  %v2062_v18 = vperm.slane %v1958_v23, 6  ;;  %v2078_v63 = vperm.slane %v1958_v23, 7 }
 0x5bb   :  { %v1970_v30 = vmul.f32 %v1966_v34, %v4523_v2  ;;  %v1986_v41 = vmul.f32 %v1982_v62, %v4558_v24  ;;  %v2002_v59 = vmul.f32 %v1998_v22, %v4574_v42  ;;  %v2018_v40 = vmul.f32 %v2014_v14, %v4565_v6  ;;  %v4697_v62 = vpop.permute.xlu2 %2217 }
 0x5bc   :  { %v2034_v33 = vmul.f32 %v2030_v60, %v4578_v4  ;;  %v2050_v38 = vmul.f32 %v2046_v44, %v4586_v26  ;;  %v2066_v20 = vmul.f32 %v2062_v18, %v4570_v51  ;;  %v1955_v11 = vsel %vm77_vm0, %v1954_v16, 0.0 }
 0x5bd   :  { %v1990_v61 = vadd.f32 %v1986_v41, %v1970_v30  ;;  %v1963_v49 = vperm.slane %v1955_v11, 0  ;;  %v1979_v13 = vperm.slane %v1955_v11, 1  ;;  %v1995_v34 = vperm.slane %v1955_v11, 2 }
 0x5be   :  { %v2011_v17 = vperm.slane %v1955_v11, 3  ;;  %v2027_v48 = vperm.slane %v1955_v11, 4  ;;  %v2043_v14 = vperm.slane %v1955_v11, 5  ;;  %v2059_v56 = vperm.slane %v1955_v11, 6  ;;  %v4699_v60 = vpop.permute.xlu1 %2184 }
 0x5bf   :  { %v2006_v22 = vadd.f32 %v2002_v59, %v1990_v61  ;;  %v1946_v23 = vpop.permute.xlu0 %1945  ;;  %v2082_v44 = vmul.f32 %v2078_v63, %v4582_v21  ;;  %v1967_v18 = vmul.f32 %v1963_v49, %v4523_v2  ;;  %v1983_v30 = vmul.f32 %v1979_v13, %v4558_v24 }
 0x5c0   :  { %v1999_v16 = vmul.f32 %v1995_v34, %v4574_v42  ;;  %v2015_v55 = vmul.f32 %v2011_v17, %v4565_v6  ;;  %v2031_v36 = vmul.f32 %v2027_v48, %v4578_v4  ;;  %v2047_v61 = vmul.f32 %v2043_v14, %v4586_v26 }
 0x5c1   :  { %v2022_v41 = vadd.f32 %v2018_v40, %v2006_v22  ;;  %v1987_v59 = vadd.f32 %v1983_v30, %v1967_v18  ;;  %v2063_v7 = vmul.f32 %v2059_v56, %v4570_v51  ;;  %v2075_v53 = vperm.slane %v1955_v11, 7 }
 0x5c2   :  { %v5169_v63 = vperm.slane %v4528_v3, 6  ;;  %v5170_v13 = vperm.slane %v4541_v31, 6  ;;  %v4720_v17 = vmul.f32 %v2189_v37, %v4699_v60  ;;  %v1952_v48 = vsel %vm426_vm15, %v1946_v23, %v1948_v9 }
 0x5c3   :  { %v2038_v49 = vadd.f32 %v2034_v33, %v2022_v41  ;;  %v2003_v34 = vadd.f32 %v1999_v16, %v1987_v59  ;;  %v2079_v56 = vmul.f32 %v2075_v53, %v4582_v21  ;;  %v1953_v11 = vsel %vm426_vm15, %v1944_v12, %v1946_v23 }
 0x5c4   :  { %v4712_v19 = vmul.f32 %v5169_v63, %v4699_v60  ;;  %v4717_v40 = vmul.f32 %v5170_v13, %v4699_v60  ;;  %5171 = vst [vmem:[#allocation52_spill] sm:$0xff] %v4720_v17  ;;  %v4729_v33 = vsel %vm79_vm3, %v1952_v48, 0.0  ;;  %v1956_v14 = vsel %vm78_vm1, %v1953_v11, 0.0  ;;  %vm5199_vm1 = vmmov %vm5137_vm6 }
 0x5c5   :  { %v2054_v22 = vadd.f32 %v2050_v38, %v2038_v49  ;;  %v1965_v37 = vperm.slane %v4729_v33, 0  ;;  %v1981_v18 = vperm.slane %v4729_v33, 1  ;;  %v2019_v30 = vadd.f32 %v2015_v55, %v2003_v34  ;;  %v4743_v55 = vpop.permute.xlu2 %2221 }
 0x5c6   :  { %v1964_v9 = vperm.slane %v1956_v14, 0  ;;  %v1980_v16 = vperm.slane %v1956_v14, 1  ;;  %v1996_v41 = vperm.slane %v1956_v14, 2  ;;  %v1997_v23 = vperm.slane %v4729_v33, 2 }
 0x5c7   :  { %v2070_v53 = vadd.f32 %v2066_v20, %v2054_v22  ;;  %v1969_v59 = vmul.f32 %v1965_v37, %v4523_v2  ;;  %v1985_v12 = vmul.f32 %v1981_v18, %v4558_v24  ;;  %v4738_v63 = vpop.permute.xlu0 %2200  ;;  %v2035_v38 = vadd.f32 %v2031_v36, %v2019_v30 }
 0x5c8   :  { %v1968_v49 = vmul.f32 %v1964_v9, %v4523_v2  ;;  %v1984_v13 = vmul.f32 %v1980_v16, %v4558_v24  ;;  %v2000_v48 = vmul.f32 %v1996_v41, %v4574_v42  ;;  %v2001_v20 = vmul.f32 %v1997_v23, %v4574_v42  ;;  %v4747_v17 = vpop.permute.xlu1 %2232 }
 0x5c9   :  { %v2086_v34 = vadd.f32 %v2082_v44, %v2070_v53  ;;  %v1989_v11 = vadd.f32 %v1985_v12, %v1969_v59  ;;  %v2012_v22 = vperm.slane %v1956_v14, 3  ;;  %v2051_v37 = vadd.f32 %v2047_v61, %v2035_v38 }
 0x5ca   :  { %v1988_v18 = vadd.f32 %v1984_v13, %v1968_v49  ;;  %v2013_v39 = vperm.slane %v4729_v33, 3  ;;  %v2028_v45 = vperm.slane %v1956_v14, 4  ;;  %v2029_v30 = vperm.slane %v4729_v33, 4 }
 0x5cb   :  { %v2102_v36 = vadd.f32 %v4628_v46, %v2086_v34  ;;  %v2005_v2 = vadd.f32 %v2001_v20, %v1989_v11  ;;  %v2016_v24 = vmul.f32 %v2012_v22, %v4565_v6  ;;  %v2067_v9 = vadd.f32 %v2063_v7, %v2051_v37 }
 0x5cc   :  { %v2004_v44 = vadd.f32 %v2000_v48, %v1988_v18  ;;  %v2017_v16 = vmul.f32 %v2013_v39, %v4565_v6  ;;  %v2032_v42 = vmul.f32 %v2028_v45, %v4578_v4  ;;  %v2033_v41 = vmul.f32 %v2029_v30, %v4578_v4 }
 0x5cd   :  { %v2118_v61 = vadd.f32 %v4623_v32, %v2102_v36  ;;  %v2044_v53 = vperm.slane %v1956_v14, 5  ;;  %v2045_v59 = vperm.slane %v4729_v33, 5  ;;  %v2083_v12 = vadd.f32 %v2079_v56, %v2067_v9  ;;  %v1867_v36 = vpop.permute.xlu2 %1866 }
 0x5ce   :  { %v2020_v46 = vadd.f32 %v2016_v24, %v2004_v44  ;;  %v2021_v23 = vadd.f32 %v2017_v16, %v2005_v2  ;;  %v2060_v38 = vperm.slane %v1956_v14, 6  ;;  %v5172_v7 = vperm.slane %v4532_v52, 6 }
 0x5cf   :  { %v2134_v49 = vadd.f32 %v4686_v8, %v2118_v61  ;;  %v2048_v39 = vmul.f32 %v2044_v53, %v4586_v26  ;;  %v2061_v45 = vperm.slane %v4729_v33, 6  ;;  %v2216_v6 = vpop.permute.xlu0 %2215  ;;  %v2099_v4 = vadd.f32 %v4634_v5, %v2083_v12 }
 0x5d0   :  { %v2194_v13 = vmul.f32 %v5172_v7, %v4699_v60  ;;  %v2036_v32 = vadd.f32 %v2032_v42, %v2020_v46  ;;  %v2037_v48 = vadd.f32 %v2033_v41, %v2021_v23  ;;  %v2049_v56 = vmul.f32 %v2045_v59, %v4586_v26  ;;  %v5177_v42 = vld [vmem:[#allocation21_spill] sm:$0xff]  ;;  %v5180_v23 = vld [vmem:[#allocation23_spill] sm:$0xff] }
 0x5d1   :  { %v2150_v34 = vadd.f32 %v4644_v50, %v2134_v49  ;;  %v2064_v11 = vmul.f32 %v2060_v38, %v4570_v51  ;;  %v2076_v8 = vperm.slane %v1956_v14, 7  ;;  %v2077_v20 = vperm.slane %v4729_v33, 7 }
 0x5d2   :  { %v2115_v60 = vadd.f32 %v4641_v54, %v2099_v4  ;;  %v2052_v22 = vadd.f32 %v2048_v39, %v2036_v32  ;;  %v2053_v37 = vadd.f32 %v2049_v56, %v2037_v48  ;;  %v2065_v18 = vmul.f32 %v2061_v45, %v4570_v51  ;;  %v4782_v51 = vpop.permute.xlu1 %2264  ;;  %v5183_v32 = vld [vmem:[#allocation12_spill] sm:$0xff] }
 0x5d3   :  { %v2166_v5 = vadd.f32 %v4605_v27, %v2150_v34  ;;  %v2080_v2 = vmul.f32 %v2076_v8, %v4582_v21  ;;  %v2081_v26 = vmul.f32 %v2077_v20, %v4582_v21  ;;  %v5173_v50 = vperm.slane %v4528_v3, 7  ;;  %v5176_v3 = vld [vmem:[#allocation20_spill] sm:$0xff] }
 0x5d4   :  { %v2131_v14 = vadd.f32 %v4672_v1, %v2115_v60  ;;  %v2068_v33 = vadd.f32 %v2064_v11, %v2052_v22  ;;  %v2069_v30 = vadd.f32 %v2065_v18, %v2053_v37  ;;  %v5174_v54 = vperm.slane %v4541_v31, 7  ;;  %v5178_v31 = vld [vmem:[#allocation22_spill] sm:$0xff]  ;;  %v5187_v8 = vld [vmem:[#allocation40_spill] sm:$0xff]  ;;  %v5189_v18 = vld [vmem:[#allocation49_spill] sm:$0xff] }
 0x5d5   :  { %v2207_v24 = vmul.f32 %v5173_v50, %v4738_v63  ;;  %v2182_v27 = vadd.f32 %v4614_v25, %v2166_v5  ;;  %v5175_v21 = vperm.slane %v4530_v10, 7  ;;  %v1869_v16 = vmul.f32 %v1867_v36, %v5176_v3  ;;  %v5188_v60 = vld [vmem:[#allocation44_spill] sm:$0xff]  ;;  %v5190_v50 = vld [vmem:[#allocation34_spill] sm:$0xff] }
 0x5d6   :  { %v4780_v9 = vmul.f32 %v5174_v54, %v4738_v63  ;;  %v1870_v1 = vmul.f32 %v1867_v36, %v5177_v42  ;;  %v2147_v61 = vadd.f32 %v4649_v28, %v2131_v14  ;;  %v2084_v41 = vadd.f32 %v2080_v2, %v2068_v33  ;;  %v5191_v33 = vld [vmem:[#allocation53_spill] sm:$0xff] }
 0x5d7   :  { %v4788_v44 = vmul.f32 %v5175_v21, %v4738_v63  ;;  %v2085_v53 = vadd.f32 %v2081_v26, %v2069_v30  ;;  %v1871_v59 = vmul.f32 %v1867_v36, %v5178_v31  ;;  %v2198_v12 = vadd.f32 %v2194_v13, %v2182_v27  ;;  %v4807_v45 = vpop.permute.xlu0 %2280  ;;  %v5192_v21 = vld [vmem:[#allocation57_spill] sm:$0xff] }
 0x5d8   :  { %v5179_v46 = vperm.slane %v4532_v52, 7  ;;  %v1872_v38 = vmul.f32 %v1867_v36, %v5180_v23  ;;  %v4799_v10 = vadd.f32 %v1869_v16, %v4512_v0  ;;  %v2163_v49 = vadd.f32 %v4598_v58, %v2147_v61  ;;  %v5193_v61 = vld [vmem:[#allocation50_spill] sm:$0xff] }
 0x5d9   :  { %v2100_v7 = vadd.f32 %v4664_v43, %v2084_v41  ;;  %v2101_v28 = vadd.f32 %v4667_v15, %v2085_v53  ;;  %v4805_v39 = vadd.f32 %v1870_v1, %v4514_v47  ;;  %v4810_v52 = vadd.f32 %v1871_v59, %v4516_v57  ;;  %v5181_v15 = vld [vmem:[#allocation61_spill] sm:$0xff]  ;;  %v5182_v47 = vld [vmem:[#allocation51_spill] sm:$0xff]  ;;  %v5194_v53 = vld [vmem:[#allocation38_spill] sm:$0xff] }
 0x5da   :  { %v2210_v25 = vmul.f32 %v5179_v46, %v4738_v63  ;;  %v2225_v0 = vsel %vm624_vm4, %v2216_v6, %v4697_v62  ;;  %v2226_v58 = vsel %vm624_vm4, %v4743_v55, %v2216_v6  ;;  %v2179_v43 = vadd.f32 %v4607_v35, %v2163_v49  ;;  %v5185_v57 = vld [vmem:[#allocation13_spill] sm:$0xff]  ;;  %v2220_v27 = vpop.permute.xlu1 %2219  ;;  %v4849_v46 = vpop.permute.xlu2 %2344 }
 0x5db   :  { %v2116_v63 = vadd.f32 %v5181_v15, %v2100_v7  ;;  %v2117_v4 = vadd.f32 %v5182_v47, %v2101_v28  ;;  %vm5184_vm15 = vcmp.lt.s32.totalorder %v5183_v32, 15  ;;  %vm5186_vm0 = vcmp.lt.s32.totalorder %v5185_v57, 15  ;;  %v5195_v49 = vld [vmem:[#allocation33_spill] sm:$0xff]  ;;  %v5196_v28 = vld [vmem:[#allocation56_spill] sm:$0xff] }
 0x5dc   :  { %v2214_v13 = vadd.f32 %v2210_v25, %v2198_v12  ;;  %v4823_v48 = vsel %vm5184_vm15, %v2225_v0, 0.0  ;;  %v4827_v56 = vsel %vm5186_vm0, %v2226_v58, 0.0  ;;  %v2195_v35 = vadd.f32 %v4712_v19, %v2179_v43  ;;  %v5197_v57 = vld [vmem:[#allocation52_spill] sm:$0xff] }
 0x5dd   :  { %v2235_v34 = vperm.slane %v4823_v48, 0  ;;  %v2251_v11 = vperm.slane %v4823_v48, 1  ;;  %v2267_v6 = vperm.slane %v4823_v48, 2  ;;  %v2132_v20 = vadd.f32 %v5187_v8, %v2116_v63 }
 0x5de   :  { %v2133_v22 = vadd.f32 %v5188_v60, %v2117_v4  ;;  %v2238_v37 = vperm.slane %v4827_v56, 0  ;;  %v1876_v36 = vadd.f32 %v1872_v38, %v5189_v18  ;;  %v2254_v2 = vperm.slane %v4827_v56, 1  ;;  %v5200_v60 = vld [vmem:[#allocation28_spill] sm:$0xff] }
 0x5df   :  { %v2239_v5 = vmul.f32 %v2235_v34, %v4747_v17  ;;  %v2270_v26 = vperm.slane %v4827_v56, 2  ;;  %v2148_v14 = vadd.f32 %v5190_v50, %v2132_v20  ;;  %v2211_v54 = vadd.f32 %v2207_v24, %v2195_v35 }
 0x5e0   :  { %v2149_v30 = vadd.f32 %v5191_v33, %v2133_v22  ;;  %v2242_v19 = vmul.f32 %v2238_v37, %v4747_v17  ;;  %v2255_v3 = vmul.f32 %v2251_v11, %v5192_v21  ;;  %v2258_v16 = vmul.f32 %v2254_v2, %v5192_v21  ;;  %v1879_v15 = vpop.permute.xlu0 %1878  ;;  %v5201_v37 = vld [vmem:[#allocation29_spill] sm:$0xff] }
 0x5e1   :  { %v2271_v42 = vmul.f32 %v2267_v6, %v4782_v51  ;;  %v2347_v1 = vperm.slane %v4823_v48, 7  ;;  %v2164_v41 = vadd.f32 %v5193_v61, %v2148_v14  ;;  %v2243_v59 = vadd.f32 %v2239_v5, %v2211_v54  ;;  %v5204_v14 = vld [vmem:[#allocation30_spill] sm:$0xff] }
 0x5e2   :  { %v2165_v31 = vadd.f32 %v5194_v53, %v2149_v30  ;;  %v2246_v12 = vadd.f32 %v2242_v19, %v2214_v13  ;;  %v2274_v24 = vmul.f32 %v2270_v26, %v4782_v51  ;;  %v2350_v25 = vperm.slane %v4827_v56, 7  ;;  %v5205_v19 = vld [vmem:[#allocation31_spill] sm:$0xff] }
 0x5e3   :  { %v2283_v23 = vperm.slane %v4823_v48, 3  ;;  %v2286_v38 = vperm.slane %v4827_v56, 3  ;;  %v2180_v7 = vadd.f32 %v5195_v49, %v2164_v41  ;;  %v2259_v58 = vadd.f32 %v2255_v3, %v2243_v59 }
 0x5e4   :  { %v2181_v0 = vadd.f32 %v5196_v28, %v2165_v31  ;;  %v2262_v43 = vadd.f32 %v2258_v16, %v2246_v12  ;;  %v4858_v63 = vmul.f32 %v2347_v1, %v4849_v46  ;;  %v2223_v4 = vsel %vm624_vm4, %v2220_v27, %v4743_v55 }
 0x5e5   :  { %v2287_v13 = vmul.f32 %v2283_v23, %v4807_v45  ;;  %v2290_v47 = vmul.f32 %v2286_v38, %v4807_v45  ;;  %v2196_v32 = vadd.f32 %v4717_v40, %v2180_v7  ;;  %v2275_v11 = vadd.f32 %v2271_v42, %v2259_v58  ;;  %v5206_v58 = vld [vmem:[#allocation39_spill] sm:$0xff] }
 0x5e6   :  { %v2197_v34 = vadd.f32 %v5197_v57, %v2181_v0  ;;  %v2278_v6 = vadd.f32 %v2274_v24, %v2262_v43  ;;  %v2224_v35 = vsel %vm624_vm4, %v4697_v62, %v2220_v27  ;;  %v4872_v20 = vsel %vm5199_vm1, %v2223_v4, 0.0  ;;  %v2313_v27 = vpop.permute.xlu1 %2312 }
 0x5e7   :  { %v1881_v22 = vmul.f32 %v1879_v15, %v5200_v60  ;;  %v1882_v18 = vmul.f32 %v1879_v15, %v5201_v37  ;;  %v2212_v55 = vadd.f32 %v4780_v9, %v2196_v32  ;;  %v2291_v5 = vadd.f32 %v2287_v13, %v2275_v11 }
 0x5e8   :  { %v2213_v40 = vadd.f32 %v4788_v44, %v2197_v34  ;;  %v2294_v2 = vadd.f32 %v2290_v47, %v2278_v6  ;;  %v4880_v50 = vsel %vm5203_vm2, %v2224_v35, 0.0  ;;  %v2237_v29 = vperm.slane %v4872_v20, 0 }
 0x5e9   :  { %v2253_v62 = vperm.slane %v4872_v20, 1  ;;  %v1883_v33 = vmul.f32 %v1879_v15, %v5204_v14  ;;  %v2236_v30 = vperm.slane %v4880_v50, 0  ;;  %v2252_v54 = vperm.slane %v4880_v50, 1 }
 0x5ea   :  { %v1884_v9 = vmul.f32 %v1879_v15, %v5205_v19  ;;  %v4889_v44 = vadd.f32 %v1881_v22, %v4799_v10  ;;  %v4892_v3 = vadd.f32 %v1882_v18, %v4805_v39  ;;  %v2241_v42 = vmul.f32 %v2237_v29, %v4747_v17 }
 0x5eb   :  { %v4895_v16 = vadd.f32 %v1883_v33, %v4810_v52  ;;  %v2257_v1 = vmul.f32 %v2253_v62, %v5192_v21  ;;  %v2240_v41 = vmul.f32 %v2236_v30, %v4747_v17  ;;  %v2256_v53 = vmul.f32 %v2252_v54, %v5192_v21 }
 0x5ec   :  { %v4899_v61 = vadd.f32 %v1884_v9, %v1876_v36  ;;  %v2268_v10 = vperm.slane %v4880_v50, 2  ;;  %v2245_v31 = vadd.f32 %v2241_v42, %v2213_v40  ;;  %v2269_v59 = vperm.slane %v4872_v20, 2 }
 0x5ed   :  { %v2284_v39 = vperm.slane %v4880_v50, 3  ;;  %v2285_v52 = vperm.slane %v4872_v20, 3  ;;  %v2244_v12 = vadd.f32 %v2240_v41, %v2212_v55  ;;  %v2299_v23 = vperm.slane %v4823_v48, 4 }
 0x5ee   :  { %v2272_v24 = vmul.f32 %v2268_v10, %v4782_v51  ;;  %v2300_v36 = vperm.slane %v4880_v50, 4  ;;  %v2261_v38 = vadd.f32 %v2257_v1, %v2245_v31  ;;  %v2273_v17 = vmul.f32 %v2269_v59, %v4782_v51  ;;  %v2329_v37 = vpop.permute.xlu1 %2328 }
 0x5ef   :  { %v2288_v21 = vmul.f32 %v2284_v39, %v4807_v45  ;;  %v2289_v49 = vmul.f32 %v2285_v52, %v4807_v45  ;;  %v2260_v7 = vadd.f32 %v2256_v53, %v2244_v12  ;;  %v2301_v28 = vperm.slane %v4872_v20, 4 }
 0x5f0   :  { %v2302_v0 = vperm.slane %v4827_v56, 4  ;;  %v2303_v43 = vmul.f32 %v2299_v23, %v5206_v58  ;;  %v2277_v15 = vadd.f32 %v2273_v17, %v2261_v38  ;;  %v2304_v13 = vmul.f32 %v2300_v36, %v5206_v58 }
 0x5f1   :  { %v2315_v47 = vperm.slane %v4823_v48, 5  ;;  %v2316_v4 = vperm.slane %v4880_v50, 5  ;;  %v2276_v32 = vadd.f32 %v2272_v24, %v2260_v7  ;;  %v2305_v51 = vmul.f32 %v2301_v28, %v5206_v58 }
 0x5f2   :  { %v2306_v57 = vmul.f32 %v2302_v0, %v5206_v58  ;;  %v2307_v45 = vadd.f32 %v2303_v43, %v2291_v5  ;;  %v2293_v34 = vadd.f32 %v2289_v49, %v2277_v15  ;;  %v2317_v11 = vperm.slane %v4872_v20, 5 }
 0x5f3   :  { %v2318_v6 = vperm.slane %v4827_v56, 5  ;;  %v2319_v35 = vmul.f32 %v2315_v47, %v2313_v27  ;;  %v2292_v8 = vadd.f32 %v2288_v21, %v2276_v32  ;;  %v2320_v22 = vmul.f32 %v2316_v4, %v2313_v27 }
 0x5f4   :  { %v2310_v60 = vadd.f32 %v2306_v57, %v2294_v2  ;;  %v2331_v18 = vperm.slane %v4823_v48, 6  ;;  %v2309_v55 = vadd.f32 %v2305_v51, %v2293_v34  ;;  %v2321_v40 = vmul.f32 %v2317_v11, %v2313_v27  ;;  %v5207_v57 = vld [vmem:[#allocation32_spill] sm:$0xff] }
 0x5f5   :  { %v2322_v26 = vmul.f32 %v2318_v6, %v2313_v27  ;;  %v2323_v29 = vadd.f32 %v2319_v35, %v2307_v45  ;;  %v2308_v62 = vadd.f32 %v2304_v13, %v2292_v8  ;;  %v2332_v14 = vperm.slane %v4880_v50, 6 }
 0x5f6   :  { %v2333_v5 = vperm.slane %v4872_v20, 6  ;;  %v2334_v33 = vperm.slane %v4827_v56, 6  ;;  %v2325_v30 = vadd.f32 %v2321_v40, %v2309_v55  ;;  %v2335_v19 = vmul.f32 %v2331_v18, %v2329_v37 }
 0x5f7   :  { %v2326_v54 = vadd.f32 %v2322_v26, %v2310_v60  ;;  %v2348_v2 = vperm.slane %v4880_v50, 7  ;;  %v2324_v9 = vadd.f32 %v2320_v22, %v2308_v62  ;;  %v2336_v42 = vmul.f32 %v2332_v14, %v2329_v37 }
 0x5f8   :  { %v2337_v1 = vmul.f32 %v2333_v5, %v2329_v37  ;;  %v2338_v48 = vmul.f32 %v2334_v33, %v2329_v37  ;;  %v2339_v41 = vadd.f32 %v2335_v19, %v2323_v29  ;;  %v2349_v27 = vperm.slane %v4872_v20, 7 }
 0x5f9   :  { %v2352_v53 = vmul.f32 %v2348_v2, %v4849_v46  ;;  %v1889_v10 = vadd.f32 %v4892_v3, %v4889_v44  ;;  %v2340_v31 = vadd.f32 %v2336_v42, %v2324_v9  ;;  %v1895_v52 = vmul.f32 %v4889_v44, %v4889_v44 }
 0x5fa   :  { %v2341_v59 = vadd.f32 %v2337_v1, %v2325_v30  ;;  %v2342_v39 = vadd.f32 %v2338_v48, %v2326_v54  ;;  %v2353_v50 = vmul.f32 %v2349_v27, %v4849_v46  ;;  %v4936_v12 = vadd.f32 %v4858_v63, %v2339_v41  ;;  %v2686_v48 = vld [vmem:[#allocation7] sm:$0xff] }
 0x5fb   :  { %v1890_v24 = vadd.f32 %v1889_v10, %v4895_v16  ;;  %v1896_v20 = vmul.f32 %v4892_v3, %v4892_v3  ;;  %v2354_v23 = vmul.f32 %v2350_v25, %v4849_v46  ;;  %v4944_v36 = vadd.f32 %v2352_v53, %v2340_v31 }
 0x5fc   :  { %v4946_v38 = vadd.f32 %v2353_v50, %v2341_v59  ;;  %v1897_v21 = vmul.f32 %v4895_v16, %v4895_v16  ;;  %v2365_v28 = vmul.f32 %v4936_v12, %v4936_v12  ;;  %v1898_v46 = vmul.f32 %v4899_v61, %v4899_v61 }
 0x5fd   :  { %v1891_v17 = vadd.f32 %v1890_v24, %v4899_v61  ;;  %v1899_v63 = vadd.f32 %v1896_v20, %v1895_v52  ;;  %v4951_v49 = vadd.f32 %v2354_v23, %v2342_v39  ;;  %v2359_v7 = vadd.f32 %v4944_v36, %v4936_v12 }
 0x5fe   :  { %v2366_v56 = vmul.f32 %v4944_v36, %v4944_v36  ;;  %v2367_v58 = vmul.f32 %v4946_v38, %v4946_v38  ;;  %v5208_v39 = vmov 5  }
 0x5ff   :  { %1892 = vadd.xlane.f32.xlu1 %v1891_v17  ;;  %v1900_v25 = vadd.f32 %v1899_v63, %v1897_v21  ;;  %v2360_v0 = vadd.f32 %v2359_v7, %v4946_v38  ;;  %v2368_v47 = vmul.f32 %v4951_v49, %v4951_v49 }
 0x600   :  { %v2369_v43 = vadd.f32 %v2366_v56, %v2365_v28 }
 0x601   :  { %v1901_v15 = vadd.f32 %v1900_v25, %v1898_v46  ;;  %v2361_v13 = vadd.f32 %v2360_v0, %v4951_v49 }
 0x602   :  { %v2370_v4 = vadd.f32 %v2369_v43, %v2367_v58 }
 0x603   :  { %1902 = vadd.xlane.f32.xlu0 %v1901_v15  ;;  %2362 = vadd.xlane.f32.xlu2 %v2361_v13 }
 0x604   :  { %v2371_v32 = vadd.f32 %v2370_v4, %v2368_v47 }
 0x607   :  { %2372 = vadd.xlane.f32.xlu1 %v2371_v32 }
 0x672   :  { %v1893_v51 = vpop.xlane.xlu1 %1892 }
 0x673   :  { %v1894_v45 = vmul.f32 %v1893_v51, %v5207_v57 }
 0x675   :  { %v1905_v34 = vmul.f32 %v1894_v45, %v1894_v45 }
 0x676   :  { %v1903_v11 = vpop.xlane.xlu0 %1902  ;;  %v2363_v35 = vpop.xlane.xlu2 %2362 }
 0x677   :  { %v1904_v6 = vmul.f32 %v1903_v11, %v5207_v57  ;;  %v2364_v8 = vmul.f32 %v2363_v35, %v5207_v57 }
 0x679   :  { %v1906_v60 = vsub.f32 %v1904_v6, %v1905_v34  ;;  %v2375_v22 = vmul.f32 %v2364_v8, %v2364_v8 }
 0x67a   :  { %v2373_v37 = vpop.xlane.xlu1 %2372 }
 0x67b   :  { %v1907_v18 = vadd.f32 1e-05, %v1906_v60  ;;  %v2374_v55 = vmul.f32 %v2373_v37, %v5207_v57 }
 0x67d   :  { %2679 = vrsqrt.f32 %v1907_v18  ;;  %v2376_v40 = vsub.f32 %v2374_v55, %v2375_v22  ;;  %vm1914_vm4 = vweird.f32 %v1907_v18 }
 0x67f   :  { %v2377_v26 = vadd.f32 1e-05, %v2376_v40 }
 0x681   :  { %2681 = vrsqrt.f32 %v2377_v26  ;;  %vm2384_vm6 = vweird.f32 %v2377_v26 }
 0x683   :  { %v2680_v29 = vpop.eup %2679 }
 0x684   :  { %v1909_v62 = vmul.f32 %v2680_v29, %v1907_v18  ;;  %vm1915_vm3 = vweird.f32 %v2680_v29 }
 0x685   :  { %vm1916_vm9 = vmor %vm1914_vm4, %vm1915_vm3 }
 0x686   :  { %v1910_v14 = vmul.f32 %v2680_v29, %v1909_v62 }
 0x687   :  { %v2682_v5 = vpop.eup %2681 }
 0x688   :  { %v1911_v33 = vmul.f32 0.5, %v1910_v14  ;;  %v2379_v30 = vmul.f32 %v2682_v5, %v2377_v26  ;;  %vm2385_vm5 = vweird.f32 %v2682_v5 }
 0x689   :  { %vm2386_vm7 = vmor %vm2384_vm6, %vm2385_vm5 }
 0x68a   :  { %v1912_v54 = vsub.f32 1.5, %v1911_v33  ;;  %v2380_v19 = vmul.f32 %v2682_v5, %v2379_v30 }
 0x68c   :  { %v2381_v2 = vmul.f32 0.5, %v2380_v19  ;;  %v1913_v9 = vmul.f32 %v2680_v29, %v1912_v54 }
 0x68e   :  { %v2382_v42 = vsub.f32 1.5, %v2381_v2  ;;  %v1917_v1 = vsel %vm1916_vm9, %v2680_v29, %v1913_v9 }
 0x68f   :  { %v1918_v41 = vmul.f32 %v2686_v48, %v1917_v1 }
 0x690   :  { %v2383_v27 = vmul.f32 %v2682_v5, %v2382_v42 }
 0x691   :  { %1927 = vperm.xlu0 %2668, %v1918_v41   ;;  %v1919_v53 = vmul.f32 %v1918_v41, %v1894_v45 }
 0x692   :  { %v2387_v10 = vsel %vm2386_vm7, %v2682_v5, %v2383_v27 }
 0x693   :  { %1921 = vrot.lane.b32.xlu2 %v1919_v53, %s2806_s27  ;;  %v2388_v31 = vmul.f32 %v2686_v48, %v2387_v10 }
 0x695   :  { %v2389_v59 = vmul.f32 %v2388_v31, %v2364_v8 }
 0x697   :  { %2391 = vrot.lane.b32.xlu1 %v2389_v59, %s2806_s27 }
 0x699   :  { %2672 = vset.pattern.permute.xlu0 %v5208_v39 }
 0x69b   :  { %2397 = vperm.xlu2 %2669, %v2388_v31  }
 0x6a3   :  { %2671 = vset.pattern.permute.xlu2 %v5208_v39 }
 0x6ed   :  { %v1922_v52 = vpop.permute.xlu2 %1921 }
 0x6ee   :  { %v1924_v50 = vsub.f32 %v2686_v48, %v1922_v52 }
 0x6f0   :  { %1936 = vperm.xlu1 %2670, %v1924_v50  }
 0x6f5   :  { %v2398_v23 = vpop.permute.xlu2 %2397 }
 0x6f6   :  { %v2400_v46 = vmul.f32 %v2398_v23, %v4936_v12  ;;  %v2401_v25 = vmul.f32 %v2398_v23, %v4944_v36  ;;  %v2402_v0 = vmul.f32 %v2398_v23, %v4946_v38  ;;  %v2403_v58 = vmul.f32 %v2398_v23, %v4951_v49 }
 0x703   :  { %v1928_v17 = vpop.permute.xlu0 %1927 }
 0x704   :  { %v1930_v63 = vmul.f32 %v1928_v17, %v4889_v44  ;;  %v1931_v7 = vmul.f32 %v1928_v17, %v4892_v3  ;;  %v1932_v28 = vmul.f32 %v1928_v17, %v4895_v16  ;;  %v1933_v56 = vmul.f32 %v1928_v17, %v4899_v61 }
 0x709   :  { %v2392_v24 = vpop.permute.xlu1 %2391 }
 0x70a   :  { %v2394_v20 = vsub.f32 %v2686_v48, %v2392_v24 }
 0x70c   :  { %2406 = vperm.xlu2 %2671, %v2394_v20  }
 0x762   :  { %v1937_v21 = vpop.permute.xlu1 %1936 }
 0x763   :  { %v1939_v43 = vadd.f32 %v1937_v21, %v1930_v63  ;;  %v1940_v15 = vadd.f32 %v1937_v21, %v1931_v7  ;;  %v1941_v13 = vadd.f32 %v1937_v21, %v1932_v28  ;;  %v1942_v47 = vadd.f32 %v1937_v21, %v1933_v56 }
 0x766   :  { %v2407_v4 = vpop.permute.xlu2 %2406 }
 0x767   :  { %v2409_v44 = vadd.f32 %v2407_v4, %v2400_v46  ;;  %v2410_v32 = vadd.f32 %v2407_v4, %v2401_v25  ;;  %v2411_v3 = vadd.f32 %v2407_v4, %v2402_v0  ;;  %v2412_v51 = vadd.f32 %v2407_v4, %v2403_v58 }
 0x769   :  { %v2413_v16 = vadd.f32 %v2409_v44, %v1939_v43  ;;  %v2414_v57 = vadd.f32 %v2410_v32, %v1940_v15  ;;  %v2415_v61 = vadd.f32 %v2411_v3, %v1941_v13  ;;  %v2416_v45 = vadd.f32 %v2412_v51, %v1942_v47 }
 0x76b   :  { %v2417_v12 = vmax.f32 %v2413_v16, 0.0  ;;  %v2418_v34 = vmax.f32 %v2414_v57, 0.0  ;;  %v2419_v36 = vmax.f32 %v2415_v61, 0.0  ;;  %v2420_v38 = vmax.f32 %v2416_v45, 0.0 }
 0x76d   :  { %2421 = vst [vmem:[#allocation8] sm:$0xff] %v2417_v12 }
 0x76e   :  { %2422 = vst [vmem:[#allocation8 + $0x8] sm:$0xff] %v2418_v34 }
 0x76f   :  { %2423 = vst [vmem:[#allocation8 + $0x10] sm:$0xff] %v2419_v36 }
 0x770   :  { %2424 = vst [vmem:[#allocation8 + $0x18] sm:$0xff] %v2420_v38 }
 0x771   :  { %2435 = dma.vmem_to_hbm [thread:$0]  %s2431_s6, 512, %s2433_s9, [#allocation4]  }
 0x772   :  { %2787 = dma.done.wait [#allocation4], 512  }
 0x773   :  { %2788 = vsyncadd [#allocation4], 4294966784 }
 0x774   :  { %2440 = vsyncpa [#allocation3], 1 }
 0x775   :  { %2441 = vsyncpa [#allocation6], 1 }
 0x776   :  { %2442 = vsyncpa [#allocation4], 1 }

</bundles_post_ra>
